<compile_context>
chip_gen: v7x
topology: tpu7x:2x2x1
jax: 0.10.0
libtpu: 0.0.40
codegen_flags: <defaults>
</compile_context>

<pallas_src>
import jax
import jax.numpy as jnp
from jax.experimental import pallas as pl
from jax.experimental.pallas import tpu as pltpu


_CP = pltpu.CompilerParams(
    dimension_semantics=("parallel",),
    vmem_limit_bytes=32 * 1024 * 1024,
)

# Geometry of the synthetic config (32x32 input -> stem/2 -> 16x16 -> IR/2 -> 8x8).
_H1, _W1 = 16, 16            # spatial size after the stem (block0 / block1 input)
_H2, _W2 = 8, 8              # spatial size after block1 (block2 / head input)
_L1 = _H1 * _W1              # 256 rows
_L2 = _H2 * _W2              # 64 rows
_PAD1 = 24                   # zero-row halo for 16-wide slabs (>= W1+1, mult of 8)
_PAD2 = 16                   # zero-row halo for 8-wide slab   (>= W2+1, mult of 8)
_S1 = _PAD1 + _L1 + _PAD1    # 304
_S2 = _PAD2 + _L2 + _PAD2    # 96


# ---------------------------------------------------------------------------
# In-kernel helpers.
# ---------------------------------------------------------------------------
def _dw3x3(src_ref, start, width, n_rows, w_ref, b_ref):
  """Depthwise 3x3 (stride-1 taps, pad=1) + folded-BN bias + ReLU over a
  row-flattened slab with zero row-halos.  Width is NOT padded: image left /
  right edges are handled by per-column-offset masks, so no junk columns are
  produced and taps are grouped into 3 partial sums (less accumulator traffic
  than 9 full passes)."""
  w = w_ref[...]                                               # (9, C) f32
  col = jax.lax.broadcasted_iota(jnp.int32, (n_rows, 1), 0) % width
  groups = []
  for dj in range(3):
    acc = None
    for di in range(3):
      t = 3 * di + dj
      sl = src_ref[pl.ds(start + (di - 1) * width + (dj - 1), n_rows), :]
      c = sl * w[t:t + 1, :]
      acc = c if acc is None else acc + c
    groups.append(acc)
  y = (jnp.where(col > 0, groups[0], 0.0) + groups[1]
       + jnp.where(col < width - 1, groups[2], 0.0))
  return jnp.maximum(y + b_ref[...], 0.0)


def _squeeze_excite(y, wr_ref, br_ref, we_ref, be_ref, inv_count):
  """SE: global average pool -> 1x1 reduce + ReLU -> 1x1 expand -> sigmoid gate."""
  pooled = jnp.sum(y, axis=0, keepdims=True) * inv_count       # (1, C)
  s = jnp.maximum(
      jnp.dot(pooled, wr_ref[...], preferred_element_type=jnp.float32)
      + br_ref[...], 0.0)
  g = jax.nn.sigmoid(
      jnp.dot(s, we_ref[...], preferred_element_type=jnp.float32) + be_ref[...])
  return y * g


# ---------------------------------------------------------------------------
# The single fused kernel (one grid step per image).
# ---------------------------------------------------------------------------
def _efficientnet_kernel(
    x_ref,                                   # (1, 256, 32) bf16 stem im2col
    w_stem, b_stem,                          # stem conv (BN folded)
    w_dw0, b_dw0, w_se0r, b_se0r, w_se0e, b_se0e, w_pw0, b_pw0,        # block0
    w_pw1, b_pw1, w_dw1, b_dw1, w_se1r, b_se1r, w_se1e, b_se1e,
    w_pwl1, b_pwl1,                                                    # block1
    w_exp2, b_exp2, w_pwl2, b_pwl2,                                    # block2
    w_head, b_head, w_cls, b_cls,                                      # head
    o_ref,                                   # (1, 1, num_classes) f32
    a0_ref, mid_ref, dw1_ref, a2_ref,        # VMEM scratch slabs
):
  f32, bf16 = jnp.float32, jnp.bfloat16

  # Zero the row-halos of the padded slabs (scratch is uninitialised per step).
  a0_ref[pl.ds(0, _PAD1), :] = jnp.zeros((_PAD1, a0_ref.shape[1]), f32)
  a0_ref[pl.ds(_PAD1 + _L1, _PAD1), :] = jnp.zeros((_PAD1, a0_ref.shape[1]), f32)
  mid_ref[pl.ds(0, _PAD1), :] = jnp.zeros((_PAD1, mid_ref.shape[1]), f32)
  mid_ref[pl.ds(_PAD1 + _L1, _PAD1), :] = jnp.zeros((_PAD1, mid_ref.shape[1]), f32)
  a2_ref[pl.ds(0, _PAD2), :] = jnp.zeros((_PAD2, a2_ref.shape[1]), f32)
  a2_ref[pl.ds(_PAD2 + _L2, _PAD2), :] = jnp.zeros((_PAD2, a2_ref.shape[1]), f32)

  # ---- stem: conv3x3 s2 as ONE (256,32)x(32,8) bf16 matmul + BN + ReLU ------
  s = jnp.dot(x_ref[0], w_stem[...], preferred_element_type=f32) + b_stem[...]
  a0_ref[pl.ds(_PAD1, _L1), :] = jnp.maximum(s, 0.0)

  # ---- block0: DepthwiseSeparableConv (dw3x3 s1 -> SE -> pw1x1, +residual) --
  y = _dw3x3(a0_ref, _PAD1, _W1, _L1, w_dw0, b_dw0)
  y = _squeeze_excite(y, w_se0r, b_se0r, w_se0e, b_se0e, 1.0 / _L1)
  y = jnp.dot(y.astype(bf16), w_pw0[...], preferred_element_type=f32) + b_pw0[...]
  y = y + a0_ref[pl.ds(_PAD1, _L1), :]                     # residual = stem out

  # ---- block1: InvertedResidual s2 (pw expand -> dw3x3 s2 -> SE -> pwl) -----
  t = jnp.dot(y.astype(bf16), w_pw1[...], preferred_element_type=f32) + b_pw1[...]
  mid_ref[pl.ds(_PAD1, _L1), :] = jnp.maximum(t, 0.0)
  dw1_ref[...] = _dw3x3(mid_ref, _PAD1, _W1, _L1, w_dw1, b_dw1)
  # Compact to the 64 stride-2 anchors (one strided sublane read per out row)
  # BEFORE the SE gate and the pointwise-linear matmul.
  y = jnp.concatenate(
      [dw1_ref[pl.ds(2 * _W1 * oi, _W2, 2), :] for oi in range(_H2)], axis=0)
  y = _squeeze_excite(y, w_se1r, b_se1r, w_se1e, b_se1e, 1.0 / _L2)
  y = jnp.dot(y.astype(bf16), w_pwl1[...], preferred_element_type=f32) + b_pwl1[...]
  a2_ref[pl.ds(_PAD2, _L2), :] = y                          # (64, 16), no skip

  # ---- block2: EdgeResidual (3x3 expand via 9-tap lane-concat matmul) -------
  col8 = jax.lax.broadcasted_iota(jnp.int32, (_L2, 1), 0) % _W2
  taps = []
  for di in range(3):
    for dj in range(3):
      tp = a2_ref[pl.ds(_PAD2 + (di - 1) * _W2 + (dj - 1), _L2), :]
      if dj == 0:
        tp = jnp.where(col8 > 0, tp, 0.0)
      elif dj == 2:
        tp = jnp.where(col8 < _W2 - 1, tp, 0.0)
      taps.append(tp)
  patch = jnp.concatenate(taps, axis=1).astype(bf16)        # (64, 144)
  y = jnp.maximum(
      jnp.dot(patch, w_exp2[...], preferred_element_type=f32) + b_exp2[...], 0.0)
  y = jnp.dot(y.astype(bf16), w_pwl2[...], preferred_element_type=f32) + b_pwl2[...]
  y = y + a2_ref[pl.ds(_PAD2, _L2), :]                      # residual = block1 out

  # ---- head: conv1x1 + BN + ReLU -> global avg pool -> classifier -----------
  h = jnp.maximum(
      jnp.dot(y.astype(bf16), w_head[...], preferred_element_type=f32)
      + b_head[...], 0.0)
  pooled = jnp.sum(h, axis=0, keepdims=True) * (1.0 / _L2)
  o_ref[0] = jnp.dot(pooled, w_cls[...], preferred_element_type=f32) + b_cls[...]


# ---------------------------------------------------------------------------
# Parameters (deterministic, synthetic) + kernel-ready preparation.
# ---------------------------------------------------------------------------
def init_params(key):
  keys = iter(jax.random.split(key, 80))

  def w(shape, scl=0.1):
    return jax.random.normal(next(keys), shape, jnp.float32) * scl

  def bn(c, eps=1e-5):
    gamma = 1.0 + 0.1 * jax.random.normal(next(keys), (c,), jnp.float32)
    beta = 0.1 * jax.random.normal(next(keys), (c,), jnp.float32)
    mean = 0.1 * jax.random.normal(next(keys), (c,), jnp.float32)
    var = 1.0 + 0.1 * jnp.abs(jax.random.normal(next(keys), (c,), jnp.float32))
    s = gamma / jnp.sqrt(var + eps)            # folded inference BatchNorm
    b = beta - mean * s
    return s, b

  p = {}
  p['stem_w'] = w((8, 3, 3, 3));   p['stem_bn'] = bn(8)
  # block0: DS, in=8 out=8, se reduced=2
  p['b0'] = dict(dw_w=w((8, 1, 3, 3)), bn1=bn(8),
                 se_wr=w((2, 8, 1, 1)), se_br=w((2,)),
                 se_we=w((8, 2, 1, 1)), se_be=w((8,)),
                 pw_w=w((8, 8, 1, 1)), bn2=bn(8))
  # block1: IR, in=8 mid=32 out=16 s2, se reduced=2
  p['b1'] = dict(pw_w=w((32, 8, 1, 1)), bn1=bn(32),
                 dw_w=w((32, 1, 3, 3)), bn2=bn(32),
                 se_wr=w((2, 32, 1, 1)), se_br=w((2,)),
                 se_we=w((32, 2, 1, 1)), se_be=w((32,)),
                 pwl_w=w((16, 32, 1, 1)), bn3=bn(16))
  # block2: ER, in=16 mid=32 out=16, no SE
  p['b2'] = dict(exp_w=w((32, 16, 3, 3)), bn1=bn(32),
                 pwl_w=w((16, 32, 1, 1)), bn2=bn(16))
  p['head_w'] = w((64, 16, 1, 1)); p['head_bn'] = bn(64)
  p['cls_w'] = w((10, 64));        p['cls_b'] = w((10,))
  return p


def prepare_params(raw):
  """Fold inference BatchNorm into the conv weights, transpose to (Cin,Cout) /
  per-tap layouts, cast all MXU operands to bf16."""
  def row(v):
    return v.reshape(1, -1).astype(jnp.float32)

  def fold_pw(w_oihw, s):                      # 1x1 conv -> (Ci, Co) bf16
    co, ci = w_oihw.shape[:2]
    return (w_oihw.reshape(co, ci).T * s).astype(jnp.bfloat16)

  def fold_conv3x3(w_oihw, s):                 # full 3x3 -> (9*Ci, Co) bf16
    wt = jnp.transpose(w_oihw, (2, 3, 1, 0))   # (kh, kw, Ci, Co)
    co = wt.shape[-1]
    return (wt.reshape(-1, co) * s).astype(jnp.bfloat16)

  def fold_dw3x3(w_c1kk, s):                   # depthwise 3x3 -> (9, C) f32
    c = w_c1kk.shape[0]
    wt = jnp.transpose(w_c1kk[:, 0], (1, 2, 0)).reshape(9, c)
    return (wt * s).astype(jnp.float32)

  p = {}
  s, b = raw['stem_bn']
  w27 = fold_conv3x3(raw['stem_w'], s)                       # (27, 8)
  p['w_stem'] = jnp.pad(w27, ((0, 5), (0, 0)))               # pad K to 32
  p['b_stem'] = row(b)

  b0 = raw['b0']
  s1, bb1 = b0['bn1']; s2, bb2 = b0['bn2']
  p['w_dw0'] = fold_dw3x3(b0['dw_w'], s1); p['b_dw0'] = row(bb1)
  p['w_se0r'] = b0['se_wr'].reshape(2, 8).T.astype(jnp.float32)
  p['b_se0r'] = row(b0['se_br'])
  p['w_se0e'] = b0['se_we'].reshape(8, 2).T.astype(jnp.float32)
  p['b_se0e'] = row(b0['se_be'])
  p['w_pw0'] = fold_pw(b0['pw_w'], s2); p['b_pw0'] = row(bb2)

  b1 = raw['b1']
  s1, bb1 = b1['bn1']; s2, bb2 = b1['bn2']; s3, bb3 = b1['bn3']
  p['w_pw1'] = fold_pw(b1['pw_w'], s1); p['b_pw1'] = row(bb1)
  p['w_dw1'] = fold_dw3x3(b1['dw_w'], s2); p['b_dw1'] = row(bb2)
  p['w_se1r'] = b1['se_wr'].reshape(2, 32).T.astype(jnp.float32)
  p['b_se1r'] = row(b1['se_br'])
  p['w_se1e'] = b1['se_we'].reshape(32, 2).T.astype(jnp.float32)
  p['b_se1e'] = row(b1['se_be'])
  p['w_pwl1'] = fold_pw(b1['pwl_w'], s3); p['b_pwl1'] = row(bb3)

  b2 = raw['b2']
  s1, bb1 = b2['bn1']; s2, bb2 = b2['bn2']
  p['w_exp2'] = fold_conv3x3(b2['exp_w'], s1); p['b_exp2'] = row(bb1)  # (144,32)
  p['w_pwl2'] = fold_pw(b2['pwl_w'], s2); p['b_pwl2'] = row(bb2)

  s, b = raw['head_bn']
  p['w_head'] = fold_pw(raw['head_w'], s); p['b_head'] = row(b)
  p['w_cls'] = raw['cls_w'].T.astype(jnp.float32)
  p['b_cls'] = row(raw['cls_b'])
  return p


# ---------------------------------------------------------------------------
# Forward pass (matches EfficientNet.forward semantics, inference mode).
# ---------------------------------------------------------------------------
def forward(params, x_nchw):
  p = params
  n = x_nchw.shape[0]
  nc = p['b_cls'].shape[1]

  # Host-side im2col for the stem only: the 3-channel 32x32 input is tiny, and
  # this turns the stem into one lane-dense K=32 bf16 matmul inside the kernel
  # with a contiguous HBM read (instead of 12-byte rows).
  x = jnp.transpose(x_nchw, (0, 2, 3, 1)).astype(jnp.float32)        # NHWC
  xp = jnp.pad(x, ((0, 0), (1, 1), (1, 1), (0, 0)))                  # conv pad=1
  taps = [xp[:, di:di + 2 * _H1:2, dj:dj + 2 * _W1:2, :]             # stride-2
          for di in range(3) for dj in range(3)]
  col = jnp.concatenate(taps, axis=-1).reshape(n, _L1, 27)           # (n,256,27)
  col = jnp.pad(col, ((0, 0), (0, 0), (0, 5))).astype(jnp.bfloat16)  # K -> 32

  weights = (
      p['w_stem'], p['b_stem'],
      p['w_dw0'], p['b_dw0'], p['w_se0r'], p['b_se0r'], p['w_se0e'], p['b_se0e'],
      p['w_pw0'], p['b_pw0'],
      p['w_pw1'], p['b_pw1'], p['w_dw1'], p['b_dw1'],
      p['w_se1r'], p['b_se1r'], p['w_se1e'], p['b_se1e'],
      p['w_pwl1'], p['b_pwl1'],
      p['w_exp2'], p['b_exp2'], p['w_pwl2'], p['b_pwl2'],
      p['w_head'], p['b_head'], p['w_cls'], p['b_cls'],
  )

  in_specs = [pl.BlockSpec((1, _L1, 32), lambda i: (i, 0, 0))]
  in_specs += [pl.BlockSpec(w.shape, lambda i: (0, 0)) for w in weights]

  logits = pl.pallas_call(
      _efficientnet_kernel,
      out_shape=jax.ShapeDtypeStruct((n, 1, nc), jnp.float32),
      grid=(n,),
      in_specs=in_specs,
      out_specs=pl.BlockSpec((1, 1, nc), lambda i: (i, 0, 0)),
      scratch_shapes=[
          pltpu.VMEM((_S1, 8), jnp.float32),    # a0 : stem out / block0 slab
          pltpu.VMEM((_S1, 32), jnp.float32),   # mid: block1 expanded slab
          pltpu.VMEM((_L1, 32), jnp.float32),   # dw1: dense dw out (anchors read)
          pltpu.VMEM((_S2, 16), jnp.float32),   # a2 : block2 input slab
      ],
      compiler_params=_CP,
  )(col, *weights)
  return logits.reshape(n, nc)


if __name__ == "__main__":
  key = jax.random.PRNGKey(0)
  pkey, xkey = jax.random.split(key)
  params = prepare_params(init_params(pkey))
  x = jax.random.normal(xkey, (2, 3, 32, 32), jnp.float32)
  logits = jax.jit(forward)(params, x)
  jax.block_until_ready(logits)
  assert logits.shape == (2, 10), logits.shape
  assert bool(jnp.all(jnp.isfinite(logits)))
  print("KERNEL_OK")
</pallas_src>

<mosaic_0001>
module attributes {stable_mosaic.version = 11 : i64} {
  func.func @_efficientnet_kernel(%arg0: i32, %arg1: memref<1x256x32xbf16, #tpu.memory_space<vmem>>, %arg2: memref<32x8xbf16, #tpu.memory_space<vmem>>, %arg3: memref<1x8xf32, #tpu.memory_space<vmem>>, %arg4: memref<9x8xf32, #tpu.memory_space<vmem>>, %arg5: memref<1x8xf32, #tpu.memory_space<vmem>>, %arg6: memref<8x2xf32, #tpu.memory_space<vmem>>, %arg7: memref<1x2xf32, #tpu.memory_space<vmem>>, %arg8: memref<2x8xf32, #tpu.memory_space<vmem>>, %arg9: memref<1x8xf32, #tpu.memory_space<vmem>>, %arg10: memref<8x8xbf16, #tpu.memory_space<vmem>>, %arg11: memref<1x8xf32, #tpu.memory_space<vmem>>, %arg12: memref<8x32xbf16, #tpu.memory_space<vmem>>, %arg13: memref<1x32xf32, #tpu.memory_space<vmem>>, %arg14: memref<9x32xf32, #tpu.memory_space<vmem>>, %arg15: memref<1x32xf32, #tpu.memory_space<vmem>>, %arg16: memref<32x2xf32, #tpu.memory_space<vmem>>, %arg17: memref<1x2xf32, #tpu.memory_space<vmem>>, %arg18: memref<2x32xf32, #tpu.memory_space<vmem>>, %arg19: memref<1x32xf32, #tpu.memory_space<vmem>>, %arg20: memref<32x16xbf16, #tpu.memory_space<vmem>>, %arg21: memref<1x16xf32, #tpu.memory_space<vmem>>, %arg22: memref<144x32xbf16, #tpu.memory_space<vmem>>, %arg23: memref<1x32xf32, #tpu.memory_space<vmem>>, %arg24: memref<32x16xbf16, #tpu.memory_space<vmem>>, %arg25: memref<1x16xf32, #tpu.memory_space<vmem>>, %arg26: memref<16x64xbf16, #tpu.memory_space<vmem>>, %arg27: memref<1x64xf32, #tpu.memory_space<vmem>>, %arg28: memref<64x10xf32, #tpu.memory_space<vmem>>, %arg29: memref<1x10xf32, #tpu.memory_space<vmem>>, %arg30: memref<1x1x10xf32, #tpu.memory_space<vmem>>, %arg31: memref<304x8xf32, #tpu.memory_space<vmem>>, %arg32: memref<304x32xf32, #tpu.memory_space<vmem>>, %arg33: memref<256x32xf32, #tpu.memory_space<vmem>>, %arg34: memref<96x16xf32, #tpu.memory_space<vmem>>) attributes {dimension_semantics = [#tpu.dimension_semantics<parallel>], iteration_bounds = array<i64: 2>, scalar_prefetch = 0 : i64, scratch_operands = 4 : i64, tpu.core_type = #tpu.core_type<tc>, window_params = [{transform_indices = @transform_0, window_bounds = array<i64: 1, 256, 32>}, {pipeline_mode = #tpu.pipeline_mode<synchronous>, transform_indices = @transform_1, window_bounds = array<i64: 32, 8>}, {pipeline_mode = #tpu.pipeline_mode<synchronous>, transform_indices = @transform_2, window_bounds = array<i64: 1, 8>}, {pipeline_mode = #tpu.pipeline_mode<synchronous>, transform_indices = @transform_3, window_bounds = array<i64: 9, 8>}, {pipeline_mode = #tpu.pipeline_mode<synchronous>, transform_indices = @transform_4, window_bounds = array<i64: 1, 8>}, {pipeline_mode = #tpu.pipeline_mode<synchronous>, transform_indices = @transform_5, window_bounds = array<i64: 8, 2>}, {pipeline_mode = #tpu.pipeline_mode<synchronous>, transform_indices = @transform_6, window_bounds = array<i64: 1, 2>}, {pipeline_mode = #tpu.pipeline_mode<synchronous>, transform_indices = @transform_7, window_bounds = array<i64: 2, 8>}, {pipeline_mode = #tpu.pipeline_mode<synchronous>, transform_indices = @transform_8, window_bounds = array<i64: 1, 8>}, {pipeline_mode = #tpu.pipeline_mode<synchronous>, transform_indices = @transform_9, window_bounds = array<i64: 8, 8>}, {pipeline_mode = #tpu.pipeline_mode<synchronous>, transform_indices = @transform_10, window_bounds = array<i64: 1, 8>}, {pipeline_mode = #tpu.pipeline_mode<synchronous>, transform_indices = @transform_11, window_bounds = array<i64: 8, 32>}, {pipeline_mode = #tpu.pipeline_mode<synchronous>, transform_indices = @transform_12, window_bounds = array<i64: 1, 32>}, {pipeline_mode = #tpu.pipeline_mode<synchronous>, transform_indices = @transform_13, window_bounds = array<i64: 9, 32>}, {pipeline_mode = #tpu.pipeline_mode<synchronous>, transform_indices = @transform_14, window_bounds = array<i64: 1, 32>}, {pipeline_mode = #tpu.pipeline_mode<synchronous>, transform_indices = @transform_15, window_bounds = array<i64: 32, 2>}, {pipeline_mode = #tpu.pipeline_mode<synchronous>, transform_indices = @transform_16, window_bounds = array<i64: 1, 2>}, {pipeline_mode = #tpu.pipeline_mode<synchronous>, transform_indices = @transform_17, window_bounds = array<i64: 2, 32>}, {pipeline_mode = #tpu.pipeline_mode<synchronous>, transform_indices = @transform_18, window_bounds = array<i64: 1, 32>}, {pipeline_mode = #tpu.pipeline_mode<synchronous>, transform_indices = @transform_19, window_bounds = array<i64: 32, 16>}, {pipeline_mode = #tpu.pipeline_mode<synchronous>, transform_indices = @transform_20, window_bounds = array<i64: 1, 16>}, {pipeline_mode = #tpu.pipeline_mode<synchronous>, transform_indices = @transform_21, window_bounds = array<i64: 144, 32>}, {pipeline_mode = #tpu.pipeline_mode<synchronous>, transform_indices = @transform_22, window_bounds = array<i64: 1, 32>}, {pipeline_mode = #tpu.pipeline_mode<synchronous>, transform_indices = @transform_23, window_bounds = array<i64: 32, 16>}, {pipeline_mode = #tpu.pipeline_mode<synchronous>, transform_indices = @transform_24, window_bounds = array<i64: 1, 16>}, {pipeline_mode = #tpu.pipeline_mode<synchronous>, transform_indices = @transform_25, window_bounds = array<i64: 16, 64>}, {pipeline_mode = #tpu.pipeline_mode<synchronous>, transform_indices = @transform_26, window_bounds = array<i64: 1, 64>}, {pipeline_mode = #tpu.pipeline_mode<synchronous>, transform_indices = @transform_27, window_bounds = array<i64: 64, 10>}, {pipeline_mode = #tpu.pipeline_mode<synchronous>, transform_indices = @transform_28, window_bounds = array<i64: 1, 10>}, {transform_indices = @transform_29, window_bounds = array<i64: 1, 1, 10>}]} {
    %cst = arith.constant 0.000000e+00 : f32
    %0 = vector.broadcast %cst : f32 to vector<24x8xf32>
    %c0 = arith.constant 0 : index
    %c0_0 = arith.constant 0 : index
    %1 = vector.load %arg31[%c0, %c0_0] : memref<304x8xf32, #tpu.memory_space<vmem>>, vector<24x8xf32>
    tpu.vector_store %arg31[%c0, %c0_0], %0 {strides = array<i32>} : memref<304x8xf32, #tpu.memory_space<vmem>>, vector<24x8xf32>,
    %cst_1 = arith.constant 0.000000e+00 : f32
    %2 = vector.broadcast %cst_1 : f32 to vector<24x8xf32>
    %c280 = arith.constant 280 : index
    %c0_2 = arith.constant 0 : index
    %3 = vector.load %arg31[%c280, %c0_2] : memref<304x8xf32, #tpu.memory_space<vmem>>, vector<24x8xf32>
    tpu.vector_store %arg31[%c280, %c0_2], %2 {strides = array<i32>} : memref<304x8xf32, #tpu.memory_space<vmem>>, vector<24x8xf32>,
    %cst_3 = arith.constant 0.000000e+00 : f32
    %4 = vector.broadcast %cst_3 : f32 to vector<24x32xf32>
    %c0_4 = arith.constant 0 : index
    %c0_5 = arith.constant 0 : index
    %5 = vector.load %arg32[%c0_4, %c0_5] : memref<304x32xf32, #tpu.memory_space<vmem>>, vector<24x32xf32>
    tpu.vector_store %arg32[%c0_4, %c0_5], %4 {strides = array<i32>} : memref<304x32xf32, #tpu.memory_space<vmem>>, vector<24x32xf32>,
    %cst_6 = arith.constant 0.000000e+00 : f32
    %6 = vector.broadcast %cst_6 : f32 to vector<24x32xf32>
    %c280_7 = arith.constant 280 : index
    %c0_8 = arith.constant 0 : index
    %7 = vector.load %arg32[%c280_7, %c0_8] : memref<304x32xf32, #tpu.memory_space<vmem>>, vector<24x32xf32>
    tpu.vector_store %arg32[%c280_7, %c0_8], %6 {strides = array<i32>} : memref<304x32xf32, #tpu.memory_space<vmem>>, vector<24x32xf32>,
    %cst_9 = arith.constant 0.000000e+00 : f32
    %8 = vector.broadcast %cst_9 : f32 to vector<16x16xf32>
    %c0_10 = arith.constant 0 : index
    %c0_11 = arith.constant 0 : index
    %9 = vector.load %arg34[%c0_10, %c0_11] : memref<96x16xf32, #tpu.memory_space<vmem>>, vector<16x16xf32>
    tpu.vector_store %arg34[%c0_10, %c0_11], %8 {strides = array<i32>} : memref<96x16xf32, #tpu.memory_space<vmem>>, vector<16x16xf32>,
    %cst_12 = arith.constant 0.000000e+00 : f32
    %10 = vector.broadcast %cst_12 : f32 to vector<16x16xf32>
    %c80 = arith.constant 80 : index
    %c0_13 = arith.constant 0 : index
    %11 = vector.load %arg34[%c80, %c0_13] : memref<96x16xf32, #tpu.memory_space<vmem>>, vector<16x16xf32>
    tpu.vector_store %arg34[%c80, %c0_13], %10 {strides = array<i32>} : memref<96x16xf32, #tpu.memory_space<vmem>>, vector<16x16xf32>,
    %c0_14 = arith.constant 0 : index
    %c0_15 = arith.constant 0 : index
    %c0_16 = arith.constant 0 : index
    %12 = vector.load %arg1[%c0_14, %c0_15, %c0_16] : memref<1x256x32xbf16, #tpu.memory_space<vmem>>, vector<1x256x32xbf16>
    %13 = vector.shape_cast %12 : vector<1x256x32xbf16> to vector<256x32xbf16>
    %c0_17 = arith.constant 0 : index
    %c0_18 = arith.constant 0 : index
    %14 = vector.load %arg2[%c0_17, %c0_18] : memref<32x8xbf16, #tpu.memory_space<vmem>>, vector<32x8xbf16>
    %cst_19 = arith.constant dense<0.000000e+00> : vector<256x8xf32>
    %15 = tpu.matmul %13, %14, %cst_19 {dimension_numbers = #tpu.dot_dimension_numbers<[1], [0], [0], [1], [0, 0, 1, 1], [], []>} : vector<256x32xbf16>, vector<32x8xbf16>, vector<256x8xf32> -> vector<256x8xf32>
    %c0_20 = arith.constant 0 : index
    %c0_21 = arith.constant 0 : index
    %16 = vector.load %arg3[%c0_20, %c0_21] : memref<1x8xf32, #tpu.memory_space<vmem>>, vector<1x8xf32>
    %17 = vector.broadcast %16 : vector<1x8xf32> to vector<256x8xf32>
    %18 = arith.addf %15, %17 : vector<256x8xf32>
    %cst_22 = arith.constant 0.000000e+00 : f32
    %19 = vector.broadcast %cst_22 : f32 to vector<256x8xf32>
    %20 = arith.maximumf %18, %19 : vector<256x8xf32>
    %c24 = arith.constant 24 : index
    %c0_23 = arith.constant 0 : index
    %21 = vector.load %arg31[%c24, %c0_23] : memref<304x8xf32, #tpu.memory_space<vmem>>, vector<256x8xf32>
    tpu.vector_store %arg31[%c24, %c0_23], %20 {strides = array<i32>} : memref<304x8xf32, #tpu.memory_space<vmem>>, vector<256x8xf32>,
    %c0_24 = arith.constant 0 : index
    %c0_25 = arith.constant 0 : index
    %22 = vector.load %arg4[%c0_24, %c0_25] : memref<9x8xf32, #tpu.memory_space<vmem>>, vector<9x8xf32>
    %23 = tpu.iota {dimensions = array<i32: 0>} : vector<256x1xi32>
    %c16_i32 = arith.constant 16 : i32
    %c0_i32 = arith.constant 0 : i32
    %24 = arith.cmpi eq, %c16_i32, %c0_i32 : i32
    %c1_i32 = arith.constant 1 : i32
    %25 = arith.select %24, %c1_i32, %c16_i32 : i32
    %26 = vector.broadcast %25 : i32 to vector<256x1xi32>
    %27 = arith.remsi %23, %26 : vector<256x1xi32>
    %c0_i32_26 = arith.constant 0 : i32
    %28 = vector.broadcast %c0_i32_26 : i32 to vector<256x1xi32>
    %29 = arith.cmpi ne, %27, %28 : vector<256x1xi32>
    %c0_i32_27 = arith.constant 0 : i32
    %30 = vector.broadcast %c0_i32_27 : i32 to vector<256x1xi32>
    %31 = arith.cmpi slt, %27, %30 : vector<256x1xi32>
    %c0_i32_28 = arith.constant 0 : i32
    %32 = arith.cmpi slt, %25, %c0_i32_28 : i32
    %33 = vector.broadcast %32 : i1 to vector<256x1xi1>
    %34 = vector.broadcast %33 : vector<256x1xi1> to vector<256x1xi1>
    %35 = arith.xori %31, %34 : vector<256x1xi1>
    %36 = arith.andi %35, %29 : vector<256x1xi1>
    %37 = vector.broadcast %25 : i32 to vector<256x1xi32>
    %38 = arith.addi %27, %37 : vector<256x1xi32>
    %39 = arith.select %36, %38, %27 : vector<256x1xi1>, vector<256x1xi32>
    %c7 = arith.constant 7 : index
    %c0_29 = arith.constant 0 : index
    %40 = vector.load %arg31[%c7, %c0_29] : memref<304x8xf32, #tpu.memory_space<vmem>>, vector<256x8xf32>
    %41 = vector.extract_strided_slice %22 {offsets = [0, 0], sizes = [1, 8], strides = [1, 1]} : vector<9x8xf32> to vector<1x8xf32>
    %42 = vector.broadcast %41 : vector<1x8xf32> to vector<256x8xf32>
    %43 = arith.mulf %40, %42 : vector<256x8xf32>
    %c23 = arith.constant 23 : index
    %c0_30 = arith.constant 0 : index
    %44 = vector.load %arg31[%c23, %c0_30] : memref<304x8xf32, #tpu.memory_space<vmem>>, vector<256x8xf32>
    %45 = vector.extract_strided_slice %22 {offsets = [3, 0], sizes = [1, 8], strides = [1, 1]} : vector<9x8xf32> to vector<1x8xf32>
    %46 = vector.broadcast %45 : vector<1x8xf32> to vector<256x8xf32>
    %47 = arith.mulf %44, %46 : vector<256x8xf32>
    %48 = arith.addf %43, %47 : vector<256x8xf32>
    %c39 = arith.constant 39 : index
    %c0_31 = arith.constant 0 : index
    %49 = vector.load %arg31[%c39, %c0_31] : memref<304x8xf32, #tpu.memory_space<vmem>>, vector<256x8xf32>
    %50 = vector.extract_strided_slice %22 {offsets = [6, 0], sizes = [1, 8], strides = [1, 1]} : vector<9x8xf32> to vector<1x8xf32>
    %51 = vector.broadcast %50 : vector<1x8xf32> to vector<256x8xf32>
    %52 = arith.mulf %49, %51 : vector<256x8xf32>
    %53 = arith.addf %48, %52 : vector<256x8xf32>
    %c8 = arith.constant 8 : index
    %c0_32 = arith.constant 0 : index
    %54 = vector.load %arg31[%c8, %c0_32] : memref<304x8xf32, #tpu.memory_space<vmem>>, vector<256x8xf32>
    %55 = vector.extract_strided_slice %22 {offsets = [1, 0], sizes = [1, 8], strides = [1, 1]} : vector<9x8xf32> to vector<1x8xf32>
    %56 = vector.broadcast %55 : vector<1x8xf32> to vector<256x8xf32>
    %57 = arith.mulf %54, %56 : vector<256x8xf32>
    %c24_33 = arith.constant 24 : index
    %c0_34 = arith.constant 0 : index
    %58 = vector.load %arg31[%c24_33, %c0_34] : memref<304x8xf32, #tpu.memory_space<vmem>>, vector<256x8xf32>
    %59 = vector.extract_strided_slice %22 {offsets = [4, 0], sizes = [1, 8], strides = [1, 1]} : vector<9x8xf32> to vector<1x8xf32>
    %60 = vector.broadcast %59 : vector<1x8xf32> to vector<256x8xf32>
    %61 = arith.mulf %58, %60 : vector<256x8xf32>
    %62 = arith.addf %57, %61 : vector<256x8xf32>
    %c40 = arith.constant 40 : index
    %c0_35 = arith.constant 0 : index
    %63 = vector.load %arg31[%c40, %c0_35] : memref<304x8xf32, #tpu.memory_space<vmem>>, vector<256x8xf32>
    %64 = vector.extract_strided_slice %22 {offsets = [7, 0], sizes = [1, 8], strides = [1, 1]} : vector<9x8xf32> to vector<1x8xf32>
    %65 = vector.broadcast %64 : vector<1x8xf32> to vector<256x8xf32>
    %66 = arith.mulf %63, %65 : vector<256x8xf32>
    %67 = arith.addf %62, %66 : vector<256x8xf32>
    %c9 = arith.constant 9 : index
    %c0_36 = arith.constant 0 : index
    %68 = vector.load %arg31[%c9, %c0_36] : memref<304x8xf32, #tpu.memory_space<vmem>>, vector<256x8xf32>
    %69 = vector.extract_strided_slice %22 {offsets = [2, 0], sizes = [1, 8], strides = [1, 1]} : vector<9x8xf32> to vector<1x8xf32>
    %70 = vector.broadcast %69 : vector<1x8xf32> to vector<256x8xf32>
    %71 = arith.mulf %68, %70 : vector<256x8xf32>
    %c25 = arith.constant 25 : index
    %c0_37 = arith.constant 0 : index
    %72 = vector.load %arg31[%c25, %c0_37] : memref<304x8xf32, #tpu.memory_space<vmem>>, vector<256x8xf32>
    %73 = vector.extract_strided_slice %22 {offsets = [5, 0], sizes = [1, 8], strides = [1, 1]} : vector<9x8xf32> to vector<1x8xf32>
    %74 = vector.broadcast %73 : vector<1x8xf32> to vector<256x8xf32>
    %75 = arith.mulf %72, %74 : vector<256x8xf32>
    %76 = arith.addf %71, %75 : vector<256x8xf32>
    %c41 = arith.constant 41 : index
    %c0_38 = arith.constant 0 : index
    %77 = vector.load %arg31[%c41, %c0_38] : memref<304x8xf32, #tpu.memory_space<vmem>>, vector<256x8xf32>
    %78 = vector.extract_strided_slice %22 {offsets = [8, 0], sizes = [1, 8], strides = [1, 1]} : vector<9x8xf32> to vector<1x8xf32>
    %79 = vector.broadcast %78 : vector<1x8xf32> to vector<256x8xf32>
    %80 = arith.mulf %77, %79 : vector<256x8xf32>
    %81 = arith.addf %76, %80 : vector<256x8xf32>
    %c0_i32_39 = arith.constant 0 : i32
    %82 = vector.broadcast %c0_i32_39 : i32 to vector<256x1xi32>
    %83 = arith.cmpi sgt, %39, %82 : vector<256x1xi32>
    %cst_40 = arith.constant 0.000000e+00 : f32
    %84 = vector.shape_cast %83 : vector<256x1xi1> to vector<256x1xi1>
    %85 = vector.broadcast %84 : vector<256x1xi1> to vector<256x8xi1>
    %86 = vector.broadcast %cst_40 : f32 to vector<256x8xf32>
    %87 = arith.select %85, %53, %86 : vector<256x8xi1>, vector<256x8xf32>
    %88 = arith.addf %87, %67 : vector<256x8xf32>
    %c15_i32 = arith.constant 15 : i32
    %89 = vector.broadcast %c15_i32 : i32 to vector<256x1xi32>
    %90 = arith.cmpi slt, %39, %89 : vector<256x1xi32>
    %cst_41 = arith.constant 0.000000e+00 : f32
    %91 = vector.shape_cast %90 : vector<256x1xi1> to vector<256x1xi1>
    %92 = vector.broadcast %91 : vector<256x1xi1> to vector<256x8xi1>
    %93 = vector.broadcast %cst_41 : f32 to vector<256x8xf32>
    %94 = arith.select %92, %81, %93 : vector<256x8xi1>, vector<256x8xf32>
    %95 = arith.addf %88, %94 : vector<256x8xf32>
    %c0_42 = arith.constant 0 : index
    %c0_43 = arith.constant 0 : index
    %96 = vector.load %arg5[%c0_42, %c0_43] : memref<1x8xf32, #tpu.memory_space<vmem>>, vector<1x8xf32>
    %97 = vector.broadcast %96 : vector<1x8xf32> to vector<256x8xf32>
    %98 = arith.addf %95, %97 : vector<256x8xf32>
    %cst_44 = arith.constant 0.000000e+00 : f32
    %99 = vector.broadcast %cst_44 : f32 to vector<256x8xf32>
    %100 = arith.maximumf %98, %99 : vector<256x8xf32>
    %cst_45 = arith.constant dense<0.000000e+00> : vector<8xf32>
    %101 = vector.multi_reduction <add>, %100, %cst_45 [0] : vector<256x8xf32> to vector<8xf32>
    %102 = vector.shape_cast %101 : vector<8xf32> to vector<1x8xf32>
    %cst_46 = arith.constant 3.906250e-03 : f32
    %103 = vector.broadcast %cst_46 : f32 to vector<1x8xf32>
    %104 = arith.mulf %102, %103 : vector<1x8xf32>
    %c0_47 = arith.constant 0 : index
    %c0_48 = arith.constant 0 : index
    %105 = vector.load %arg6[%c0_47, %c0_48] : memref<8x2xf32, #tpu.memory_space<vmem>>, vector<8x2xf32>
    %cst_49 = arith.constant dense<0.000000e+00> : vector<1x2xf32>
    %106 = tpu.matmul %104, %105, %cst_49 {dimension_numbers = #tpu.dot_dimension_numbers<[1], [0], [0], [1], [0, 0, 1, 1], [], []>} : vector<1x8xf32>, vector<8x2xf32>, vector<1x2xf32> -> vector<1x2xf32>
    %c0_50 = arith.constant 0 : index
    %c0_51 = arith.constant 0 : index
    %107 = vector.load %arg7[%c0_50, %c0_51] : memref<1x2xf32, #tpu.memory_space<vmem>>, vector<1x2xf32>
    %108 = arith.addf %106, %107 : vector<1x2xf32>
    %cst_52 = arith.constant 0.000000e+00 : f32
    %109 = vector.broadcast %cst_52 : f32 to vector<1x2xf32>
    %110 = arith.maximumf %108, %109 : vector<1x2xf32>
    %c0_53 = arith.constant 0 : index
    %c0_54 = arith.constant 0 : index
    %111 = vector.load %arg8[%c0_53, %c0_54] : memref<2x8xf32, #tpu.memory_space<vmem>>, vector<2x8xf32>
    %cst_55 = arith.constant dense<0.000000e+00> : vector<1x8xf32>
    %112 = tpu.matmul %110, %111, %cst_55 {dimension_numbers = #tpu.dot_dimension_numbers<[1], [0], [0], [1], [0, 0, 1, 1], [], []>} : vector<1x2xf32>, vector<2x8xf32>, vector<1x8xf32> -> vector<1x8xf32>
    %c0_56 = arith.constant 0 : index
    %c0_57 = arith.constant 0 : index
    %113 = vector.load %arg9[%c0_56, %c0_57] : memref<1x8xf32, #tpu.memory_space<vmem>>, vector<1x8xf32>
    %114 = arith.addf %112, %113 : vector<1x8xf32>
    %115 = arith.negf %114 : vector<1x8xf32>
    %116 = math.exp %115 : vector<1x8xf32>
    %cst_58 = arith.constant 1.000000e+00 : f32
    %117 = vector.broadcast %cst_58 : f32 to vector<1x8xf32>
    %118 = arith.addf %117, %116 : vector<1x8xf32>
    %119 = arith.divf %117, %118 : vector<1x8xf32>
    %120 = vector.broadcast %119 : vector<1x8xf32> to vector<256x8xf32>
    %121 = arith.mulf %100, %120 : vector<256x8xf32>
    %122 = arith.truncf %121 : vector<256x8xf32> to vector<256x8xbf16>
    %c0_59 = arith.constant 0 : index
    %c0_60 = arith.constant 0 : index
    %123 = vector.load %arg10[%c0_59, %c0_60] : memref<8x8xbf16, #tpu.memory_space<vmem>>, vector<8x8xbf16>
    %cst_61 = arith.constant dense<0.000000e+00> : vector<256x8xf32>
    %124 = tpu.matmul %122, %123, %cst_61 {dimension_numbers = #tpu.dot_dimension_numbers<[1], [0], [0], [1], [0, 0, 1, 1], [], []>} : vector<256x8xbf16>, vector<8x8xbf16>, vector<256x8xf32> -> vector<256x8xf32>
    %c0_62 = arith.constant 0 : index
    %c0_63 = arith.constant 0 : index
    %125 = vector.load %arg11[%c0_62, %c0_63] : memref<1x8xf32, #tpu.memory_space<vmem>>, vector<1x8xf32>
    %126 = vector.broadcast %125 : vector<1x8xf32> to vector<256x8xf32>
    %127 = arith.addf %124, %126 : vector<256x8xf32>
    %c24_64 = arith.constant 24 : index
    %c0_65 = arith.constant 0 : index
    %128 = vector.load %arg31[%c24_64, %c0_65] : memref<304x8xf32, #tpu.memory_space<vmem>>, vector<256x8xf32>
    %129 = arith.addf %127, %128 : vector<256x8xf32>
    %130 = arith.truncf %129 : vector<256x8xf32> to vector<256x8xbf16>
    %c0_66 = arith.constant 0 : index
    %c0_67 = arith.constant 0 : index
    %131 = vector.load %arg12[%c0_66, %c0_67] : memref<8x32xbf16, #tpu.memory_space<vmem>>, vector<8x32xbf16>
    %cst_68 = arith.constant dense<0.000000e+00> : vector<256x32xf32>
    %132 = tpu.matmul %130, %131, %cst_68 {dimension_numbers = #tpu.dot_dimension_numbers<[1], [0], [0], [1], [0, 0, 1, 1], [], []>} : vector<256x8xbf16>, vector<8x32xbf16>, vector<256x32xf32> -> vector<256x32xf32>
    %c0_69 = arith.constant 0 : index
    %c0_70 = arith.constant 0 : index
    %133 = vector.load %arg13[%c0_69, %c0_70] : memref<1x32xf32, #tpu.memory_space<vmem>>, vector<1x32xf32>
    %134 = vector.broadcast %133 : vector<1x32xf32> to vector<256x32xf32>
    %135 = arith.addf %132, %134 : vector<256x32xf32>
    %cst_71 = arith.constant 0.000000e+00 : f32
    %136 = vector.broadcast %cst_71 : f32 to vector<256x32xf32>
    %137 = arith.maximumf %135, %136 : vector<256x32xf32>
    %c24_72 = arith.constant 24 : index
    %c0_73 = arith.constant 0 : index
    %138 = vector.load %arg32[%c24_72, %c0_73] : memref<304x32xf32, #tpu.memory_space<vmem>>, vector<256x32xf32>
    tpu.vector_store %arg32[%c24_72, %c0_73], %137 {strides = array<i32>} : memref<304x32xf32, #tpu.memory_space<vmem>>, vector<256x32xf32>,
    %c0_74 = arith.constant 0 : index
    %c0_75 = arith.constant 0 : index
    %139 = vector.load %arg14[%c0_74, %c0_75] : memref<9x32xf32, #tpu.memory_space<vmem>>, vector<9x32xf32>
    %140 = tpu.iota {dimensions = array<i32: 0>} : vector<256x1xi32>
    %c16_i32_76 = arith.constant 16 : i32
    %c0_i32_77 = arith.constant 0 : i32
    %141 = arith.cmpi eq, %c16_i32_76, %c0_i32_77 : i32
    %c1_i32_78 = arith.constant 1 : i32
    %142 = arith.select %141, %c1_i32_78, %c16_i32_76 : i32
    %143 = vector.broadcast %142 : i32 to vector<256x1xi32>
    %144 = arith.remsi %140, %143 : vector<256x1xi32>
    %c0_i32_79 = arith.constant 0 : i32
    %145 = vector.broadcast %c0_i32_79 : i32 to vector<256x1xi32>
    %146 = arith.cmpi ne, %144, %145 : vector<256x1xi32>
    %c0_i32_80 = arith.constant 0 : i32
    %147 = vector.broadcast %c0_i32_80 : i32 to vector<256x1xi32>
    %148 = arith.cmpi slt, %144, %147 : vector<256x1xi32>
    %c0_i32_81 = arith.constant 0 : i32
    %149 = arith.cmpi slt, %142, %c0_i32_81 : i32
    %150 = vector.broadcast %149 : i1 to vector<256x1xi1>
    %151 = vector.broadcast %150 : vector<256x1xi1> to vector<256x1xi1>
    %152 = arith.xori %148, %151 : vector<256x1xi1>
    %153 = arith.andi %152, %146 : vector<256x1xi1>
    %154 = vector.broadcast %142 : i32 to vector<256x1xi32>
    %155 = arith.addi %144, %154 : vector<256x1xi32>
    %156 = arith.select %153, %155, %144 : vector<256x1xi1>, vector<256x1xi32>
    %c7_82 = arith.constant 7 : index
    %c0_83 = arith.constant 0 : index
    %157 = vector.load %arg32[%c7_82, %c0_83] : memref<304x32xf32, #tpu.memory_space<vmem>>, vector<256x32xf32>
    %158 = vector.extract_strided_slice %139 {offsets = [0, 0], sizes = [1, 32], strides = [1, 1]} : vector<9x32xf32> to vector<1x32xf32>
    %159 = vector.broadcast %158 : vector<1x32xf32> to vector<256x32xf32>
    %160 = arith.mulf %157, %159 : vector<256x32xf32>
    %c23_84 = arith.constant 23 : index
    %c0_85 = arith.constant 0 : index
    %161 = vector.load %arg32[%c23_84, %c0_85] : memref<304x32xf32, #tpu.memory_space<vmem>>, vector<256x32xf32>
    %162 = vector.extract_strided_slice %139 {offsets = [3, 0], sizes = [1, 32], strides = [1, 1]} : vector<9x32xf32> to vector<1x32xf32>
    %163 = vector.broadcast %162 : vector<1x32xf32> to vector<256x32xf32>
    %164 = arith.mulf %161, %163 : vector<256x32xf32>
    %165 = arith.addf %160, %164 : vector<256x32xf32>
    %c39_86 = arith.constant 39 : index
    %c0_87 = arith.constant 0 : index
    %166 = vector.load %arg32[%c39_86, %c0_87] : memref<304x32xf32, #tpu.memory_space<vmem>>, vector<256x32xf32>
    %167 = vector.extract_strided_slice %139 {offsets = [6, 0], sizes = [1, 32], strides = [1, 1]} : vector<9x32xf32> to vector<1x32xf32>
    %168 = vector.broadcast %167 : vector<1x32xf32> to vector<256x32xf32>
    %169 = arith.mulf %166, %168 : vector<256x32xf32>
    %170 = arith.addf %165, %169 : vector<256x32xf32>
    %c8_88 = arith.constant 8 : index
    %c0_89 = arith.constant 0 : index
    %171 = vector.load %arg32[%c8_88, %c0_89] : memref<304x32xf32, #tpu.memory_space<vmem>>, vector<256x32xf32>
    %172 = vector.extract_strided_slice %139 {offsets = [1, 0], sizes = [1, 32], strides = [1, 1]} : vector<9x32xf32> to vector<1x32xf32>
    %173 = vector.broadcast %172 : vector<1x32xf32> to vector<256x32xf32>
    %174 = arith.mulf %171, %173 : vector<256x32xf32>
    %c24_90 = arith.constant 24 : index
    %c0_91 = arith.constant 0 : index
    %175 = vector.load %arg32[%c24_90, %c0_91] : memref<304x32xf32, #tpu.memory_space<vmem>>, vector<256x32xf32>
    %176 = vector.extract_strided_slice %139 {offsets = [4, 0], sizes = [1, 32], strides = [1, 1]} : vector<9x32xf32> to vector<1x32xf32>
    %177 = vector.broadcast %176 : vector<1x32xf32> to vector<256x32xf32>
    %178 = arith.mulf %175, %177 : vector<256x32xf32>
    %179 = arith.addf %174, %178 : vector<256x32xf32>
    %c40_92 = arith.constant 40 : index
    %c0_93 = arith.constant 0 : index
    %180 = vector.load %arg32[%c40_92, %c0_93] : memref<304x32xf32, #tpu.memory_space<vmem>>, vector<256x32xf32>
    %181 = vector.extract_strided_slice %139 {offsets = [7, 0], sizes = [1, 32], strides = [1, 1]} : vector<9x32xf32> to vector<1x32xf32>
    %182 = vector.broadcast %181 : vector<1x32xf32> to vector<256x32xf32>
    %183 = arith.mulf %180, %182 : vector<256x32xf32>
    %184 = arith.addf %179, %183 : vector<256x32xf32>
    %c9_94 = arith.constant 9 : index
    %c0_95 = arith.constant 0 : index
    %185 = vector.load %arg32[%c9_94, %c0_95] : memref<304x32xf32, #tpu.memory_space<vmem>>, vector<256x32xf32>
    %186 = vector.extract_strided_slice %139 {offsets = [2, 0], sizes = [1, 32], strides = [1, 1]} : vector<9x32xf32> to vector<1x32xf32>
    %187 = vector.broadcast %186 : vector<1x32xf32> to vector<256x32xf32>
    %188 = arith.mulf %185, %187 : vector<256x32xf32>
    %c25_96 = arith.constant 25 : index
    %c0_97 = arith.constant 0 : index
    %189 = vector.load %arg32[%c25_96, %c0_97] : memref<304x32xf32, #tpu.memory_space<vmem>>, vector<256x32xf32>
    %190 = vector.extract_strided_slice %139 {offsets = [5, 0], sizes = [1, 32], strides = [1, 1]} : vector<9x32xf32> to vector<1x32xf32>
    %191 = vector.broadcast %190 : vector<1x32xf32> to vector<256x32xf32>
    %192 = arith.mulf %189, %191 : vector<256x32xf32>
    %193 = arith.addf %188, %192 : vector<256x32xf32>
    %c41_98 = arith.constant 41 : index
    %c0_99 = arith.constant 0 : index
    %194 = vector.load %arg32[%c41_98, %c0_99] : memref<304x32xf32, #tpu.memory_space<vmem>>, vector<256x32xf32>
    %195 = vector.extract_strided_slice %139 {offsets = [8, 0], sizes = [1, 32], strides = [1, 1]} : vector<9x32xf32> to vector<1x32xf32>
    %196 = vector.broadcast %195 : vector<1x32xf32> to vector<256x32xf32>
    %197 = arith.mulf %194, %196 : vector<256x32xf32>
    %198 = arith.addf %193, %197 : vector<256x32xf32>
    %c0_i32_100 = arith.constant 0 : i32
    %199 = vector.broadcast %c0_i32_100 : i32 to vector<256x1xi32>
    %200 = arith.cmpi sgt, %156, %199 : vector<256x1xi32>
    %cst_101 = arith.constant 0.000000e+00 : f32
    %201 = vector.shape_cast %200 : vector<256x1xi1> to vector<256x1xi1>
    %202 = vector.broadcast %201 : vector<256x1xi1> to vector<256x32xi1>
    %203 = vector.broadcast %cst_101 : f32 to vector<256x32xf32>
    %204 = arith.select %202, %170, %203 : vector<256x32xi1>, vector<256x32xf32>
    %205 = arith.addf %204, %184 : vector<256x32xf32>
    %c15_i32_102 = arith.constant 15 : i32
    %206 = vector.broadcast %c15_i32_102 : i32 to vector<256x1xi32>
    %207 = arith.cmpi slt, %156, %206 : vector<256x1xi32>
    %cst_103 = arith.constant 0.000000e+00 : f32
    %208 = vector.shape_cast %207 : vector<256x1xi1> to vector<256x1xi1>
    %209 = vector.broadcast %208 : vector<256x1xi1> to vector<256x32xi1>
    %210 = vector.broadcast %cst_103 : f32 to vector<256x32xf32>
    %211 = arith.select %209, %198, %210 : vector<256x32xi1>, vector<256x32xf32>
    %212 = arith.addf %205, %211 : vector<256x32xf32>
    %c0_104 = arith.constant 0 : index
    %c0_105 = arith.constant 0 : index
    %213 = vector.load %arg15[%c0_104, %c0_105] : memref<1x32xf32, #tpu.memory_space<vmem>>, vector<1x32xf32>
    %214 = vector.broadcast %213 : vector<1x32xf32> to vector<256x32xf32>
    %215 = arith.addf %212, %214 : vector<256x32xf32>
    %cst_106 = arith.constant 0.000000e+00 : f32
    %216 = vector.broadcast %cst_106 : f32 to vector<256x32xf32>
    %217 = arith.maximumf %215, %216 : vector<256x32xf32>
    %c0_107 = arith.constant 0 : index
    %c0_108 = arith.constant 0 : index
    %218 = vector.load %arg33[%c0_107, %c0_108] : memref<256x32xf32, #tpu.memory_space<vmem>>, vector<256x32xf32>
    tpu.vector_store %arg33[%c0_107, %c0_108], %217 {strides = array<i32>} : memref<256x32xf32, #tpu.memory_space<vmem>>, vector<256x32xf32>,
    %c0_109 = arith.constant 0 : index
    %c0_110 = arith.constant 0 : index
    %219 = tpu.strided_load %arg33[%c0_109, %c0_110] {strides = array<i32: 2, 1>} : memref<256x32xf32, #tpu.memory_space<vmem>>, vector<8x32xf32>
    %c32 = arith.constant 32 : index
    %c0_111 = arith.constant 0 : index
    %220 = tpu.strided_load %arg33[%c32, %c0_111] {strides = array<i32: 2, 1>} : memref<256x32xf32, #tpu.memory_space<vmem>>, vector<8x32xf32>
    %c64 = arith.constant 64 : index
    %c0_112 = arith.constant 0 : index
    %221 = tpu.strided_load %arg33[%c64, %c0_112] {strides = array<i32: 2, 1>} : memref<256x32xf32, #tpu.memory_space<vmem>>, vector<8x32xf32>
    %c96 = arith.constant 96 : index
    %c0_113 = arith.constant 0 : index
    %222 = tpu.strided_load %arg33[%c96, %c0_113] {strides = array<i32: 2, 1>} : memref<256x32xf32, #tpu.memory_space<vmem>>, vector<8x32xf32>
    %c128 = arith.constant 128 : index
    %c0_114 = arith.constant 0 : index
    %223 = tpu.strided_load %arg33[%c128, %c0_114] {strides = array<i32: 2, 1>} : memref<256x32xf32, #tpu.memory_space<vmem>>, vector<8x32xf32>
    %c160 = arith.constant 160 : index
    %c0_115 = arith.constant 0 : index
    %224 = tpu.strided_load %arg33[%c160, %c0_115] {strides = array<i32: 2, 1>} : memref<256x32xf32, #tpu.memory_space<vmem>>, vector<8x32xf32>
    %c192 = arith.constant 192 : index
    %c0_116 = arith.constant 0 : index
    %225 = tpu.strided_load %arg33[%c192, %c0_116] {strides = array<i32: 2, 1>} : memref<256x32xf32, #tpu.memory_space<vmem>>, vector<8x32xf32>
    %c224 = arith.constant 224 : index
    %c0_117 = arith.constant 0 : index
    %226 = tpu.strided_load %arg33[%c224, %c0_117] {strides = array<i32: 2, 1>} : memref<256x32xf32, #tpu.memory_space<vmem>>, vector<8x32xf32>
    %227 = tpu.concatenate %219, %220, %221, %222, %223, %224, %225, %226 in 0 : vector<8x32xf32>, vector<8x32xf32>, vector<8x32xf32>, vector<8x32xf32>, vector<8x32xf32>, vector<8x32xf32>, vector<8x32xf32>, vector<8x32xf32> -> vector<64x32xf32>
    %cst_118 = arith.constant dense<0.000000e+00> : vector<32xf32>
    %228 = vector.multi_reduction <add>, %227, %cst_118 [0] : vector<64x32xf32> to vector<32xf32>
    %229 = vector.shape_cast %228 : vector<32xf32> to vector<1x32xf32>
    %cst_119 = arith.constant 1.562500e-02 : f32
    %230 = vector.broadcast %cst_119 : f32 to vector<1x32xf32>
    %231 = arith.mulf %229, %230 : vector<1x32xf32>
    %c0_120 = arith.constant 0 : index
    %c0_121 = arith.constant 0 : index
    %232 = vector.load %arg16[%c0_120, %c0_121] : memref<32x2xf32, #tpu.memory_space<vmem>>, vector<32x2xf32>
    %cst_122 = arith.constant dense<0.000000e+00> : vector<1x2xf32>
    %233 = tpu.matmul %231, %232, %cst_122 {dimension_numbers = #tpu.dot_dimension_numbers<[1], [0], [0], [1], [0, 0, 1, 1], [], []>} : vector<1x32xf32>, vector<32x2xf32>, vector<1x2xf32> -> vector<1x2xf32>
    %c0_123 = arith.constant 0 : index
    %c0_124 = arith.constant 0 : index
    %234 = vector.load %arg17[%c0_123, %c0_124] : memref<1x2xf32, #tpu.memory_space<vmem>>, vector<1x2xf32>
    %235 = arith.addf %233, %234 : vector<1x2xf32>
    %cst_125 = arith.constant 0.000000e+00 : f32
    %236 = vector.broadcast %cst_125 : f32 to vector<1x2xf32>
    %237 = arith.maximumf %235, %236 : vector<1x2xf32>
    %c0_126 = arith.constant 0 : index
    %c0_127 = arith.constant 0 : index
    %238 = vector.load %arg18[%c0_126, %c0_127] : memref<2x32xf32, #tpu.memory_space<vmem>>, vector<2x32xf32>
    %cst_128 = arith.constant dense<0.000000e+00> : vector<1x32xf32>
    %239 = tpu.matmul %237, %238, %cst_128 {dimension_numbers = #tpu.dot_dimension_numbers<[1], [0], [0], [1], [0, 0, 1, 1], [], []>} : vector<1x2xf32>, vector<2x32xf32>, vector<1x32xf32> -> vector<1x32xf32>
    %c0_129 = arith.constant 0 : index
    %c0_130 = arith.constant 0 : index
    %240 = vector.load %arg19[%c0_129, %c0_130] : memref<1x32xf32, #tpu.memory_space<vmem>>, vector<1x32xf32>
    %241 = arith.addf %239, %240 : vector<1x32xf32>
    %242 = arith.negf %241 : vector<1x32xf32>
    %243 = math.exp %242 : vector<1x32xf32>
    %cst_131 = arith.constant 1.000000e+00 : f32
    %244 = vector.broadcast %cst_131 : f32 to vector<1x32xf32>
    %245 = arith.addf %244, %243 : vector<1x32xf32>
    %246 = arith.divf %244, %245 : vector<1x32xf32>
    %247 = vector.broadcast %246 : vector<1x32xf32> to vector<64x32xf32>
    %248 = arith.mulf %227, %247 : vector<64x32xf32>
    %249 = arith.truncf %248 : vector<64x32xf32> to vector<64x32xbf16>
    %c0_132 = arith.constant 0 : index
    %c0_133 = arith.constant 0 : index
    %250 = vector.load %arg20[%c0_132, %c0_133] : memref<32x16xbf16, #tpu.memory_space<vmem>>, vector<32x16xbf16>
    %cst_134 = arith.constant dense<0.000000e+00> : vector<64x16xf32>
    %251 = tpu.matmul %249, %250, %cst_134 {dimension_numbers = #tpu.dot_dimension_numbers<[1], [0], [0], [1], [0, 0, 1, 1], [], []>} : vector<64x32xbf16>, vector<32x16xbf16>, vector<64x16xf32> -> vector<64x16xf32>
    %c0_135 = arith.constant 0 : index
    %c0_136 = arith.constant 0 : index
    %252 = vector.load %arg21[%c0_135, %c0_136] : memref<1x16xf32, #tpu.memory_space<vmem>>, vector<1x16xf32>
    %253 = vector.broadcast %252 : vector<1x16xf32> to vector<64x16xf32>
    %254 = arith.addf %251, %253 : vector<64x16xf32>
    %c16 = arith.constant 16 : index
    %c0_137 = arith.constant 0 : index
    %255 = vector.load %arg34[%c16, %c0_137] : memref<96x16xf32, #tpu.memory_space<vmem>>, vector<64x16xf32>
    tpu.vector_store %arg34[%c16, %c0_137], %254 {strides = array<i32>} : memref<96x16xf32, #tpu.memory_space<vmem>>, vector<64x16xf32>,
    %256 = tpu.iota {dimensions = array<i32: 0>} : vector<64x1xi32>
    %c8_i32 = arith.constant 8 : i32
    %c0_i32_138 = arith.constant 0 : i32
    %257 = arith.cmpi eq, %c8_i32, %c0_i32_138 : i32
    %c1_i32_139 = arith.constant 1 : i32
    %258 = arith.select %257, %c1_i32_139, %c8_i32 : i32
    %259 = vector.broadcast %258 : i32 to vector<64x1xi32>
    %260 = arith.remsi %256, %259 : vector<64x1xi32>
    %c0_i32_140 = arith.constant 0 : i32
    %261 = vector.broadcast %c0_i32_140 : i32 to vector<64x1xi32>
    %262 = arith.cmpi ne, %260, %261 : vector<64x1xi32>
    %c0_i32_141 = arith.constant 0 : i32
    %263 = vector.broadcast %c0_i32_141 : i32 to vector<64x1xi32>
    %264 = arith.cmpi slt, %260, %263 : vector<64x1xi32>
    %c0_i32_142 = arith.constant 0 : i32
    %265 = arith.cmpi slt, %258, %c0_i32_142 : i32
    %266 = vector.broadcast %265 : i1 to vector<64x1xi1>
    %267 = vector.broadcast %266 : vector<64x1xi1> to vector<64x1xi1>
    %268 = arith.xori %264, %267 : vector<64x1xi1>
    %269 = arith.andi %268, %262 : vector<64x1xi1>
    %270 = vector.broadcast %258 : i32 to vector<64x1xi32>
    %271 = arith.addi %260, %270 : vector<64x1xi32>
    %272 = arith.select %269, %271, %260 : vector<64x1xi1>, vector<64x1xi32>
    %c7_143 = arith.constant 7 : index
    %c0_144 = arith.constant 0 : index
    %273 = vector.load %arg34[%c7_143, %c0_144] : memref<96x16xf32, #tpu.memory_space<vmem>>, vector<64x16xf32>
    %c0_i32_145 = arith.constant 0 : i32
    %274 = vector.broadcast %c0_i32_145 : i32 to vector<64x1xi32>
    %275 = arith.cmpi sgt, %272, %274 : vector<64x1xi32>
    %cst_146 = arith.constant 0.000000e+00 : f32
    %276 = vector.shape_cast %275 : vector<64x1xi1> to vector<64x1xi1>
    %277 = vector.broadcast %276 : vector<64x1xi1> to vector<64x16xi1>
    %278 = vector.broadcast %cst_146 : f32 to vector<64x16xf32>
    %279 = arith.select %277, %273, %278 : vector<64x16xi1>, vector<64x16xf32>
    %c8_147 = arith.constant 8 : index
    %c0_148 = arith.constant 0 : index
    %280 = vector.load %arg34[%c8_147, %c0_148] : memref<96x16xf32, #tpu.memory_space<vmem>>, vector<64x16xf32>
    %c9_149 = arith.constant 9 : index
    %c0_150 = arith.constant 0 : index
    %281 = vector.load %arg34[%c9_149, %c0_150] : memref<96x16xf32, #tpu.memory_space<vmem>>, vector<64x16xf32>
    %c7_i32 = arith.constant 7 : i32
    %282 = vector.broadcast %c7_i32 : i32 to vector<64x1xi32>
    %283 = arith.cmpi slt, %272, %282 : vector<64x1xi32>
    %cst_151 = arith.constant 0.000000e+00 : f32
    %284 = vector.shape_cast %283 : vector<64x1xi1> to vector<64x1xi1>
    %285 = vector.broadcast %284 : vector<64x1xi1> to vector<64x16xi1>
    %286 = vector.broadcast %cst_151 : f32 to vector<64x16xf32>
    %287 = arith.select %285, %281, %286 : vector<64x16xi1>, vector<64x16xf32>
    %c15 = arith.constant 15 : index
    %c0_152 = arith.constant 0 : index
    %288 = vector.load %arg34[%c15, %c0_152] : memref<96x16xf32, #tpu.memory_space<vmem>>, vector<64x16xf32>
    %c0_i32_153 = arith.constant 0 : i32
    %289 = vector.broadcast %c0_i32_153 : i32 to vector<64x1xi32>
    %290 = arith.cmpi sgt, %272, %289 : vector<64x1xi32>
    %cst_154 = arith.constant 0.000000e+00 : f32
    %291 = vector.shape_cast %290 : vector<64x1xi1> to vector<64x1xi1>
    %292 = vector.broadcast %291 : vector<64x1xi1> to vector<64x16xi1>
    %293 = vector.broadcast %cst_154 : f32 to vector<64x16xf32>
    %294 = arith.select %292, %288, %293 : vector<64x16xi1>, vector<64x16xf32>
    %c16_155 = arith.constant 16 : index
    %c0_156 = arith.constant 0 : index
    %295 = vector.load %arg34[%c16_155, %c0_156] : memref<96x16xf32, #tpu.memory_space<vmem>>, vector<64x16xf32>
    %c17 = arith.constant 17 : index
    %c0_157 = arith.constant 0 : index
    %296 = vector.load %arg34[%c17, %c0_157] : memref<96x16xf32, #tpu.memory_space<vmem>>, vector<64x16xf32>
    %c7_i32_158 = arith.constant 7 : i32
    %297 = vector.broadcast %c7_i32_158 : i32 to vector<64x1xi32>
    %298 = arith.cmpi slt, %272, %297 : vector<64x1xi32>
    %cst_159 = arith.constant 0.000000e+00 : f32
    %299 = vector.shape_cast %298 : vector<64x1xi1> to vector<64x1xi1>
    %300 = vector.broadcast %299 : vector<64x1xi1> to vector<64x16xi1>
    %301 = vector.broadcast %cst_159 : f32 to vector<64x16xf32>
    %302 = arith.select %300, %296, %301 : vector<64x16xi1>, vector<64x16xf32>
    %c23_160 = arith.constant 23 : index
    %c0_161 = arith.constant 0 : index
    %303 = vector.load %arg34[%c23_160, %c0_161] : memref<96x16xf32, #tpu.memory_space<vmem>>, vector<64x16xf32>
    %c0_i32_162 = arith.constant 0 : i32
    %304 = vector.broadcast %c0_i32_162 : i32 to vector<64x1xi32>
    %305 = arith.cmpi sgt, %272, %304 : vector<64x1xi32>
    %cst_163 = arith.constant 0.000000e+00 : f32
    %306 = vector.shape_cast %305 : vector<64x1xi1> to vector<64x1xi1>
    %307 = vector.broadcast %306 : vector<64x1xi1> to vector<64x16xi1>
    %308 = vector.broadcast %cst_163 : f32 to vector<64x16xf32>
    %309 = arith.select %307, %303, %308 : vector<64x16xi1>, vector<64x16xf32>
    %c24_164 = arith.constant 24 : index
    %c0_165 = arith.constant 0 : index
    %310 = vector.load %arg34[%c24_164, %c0_165] : memref<96x16xf32, #tpu.memory_space<vmem>>, vector<64x16xf32>
    %c25_166 = arith.constant 25 : index
    %c0_167 = arith.constant 0 : index
    %311 = vector.load %arg34[%c25_166, %c0_167] : memref<96x16xf32, #tpu.memory_space<vmem>>, vector<64x16xf32>
    %c7_i32_168 = arith.constant 7 : i32
    %312 = vector.broadcast %c7_i32_168 : i32 to vector<64x1xi32>
    %313 = arith.cmpi slt, %272, %312 : vector<64x1xi32>
    %cst_169 = arith.constant 0.000000e+00 : f32
    %314 = vector.shape_cast %313 : vector<64x1xi1> to vector<64x1xi1>
    %315 = vector.broadcast %314 : vector<64x1xi1> to vector<64x16xi1>
    %316 = vector.broadcast %cst_169 : f32 to vector<64x16xf32>
    %317 = arith.select %315, %311, %316 : vector<64x16xi1>, vector<64x16xf32>
    %318 = tpu.concatenate %279, %280, %287, %294, %295, %302, %309, %310, %317 in 1 : vector<64x16xf32>, vector<64x16xf32>, vector<64x16xf32>, vector<64x16xf32>, vector<64x16xf32>, vector<64x16xf32>, vector<64x16xf32>, vector<64x16xf32>, vector<64x16xf32> -> vector<64x144xf32>
    %319 = arith.truncf %318 : vector<64x144xf32> to vector<64x144xbf16>
    %c0_170 = arith.constant 0 : index
    %c0_171 = arith.constant 0 : index
    %320 = vector.load %arg22[%c0_170, %c0_171] : memref<144x32xbf16, #tpu.memory_space<vmem>>, vector<144x32xbf16>
    %cst_172 = arith.constant dense<0.000000e+00> : vector<64x32xf32>
    %321 = tpu.matmul %319, %320, %cst_172 {dimension_numbers = #tpu.dot_dimension_numbers<[1], [0], [0], [1], [0, 0, 1, 1], [], []>} : vector<64x144xbf16>, vector<144x32xbf16>, vector<64x32xf32> -> vector<64x32xf32>
    %c0_173 = arith.constant 0 : index
    %c0_174 = arith.constant 0 : index
    %322 = vector.load %arg23[%c0_173, %c0_174] : memref<1x32xf32, #tpu.memory_space<vmem>>, vector<1x32xf32>
    %323 = vector.broadcast %322 : vector<1x32xf32> to vector<64x32xf32>
    %324 = arith.addf %321, %323 : vector<64x32xf32>
    %cst_175 = arith.constant 0.000000e+00 : f32
    %325 = vector.broadcast %cst_175 : f32 to vector<64x32xf32>
    %326 = arith.maximumf %324, %325 : vector<64x32xf32>
    %327 = arith.truncf %326 : vector<64x32xf32> to vector<64x32xbf16>
    %c0_176 = arith.constant 0 : index
    %c0_177 = arith.constant 0 : index
    %328 = vector.load %arg24[%c0_176, %c0_177] : memref<32x16xbf16, #tpu.memory_space<vmem>>, vector<32x16xbf16>
    %cst_178 = arith.constant dense<0.000000e+00> : vector<64x16xf32>
    %329 = tpu.matmul %327, %328, %cst_178 {dimension_numbers = #tpu.dot_dimension_numbers<[1], [0], [0], [1], [0, 0, 1, 1], [], []>} : vector<64x32xbf16>, vector<32x16xbf16>, vector<64x16xf32> -> vector<64x16xf32>
    %c0_179 = arith.constant 0 : index
    %c0_180 = arith.constant 0 : index
    %330 = vector.load %arg25[%c0_179, %c0_180] : memref<1x16xf32, #tpu.memory_space<vmem>>, vector<1x16xf32>
    %331 = vector.broadcast %330 : vector<1x16xf32> to vector<64x16xf32>
    %332 = arith.addf %329, %331 : vector<64x16xf32>
    %c16_181 = arith.constant 16 : index
    %c0_182 = arith.constant 0 : index
    %333 = vector.load %arg34[%c16_181, %c0_182] : memref<96x16xf32, #tpu.memory_space<vmem>>, vector<64x16xf32>
    %334 = arith.addf %332, %333 : vector<64x16xf32>
    %335 = arith.truncf %334 : vector<64x16xf32> to vector<64x16xbf16>
    %c0_183 = arith.constant 0 : index
    %c0_184 = arith.constant 0 : index
    %336 = vector.load %arg26[%c0_183, %c0_184] : memref<16x64xbf16, #tpu.memory_space<vmem>>, vector<16x64xbf16>
    %cst_185 = arith.constant dense<0.000000e+00> : vector<64x64xf32>
    %337 = tpu.matmul %335, %336, %cst_185 {dimension_numbers = #tpu.dot_dimension_numbers<[1], [0], [0], [1], [0, 0, 1, 1], [], []>} : vector<64x16xbf16>, vector<16x64xbf16>, vector<64x64xf32> -> vector<64x64xf32>
    %c0_186 = arith.constant 0 : index
    %c0_187 = arith.constant 0 : index
    %338 = vector.load %arg27[%c0_186, %c0_187] : memref<1x64xf32, #tpu.memory_space<vmem>>, vector<1x64xf32>
    %339 = vector.broadcast %338 : vector<1x64xf32> to vector<64x64xf32>
    %340 = arith.addf %337, %339 : vector<64x64xf32>
    %cst_188 = arith.constant 0.000000e+00 : f32
    %341 = vector.broadcast %cst_188 : f32 to vector<64x64xf32>
    %342 = arith.maximumf %340, %341 : vector<64x64xf32>
    %cst_189 = arith.constant dense<0.000000e+00> : vector<64xf32>
    %343 = vector.multi_reduction <add>, %342, %cst_189 [0] : vector<64x64xf32> to vector<64xf32>
    %344 = vector.shape_cast %343 : vector<64xf32> to vector<1x64xf32>
    %cst_190 = arith.constant 1.562500e-02 : f32
    %345 = vector.broadcast %cst_190 : f32 to vector<1x64xf32>
    %346 = arith.mulf %344, %345 : vector<1x64xf32>
    %c0_191 = arith.constant 0 : index
    %c0_192 = arith.constant 0 : index
    %347 = vector.load %arg28[%c0_191, %c0_192] : memref<64x10xf32, #tpu.memory_space<vmem>>, vector<64x10xf32>
    %cst_193 = arith.constant dense<0.000000e+00> : vector<1x10xf32>
    %348 = tpu.matmul %346, %347, %cst_193 {dimension_numbers = #tpu.dot_dimension_numbers<[1], [0], [0], [1], [0, 0, 1, 1], [], []>} : vector<1x64xf32>, vector<64x10xf32>, vector<1x10xf32> -> vector<1x10xf32>
    %c0_194 = arith.constant 0 : index
    %c0_195 = arith.constant 0 : index
    %349 = vector.load %arg29[%c0_194, %c0_195] : memref<1x10xf32, #tpu.memory_space<vmem>>, vector<1x10xf32>
    %350 = arith.addf %348, %349 : vector<1x10xf32>
    %c0_196 = arith.constant 0 : index
    %c0_197 = arith.constant 0 : index
    %c0_198 = arith.constant 0 : index
    %351 = vector.load %arg30[%c0_196, %c0_197, %c0_198] : memref<1x1x10xf32, #tpu.memory_space<vmem>>, vector<1x1x10xf32>
    %352 = vector.shape_cast %351 : vector<1x1x10xf32> to vector<1x10xf32>
    %353 = vector.shape_cast %350 : vector<1x10xf32> to vector<1x1x10xf32>
    tpu.vector_store %arg30[%c0_196, %c0_197, %c0_198], %353 {strides = array<i32>} : memref<1x1x10xf32, #tpu.memory_space<vmem>>, vector<1x1x10xf32>,
    return
  }
  func.func @transform_0(%arg0: i32) -> (i32, i32, i32) {
    %c0_i32 = arith.constant 0 : i32
    %c0_i32_0 = arith.constant 0 : i32
    %c0_i32_1 = arith.constant 0 : i32
    return %arg0, %c0_i32, %c0_i32_0 : i32, i32, i32
  }
  func.func @transform_1(%arg0: i32) -> (i32, i32) {
    %c0_i32 = arith.constant 0 : i32
    %c0_i32_0 = arith.constant 0 : i32
    %c0_i32_1 = arith.constant 0 : i32
    return %c0_i32, %c0_i32_0 : i32, i32
  }
  func.func @transform_2(%arg0: i32) -> (i32, i32) {
    %c0_i32 = arith.constant 0 : i32
    %c0_i32_0 = arith.constant 0 : i32
    %c0_i32_1 = arith.constant 0 : i32
    return %c0_i32, %c0_i32_0 : i32, i32
  }
  func.func @transform_3(%arg0: i32) -> (i32, i32) {
    %c0_i32 = arith.constant 0 : i32
    %c0_i32_0 = arith.constant 0 : i32
    %c0_i32_1 = arith.constant 0 : i32
    return %c0_i32, %c0_i32_0 : i32, i32
  }
  func.func @transform_4(%arg0: i32) -> (i32, i32) {
    %c0_i32 = arith.constant 0 : i32
    %c0_i32_0 = arith.constant 0 : i32
    %c0_i32_1 = arith.constant 0 : i32
    return %c0_i32, %c0_i32_0 : i32, i32
  }
  func.func @transform_5(%arg0: i32) -> (i32, i32) {
    %c0_i32 = arith.constant 0 : i32
    %c0_i32_0 = arith.constant 0 : i32
    %c0_i32_1 = arith.constant 0 : i32
    return %c0_i32, %c0_i32_0 : i32, i32
  }
  func.func @transform_6(%arg0: i32) -> (i32, i32) {
    %c0_i32 = arith.constant 0 : i32
    %c0_i32_0 = arith.constant 0 : i32
    %c0_i32_1 = arith.constant 0 : i32
    return %c0_i32, %c0_i32_0 : i32, i32
  }
  func.func @transform_7(%arg0: i32) -> (i32, i32) {
    %c0_i32 = arith.constant 0 : i32
    %c0_i32_0 = arith.constant 0 : i32
    %c0_i32_1 = arith.constant 0 : i32
    return %c0_i32, %c0_i32_0 : i32, i32
  }
  func.func @transform_8(%arg0: i32) -> (i32, i32) {
    %c0_i32 = arith.constant 0 : i32
    %c0_i32_0 = arith.constant 0 : i32
    %c0_i32_1 = arith.constant 0 : i32
    return %c0_i32, %c0_i32_0 : i32, i32
  }
  func.func @transform_9(%arg0: i32) -> (i32, i32) {
    %c0_i32 = arith.constant 0 : i32
    %c0_i32_0 = arith.constant 0 : i32
    %c0_i32_1 = arith.constant 0 : i32
    return %c0_i32, %c0_i32_0 : i32, i32
  }
  func.func @transform_10(%arg0: i32) -> (i32, i32) {
    %c0_i32 = arith.constant 0 : i32
    %c0_i32_0 = arith.constant 0 : i32
    %c0_i32_1 = arith.constant 0 : i32
    return %c0_i32, %c0_i32_0 : i32, i32
  }
  func.func @transform_11(%arg0: i32) -> (i32, i32) {
    %c0_i32 = arith.constant 0 : i32
    %c0_i32_0 = arith.constant 0 : i32
    %c0_i32_1 = arith.constant 0 : i32
    return %c0_i32, %c0_i32_0 : i32, i32
  }
  func.func @transform_12(%arg0: i32) -> (i32, i32) {
    %c0_i32 = arith.constant 0 : i32
    %c0_i32_0 = arith.constant 0 : i32
    %c0_i32_1 = arith.constant 0 : i32
    return %c0_i32, %c0_i32_0 : i32, i32
  }
  func.func @transform_13(%arg0: i32) -> (i32, i32) {
    %c0_i32 = arith.constant 0 : i32
    %c0_i32_0 = arith.constant 0 : i32
    %c0_i32_1 = arith.constant 0 : i32
    return %c0_i32, %c0_i32_0 : i32, i32
  }
  func.func @transform_14(%arg0: i32) -> (i32, i32) {
    %c0_i32 = arith.constant 0 : i32
    %c0_i32_0 = arith.constant 0 : i32
    %c0_i32_1 = arith.constant 0 : i32
    return %c0_i32, %c0_i32_0 : i32, i32
  }
  func.func @transform_15(%arg0: i32) -> (i32, i32) {
    %c0_i32 = arith.constant 0 : i32
    %c0_i32_0 = arith.constant 0 : i32
    %c0_i32_1 = arith.constant 0 : i32
    return %c0_i32, %c0_i32_0 : i32, i32
  }
  func.func @transform_16(%arg0: i32) -> (i32, i32) {
    %c0_i32 = arith.constant 0 : i32
    %c0_i32_0 = arith.constant 0 : i32
    %c0_i32_1 = arith.constant 0 : i32
    return %c0_i32, %c0_i32_0 : i32, i32
  }
  func.func @transform_17(%arg0: i32) -> (i32, i32) {
    %c0_i32 = arith.constant 0 : i32
    %c0_i32_0 = arith.constant 0 : i32
    %c0_i32_1 = arith.constant 0 : i32
    return %c0_i32, %c0_i32_0 : i32, i32
  }
  func.func @transform_18(%arg0: i32) -> (i32, i32) {
    %c0_i32 = arith.constant 0 : i32
    %c0_i32_0 = arith.constant 0 : i32
    %c0_i32_1 = arith.constant 0 : i32
    return %c0_i32, %c0_i32_0 : i32, i32
  }
  func.func @transform_19(%arg0: i32) -> (i32, i32) {
    %c0_i32 = arith.constant 0 : i32
    %c0_i32_0 = arith.constant 0 : i32
    %c0_i32_1 = arith.constant 0 : i32
    return %c0_i32, %c0_i32_0 : i32, i32
  }
  func.func @transform_20(%arg0: i32) -> (i32, i32) {
    %c0_i32 = arith.constant 0 : i32
    %c0_i32_0 = arith.constant 0 : i32
    %c0_i32_1 = arith.constant 0 : i32
    return %c0_i32, %c0_i32_0 : i32, i32
  }
  func.func @transform_21(%arg0: i32) -> (i32, i32) {
    %c0_i32 = arith.constant 0 : i32
    %c0_i32_0 = arith.constant 0 : i32
    %c0_i32_1 = arith.constant 0 : i32
    return %c0_i32, %c0_i32_0 : i32, i32
  }
  func.func @transform_22(%arg0: i32) -> (i32, i32) {
    %c0_i32 = arith.constant 0 : i32
    %c0_i32_0 = arith.constant 0 : i32
    %c0_i32_1 = arith.constant 0 : i32
    return %c0_i32, %c0_i32_0 : i32, i32
  }
  func.func @transform_23(%arg0: i32) -> (i32, i32) {
    %c0_i32 = arith.constant 0 : i32
    %c0_i32_0 = arith.constant 0 : i32
    %c0_i32_1 = arith.constant 0 : i32
    return %c0_i32, %c0_i32_0 : i32, i32
  }
  func.func @transform_24(%arg0: i32) -> (i32, i32) {
    %c0_i32 = arith.constant 0 : i32
    %c0_i32_0 = arith.constant 0 : i32
    %c0_i32_1 = arith.constant 0 : i32
    return %c0_i32, %c0_i32_0 : i32, i32
  }
  func.func @transform_25(%arg0: i32) -> (i32, i32) {
    %c0_i32 = arith.constant 0 : i32
    %c0_i32_0 = arith.constant 0 : i32
    %c0_i32_1 = arith.constant 0 : i32
    return %c0_i32, %c0_i32_0 : i32, i32
  }
  func.func @transform_26(%arg0: i32) -> (i32, i32) {
    %c0_i32 = arith.constant 0 : i32
    %c0_i32_0 = arith.constant 0 : i32
    %c0_i32_1 = arith.constant 0 : i32
    return %c0_i32, %c0_i32_0 : i32, i32
  }
  func.func @transform_27(%arg0: i32) -> (i32, i32) {
    %c0_i32 = arith.constant 0 : i32
    %c0_i32_0 = arith.constant 0 : i32
    %c0_i32_1 = arith.constant 0 : i32
    return %c0_i32, %c0_i32_0 : i32, i32
  }
  func.func @transform_28(%arg0: i32) -> (i32, i32) {
    %c0_i32 = arith.constant 0 : i32
    %c0_i32_0 = arith.constant 0 : i32
    %c0_i32_1 = arith.constant 0 : i32
    return %c0_i32, %c0_i32_0 : i32, i32
  }
  func.func @transform_29(%arg0: i32) -> (i32, i32, i32) {
    %c0_i32 = arith.constant 0 : i32
    %c0_i32_0 = arith.constant 0 : i32
    %c0_i32_1 = arith.constant 0 : i32
    return %arg0, %c0_i32, %c0_i32_0 : i32, i32, i32
  }
}

</mosaic_0001>

<bundles_post_ra>
// kernel: forward.1
= control target key start
LH: loop header
LB: loop body
LE: loop exit
PB: predicated region body
PF: predicated region fallthrough
CT: control target
= control target key end

     0   :  { %s6635_s6 = smov 1   ;;  %s6636_s10 = smov 2   ;;  %s9673_s0 = inlined_call_operand.smem [shape: u32[30], index: -1, kind: input, shape index: {}] }
   0x1   :  { %s6684_s5 = sld [smem:[%s9673_s0]]   ;;  %s6637_s14 = smov 3  }
   0x2   :  { %s6689_s9 = sld [smem:[%s9673_s0 + %s6635_s6]]   ;;  %s6638_s18 = smov 4  }
   0x3   :  { %s6694_s13 = sld [smem:[%s9673_s0 + %s6636_s10]]   ;;  %s6639_s22 = smov 5  }
   0x4   :  { %s6699_s17 = sld [smem:[%s9673_s0 + %s6637_s14]]   ;;  %s6640_s26 = smov 6  }
   0x5   :  { %s6704_s21 = sld [smem:[%s9673_s0 + %s6638_s18]]   ;;  %s6641_s30 = smov 7  }
   0x6   :  { %s6709_s25 = sld [smem:[%s9673_s0 + %s6639_s22]]   ;;  %s6642_s4 = smov 8  }
   0x7   :  { %9802 = sst [smem:[#allocation9_spill]] %s6684_s5  ;;  %s6643_s10 = smov 9  }
   0x8   :  { %9803 = sst [smem:[#allocation10_spill]] %s6689_s9  ;;  %s6644_s15 = smov 10  }
   0x9   :  { %9804 = sst [smem:[#allocation11_spill]] %s6694_s13  ;;  %s6645_s20 = smov 11  }
   0xa   :  { %s6714_s29 = sld [smem:[%s9673_s0 + %s6640_s26]]   ;;  %s6646_s26 = smov 12  }
   0xb   :  { %s6719_s3 = sld [smem:[%s9673_s0 + %s6641_s30]]   ;;  %s6647_s1 = smov 13  }
   0xc   :  { %s6724_s8 = sld [smem:[%s9673_s0 + %s6642_s4]]   ;;  %s6648_s7 = smov 14  }
   0xd   :  { %s6729_s14 = sld [smem:[%s9673_s0 + %s6643_s10]]   ;;  %s6650_s22 = smov 16  }
   0xe   :  { %s6734_s19 = sld [smem:[%s9673_s0 + %s6644_s15]]   ;;  %s6649_s15 = smov 15  }
   0xf   :  { %s6739_s24 = sld [smem:[%s9673_s0 + %s6645_s20]]   ;;  %s6651_s28 = smov 17  }
  0x10   :  { %s6744_s30 = sld [smem:[%s9673_s0 + %s6646_s26]]  }
  0x11   :  { %9805 = sst [smem:[#allocation12_spill]] %s6719_s3 }
  0x12   :  { %9806 = sst [smem:[#allocation13_spill]] %s6724_s8 }
  0x13   :  { %9807 = sst [smem:[#allocation14_spill]] %s6729_s14 }
  0x14   :  { %s6749_s6 = sld [smem:[%s9673_s0 + %s6647_s1]]  }
  0x15   :  { %s6754_s12 = sld [smem:[%s9673_s0 + %s6648_s7]]   ;;  %s6652_s7 = smov 18  }
  0x16   :  { %s6759_s20 = sld [smem:[%s9673_s0 + %s6649_s15]]   ;;  %s6653_s15 = smov 19  }
  0x17   :  { %s6764_s27 = sld [smem:[%s9673_s0 + %s6650_s22]]   ;;  %s6654_s22 = smov 20  }
  0x18   :  { %s6769_s4 = sld [smem:[%s9673_s0 + %s6651_s28]]   ;;  %s6655_s28 = smov 21  }
  0x1a   :  { %9808 = sst [smem:[#allocation15_spill]] %s6749_s6 }
  0x1b   :  { %9809 = sst [smem:[#allocation16_spill]] %s6754_s12 }
  0x1c   :  { %9810 = sst [smem:[#allocation17_spill]] %s6759_s20 }
  0x1d   :  { %9811 = sst [smem:[#allocation18_spill]] %s6764_s27 }
  0x1e   :  { %9812 = sst [smem:[#allocation19_spill]] %s6769_s4 }
  0x1f   :  { %s6774_s12 = sld [smem:[%s9673_s0 + %s6652_s7]]   ;;  %s6656_s7 = smov 22  }
  0x20   :  { %s6779_s20 = sld [smem:[%s9673_s0 + %s6653_s15]]   ;;  %s6657_s15 = smov 23  }
  0x21   :  { %s6784_s27 = sld [smem:[%s9673_s0 + %s6654_s22]]   ;;  %s6658_s22 = smov 24  }
  0x22   :  { %s6789_s4 = sld [smem:[%s9673_s0 + %s6655_s28]]   ;;  %s6659_s28 = smov 25  }
  0x25   :  { %9813 = sst [smem:[#allocation20_spill]] %s6774_s12 }
  0x26   :  { %9814 = sst [smem:[#allocation21_spill]] %s6779_s20 }
  0x27   :  { %9815 = sst [smem:[#allocation22_spill]] %s6784_s27 }
  0x28   :  { %9816 = sst [smem:[#allocation23_spill]] %s6789_s4 }
  0x29   :  { %s6794_s12 = sld [smem:[%s9673_s0 + %s6656_s7]]   ;;  %s6660_s7 = smov 26  }
  0x2a   :  { %s6799_s20 = sld [smem:[%s9673_s0 + %s6657_s15]]   ;;  %s6661_s15 = smov 27  }
  0x2b   :  { %s6804_s27 = sld [smem:[%s9673_s0 + %s6658_s22]]   ;;  %s6662_s22 = smov 28  }
  0x2c   :  { %s6809_s4 = sld [smem:[%s9673_s0 + %s6659_s28]]   ;;  %s6663_s28 = smov 29  }
  0x2f   :  { %9817 = sst [smem:[#allocation24_spill]] %s6794_s12 }
  0x30   :  { %9818 = sst [smem:[#allocation25_spill]] %s6799_s20 }
  0x31   :  { %9819 = sst [smem:[#allocation26_spill]] %s6804_s27 }
  0x32   :  { %9820 = sst [smem:[#allocation27_spill]] %s6809_s4 }
  0x33   :  { %s6814_s12 = sld [smem:[%s9673_s0 + %s6660_s7]]  }
  0x34   :  { %s6819_s20 = sld [smem:[%s9673_s0 + %s6661_s15]]  }
  0x35   :  { %s6824_s27 = sld [smem:[%s9673_s0 + %s6662_s22]]  }
  0x36   :  { %s6829_s4 = sld [smem:[%s9673_s0 + %s6663_s28]]  }
  0x39   :  { %9821 = sst [smem:[#allocation28_spill]] %s6814_s12 }
  0x3a   :  { %64 = vsyncpa [#allocation7], 0 }
  0x3b   :  { %66 = vsyncpa [#allocation7 + $0x1], 0  ;;  %s6831_s7 = smov 0   ;;  %s6833_s10 = smov 0  }
  0x3c   :  { %s6835_s11 = smov 0   ;;  %s6837_s15 = smov 0  }
  0x3d LB: > { %s9822_s13 = sld [smem:[#allocation11_spill]]  ;;  %s9823_s9 = sld [smem:[#allocation10_spill]]  ;;  %s6629_s11 = sphi %s6835_s11, %s10340_s11   ;;  %s6625_s10 = sphi %s6833_s10, %s10339_s10   ;;  %s6621_s7 = sphi %s6831_s7, %s10338_s7   ;;  %s6633_s15 = sphi %s6837_s15, %s10341_s15  }
  0x3e   : > { %s9824_s6 = sld [smem:[#allocation15_spill]]  ;;  %s6852_s0 = sadd.s32 4294967295, %s6633_s15  }
  0x3f   : > { %s5864_s16 = sadd.s32 4294967294, %s6633_s15   ;;  %s6856_s18 = sadd.s32 1, %s6633_s15  }
  0x40   : > { %s693_s22 = sadd.s32 1, %s6629_s11  ;;  %s690_s23 = ssub.s32 %s6633_s15, %s6856_s18 }
  0x41   : > { %p703_p0 = scmp.ne.s32.totalorder %s6629_s11, %s6625_s10  ;;  %p691_p1 = scmp.eq.s32.totalorder %s690_s23, 0 }
  0x42   : > { %p704_p2 = scmp.eq.s32.totalorder %s6852_s0, 1  ;;  %p709_p3 = scmp.ne.s32.totalorder %s6625_s10, %s6621_s7 }
  0x43   : > { %p710_p4 = scmp.eq.s32.totalorder %s5864_s16, 1  ;;  %p5867_p7 = scmp.ge.s32.totalorder %s6633_s15, 1 }
  0x44   : > { %s6867_s26 = scalar_select %p691_p1, %s6629_s11, %s693_s22  }
  0x45   : > { %p6869_p5 = por %p704_p2, %p703_p0  ;;  %p6873_p6 = por %p710_p4, %p709_p3 }
  0x46   : > { %p820_p8 = scmp.lt.s32.totalorder %s6633_s15, 3 }
  0x48   : > { %p821_p9 = pnand %p5867_p7, %p820_p8 }
  0x4a   : > { %824 = sbr.rel (%p821_p9) target bundleno = 3375 (0xd2f), region = 136 }
  0x51   : > { %s9827_s5 = sld [smem:[#allocation9_spill]]  ;;  %v6501_v0 = vld [vmem:[%s9823_s9] sm:$0xff]   ;;  %p895_p10 = scmp.lt.s32.totalorder %s6852_s0, 1  ;;  %v6502_v1 = vld [vmem:[%s9823_s9 + $0x8] sm:$0xff]   ;;  %vm9770_vm0 = vcmask 261120   ;;  %vm9773_vm1 = vcmask 64512   ;;  %v1330_v21 = vlaneseq }
  0x52   : > { %6079 = vmatprep.subr.bf16.mxu0 %v6501_v0  ;;  %v9686_v18 = vmov 0.0   ;;  %v6944_v19 = vld [vmem:[%s9822_s13] ss:$0 sm:$0xff]  ;;  %vm9771_vm5 = vmmov 0   ;;  %s10077_s3 = sld [smem:[#allocation12_spill]]  ;;  %s10080_s14 = sld [smem:[#allocation14_spill]] }
  0x53   : > { %s896_s2 = scalar_select %p895_p10, %s6852_s0, 1  ;;  %6080 = vmatpush3.bf16.msra.mxu0 %v6501_v0  ;;  %902 = vst.msk [vmem:[#allocation2] sm:$0xff] %vm9773_vm1, %v9686_v18  ;;  %903 = vst.msk [vmem:[#allocation2 + $0x8] sm:$0xff] %vm9773_vm1, %v9686_v18  ;;  %6115 = vmatprep.subr.mxu1 %v9686_v18  ;;  %v6949_v29 = vshrl.u32 %v1330_v21, 7  ;;  %v1328_v37 = vld [vmem:[%s6699_s17] sm:$0xff] }
  0x54   : > { %6081 = vmatprep.subr.bf16.mxu0 %v6502_v1  ;;  %904 = vst.msk [vmem:[#allocation2 + $0x10] sm:$0xff] %vm9773_vm1, %v9686_v18  ;;  %905 = vst.msk [vmem:[#allocation2 + $0x118] sm:$0xff] %vm9773_vm1, %v9686_v18  ;;  %s10084_s8 = sld [smem:[#allocation13_spill]]  ;;  %s10162_s23 = sld [smem:[#allocation16_spill]] }
  0x55   : > { %s5989_s16 = sshll.u32 %s896_s2, 7  ;;  %906 = vst.msk [vmem:[#allocation2 + $0x120] sm:$0xff] %vm9773_vm1, %v9686_v18  ;;  %907 = vst.msk [vmem:[#allocation2 + $0x128] sm:$0xff] %vm9773_vm1, %v9686_v18  ;;  %v9685_v34 = vsub.s32 1, %v6949_v29  ;;  %v6957_v35 = vsub.s32 0, %v6949_v29  ;;  %v9684_v38 = vsub.s32 4, %v6949_v29 }
  0x56   : > { %909 = vst.msk [vmem:[#allocation3] sm:$0xff] %vm9770_vm0, %v9686_v18  ;;  %910 = vst.msk [vmem:[#allocation3 + $0x8] sm:$0xff] %vm9770_vm0, %v9686_v18  ;;  %v9681_v41 = vsub.s32 7, %v6949_v29  ;;  %v9683_v42 = vsub.s32 3, %v6949_v29  ;;  %v9680_v43 = vsub.s32 2, %v6949_v29  ;;  %v9682_v51 = vsub.s32 6, %v6949_v29 }
  0x57   : > { %s6884_s22 = scalar_lea.vmem %s9827_s5, %s5989_s16  ;;  %6082 = vmatpush3.bf16.msra.mxu0 %v6502_v1  ;;  %911 = vst.msk [vmem:[#allocation3 + $0x10] sm:$0xff] %vm9770_vm0, %v9686_v18  ;;  %912 = vst.msk [vmem:[#allocation3 + $0x118] sm:$0xff] %vm9770_vm0, %v9686_v18  ;;  %v6972_v49 = vrot.slane %v1328_v37, %v9685_v34  ;;  %v6975_v50 = vrot.slane %v1328_v37, %v6957_v35  ;;  %v9679_v55 = vsub.s32 5, %v6949_v29  ;;  %v6998_v0 = vadd.s32 8, %v6949_v29  ;;  %s10165_s2 = sld [smem:[#allocation17_spill]] }
  0x58   : > { %v6503_v2 = vld [vmem:[%s6884_s22] sm:$0xff]   ;;  %v6504_v3 = vld [vmem:[%s6884_s22 + $0x8] sm:$0xff]   ;;  %v6505_v4 = vld [vmem:[%s6884_s22 + $0x10] sm:$0xff]   ;;  %913 = vst.msk [vmem:[#allocation3 + $0x120] sm:$0xff] %vm9770_vm0, %v9686_v18  ;;  %v6982_v57 = vrot.slane %v1328_v37, %v9684_v38  ;;  %v6986_v58 = vrot.slane %v1328_v37, %v9681_v41  ;;  %v6990_v59 = vrot.slane %v1328_v37, %v9683_v42  ;;  %v6994_v60 = vrot.slane %v1328_v37, %v9680_v43  ;;  %s10224_s16 = sld [smem:[#allocation19_spill]]  ;;  %s10279_s5 = smov 80  }
  0x59   : > { %6083 = vmatprep.mubr.msk.bf16.mxu0 %vm9770_vm0, %v6503_v2  ;;  %v6506_v5 = vld [vmem:[%s6884_s22 + $0x18] sm:$0xff]   ;;  %v6507_v6 = vld [vmem:[%s6884_s22 + $0x20] sm:$0xff]   ;;  %v6508_v7 = vld [vmem:[%s6884_s22 + $0x28] sm:$0xff]   ;;  %914 = vst.msk [vmem:[#allocation3 + $0x128] sm:$0xff] %vm9770_vm0, %v9686_v18  ;;  %v7001_v1 = vadd.s32 16, %v6949_v29  ;;  %v7005_v2 = vadd.s32 24, %v6949_v29 }
  0x5a   : > { %6084 = vmatmul.mubr.msk.bf16.vlgmr.msra.gmra.mrb[0].mxu0 %vm9770_vm0, %v6504_v3  ;;  %v6509_v8 = vld [vmem:[%s6884_s22 + $0x30] sm:$0xff]   ;;  %v6510_v9 = vld [vmem:[%s6884_s22 + $0x38] sm:$0xff]   ;;  %v6511_v10 = vld [vmem:[%s6884_s22 + $0x40] sm:$0xff]   ;;  %9828 = vst [vmem:[#allocation29_spill] sm:$0xff] %v6949_v29  ;;  %v7008_v3 = vadd.s32 32, %v6949_v29  ;;  %v9851_v21 = vand.u32 15, %v6949_v29 }
  0x5b   : > { %6087 = vmatprep.mubr.msk.bf16.mxu0 %vm9770_vm0, %v6505_v4  ;;  %v6512_v11 = vld [vmem:[%s6884_s22 + $0x48] sm:$0xff]   ;;  %v6513_v12 = vld [vmem:[%s6884_s22 + $0x50] sm:$0xff]   ;;  %v6514_v13 = vld [vmem:[%s6884_s22 + $0x58] sm:$0xff]   ;;  %9829 = vst [vmem:[#allocation30_spill] sm:$0xff] %v6957_v35  ;;  %v9850_v35 = vmov 0.0   ;;  %s10282_s9 = smov 48  }
  0x5c   : > { %v6515_v14 = vld [vmem:[%s6884_s22 + $0x60] sm:$0xff]   ;;  %v6516_v15 = vld [vmem:[%s6884_s22 + $0x68] sm:$0xff]   ;;  %v6517_v16 = vld [vmem:[%s6884_s22 + $0x70] sm:$0xff]   ;;  %9830 = vst [vmem:[#allocation31_spill] sm:$0xff] %v6998_v0  ;;  %vm7142_vm2 = vcmp.gt.s32.totalorder %v9851_v21, 0  ;;  %6117 = vmatprep.mubr.msk.f32.mxu1 %vm9771_vm5, %v9850_v35  ;;  %s10328_s12 = sld [smem:[#allocation28_spill]] }
  0x5d   : > { %v6518_v17 = vld [vmem:[%s6884_s22 + $0x78] sm:$0xff]   ;;  %v1747_v53 = vld [vmem:[#allocation2 + $0x7] sm:$0xff]  ;;  %v1748_v61 = vld [vmem:[#allocation2 + $0xf] sm:$0xff]  ;;  %9831 = vst [vmem:[#allocation32_spill] sm:$0xff] %v7001_v1  ;;  %s10225_s22 = sld [smem:[#allocation18_spill]] }
  0x5e   : > { %v1955_v54 = vld [vmem:[#allocation2 + $0x8] sm:$0xff]  ;;  %v1956_v62 = vld [vmem:[#allocation2 + $0x10] sm:$0xff]  ;;  %9832 = vst [vmem:[#allocation33_spill] sm:$0xff] %v7005_v2  ;;  %9833 = vst [vmem:[#allocation34_spill] sm:$0xff] %v7008_v3  ;;  %v7011_v4 = vmul.f32 %v6975_v50, %v1747_v53  ;;  %v7091_v53 = vadd.s32 136, %v6949_v29 }
  0x5f   : > { %v2163_v63 = vld [vmem:[#allocation2 + $0x9] sm:$0xff] }
  0x60   : > { %9846 = vst [vmem:[#allocation47_spill] sm:$0xff] %v7091_v53 }
  0x62   : > { %6088 = vmatmul.mubr.msk.bf16.gmra.mrb[4].mxu0 %vm9770_vm0, %v6506_v5  ;;  %v7014_v5 = vmul.f32 %v6972_v49, %v1955_v54  ;;  %v7094_v54 = vadd.s32 144, %v6949_v29 }
  0x63   : > { %6091 = vmatprep.mubr.msk.bf16.mxu0 %vm9770_vm0, %v6507_v6  ;;  %v7018_v6 = vrot.slane %v1328_v37, %v9682_v51 }
  0x64   : > { %9847 = vst [vmem:[#allocation48_spill] sm:$0xff] %v7094_v54 }
  0x6a   : > { %6092 = vmatmul.mubr.msk.bf16.gmra.mrb[8].mxu0 %vm9770_vm0, %v6508_v7 }
  0x6b   : > { %6095 = vmatprep.mubr.msk.bf16.mxu0 %vm9770_vm0, %v6509_v8  ;;  %v7023_v8 = vadd.s32 40, %v6949_v29 }
  0x6d   : > { %9834 = vst [vmem:[#allocation35_spill] sm:$0xff] %v7023_v8 }
  0x72   : > { %6096 = vmatmul.mubr.msk.bf16.gmra.mrb[12].mxu0 %vm9770_vm0, %v6510_v9  ;;  %v7027_v9 = vrot.slane %v1328_v37, %v9679_v55  ;;  %v7074_v37 = vadd.s32 104, %v6949_v29 }
  0x73   : > { %6099 = vmatprep.mubr.msk.bf16.mxu0 %vm9770_vm0, %v6511_v10  ;;  %v9852_v10 = vmov 0 }
  0x74   : > { %9842 = vst [vmem:[#allocation43_spill] sm:$0xff] %v7074_v37  ;;  %v9853_v10 = vsel %vm7142_vm2, 4294967295, %v9852_v10 }
  0x75   : > { %9854 = vst [vmem:[#allocation51_spill] sm:$0xff] %v9853_v10 }
  0x7a   : > { %6100 = vmatmul.mubr.msk.bf16.gmra.mrb[16].mxu0 %vm9770_vm0, %v6512_v11 }
  0x7b   : > { %6103 = vmatprep.mubr.msk.bf16.mxu0 %vm9770_vm0, %v6513_v12  ;;  %v7033_v12 = vadd.s32 48, %v6949_v29 }
  0x7d   : > { %9835 = vst [vmem:[#allocation36_spill] sm:$0xff] %v7033_v12 }
  0x82   : > { %6104 = vmatmul.mubr.msk.bf16.gmra.mrb[20].mxu0 %vm9770_vm0, %v6514_v13  ;;  %v7036_v13 = vadd.s32 56, %v6949_v29 }
  0x83   : > { %6107 = vmatprep.mubr.msk.bf16.mxu0 %vm9770_vm0, %v6515_v14  ;;  %v7039_v14 = vmul.f32 %v6975_v50, %v1748_v61  ;;  %v7100_v61 = vadd.s32 160, %v6949_v29 }
  0x84   : > { %9836 = vst [vmem:[#allocation37_spill] sm:$0xff] %v7036_v13 }
  0x85   : > { %9849 = vst [vmem:[#allocation50_spill] sm:$0xff] %v7100_v61 }
  0x8a   : > { %6108 = vmatmul.mubr.msk.bf16.gmra.mrb[24].mxu0 %vm9770_vm0, %v6516_v15  ;;  %v7042_v15 = vmul.f32 %v6972_v49, %v1956_v62 }
  0x8b   : > { %6111 = vmatprep.mubr.msk.bf16.mxu0 %vm9770_vm0, %v6517_v16  ;;  %v7045_v16 = vmul.f32 %v6994_v60, %v2163_v63 }
  0x92   : > { %6112 = vmatmul.mubr.msk.bf16.gmra.mrb[28].mxu0 %vm9770_vm0, %v6518_v17 }
 0x12d   : > { %v6085_v20 = vpop.f32.mrb[0].mxu0 }
 0x12e   : > { %v1146_v22 = vadd.f32 %v6085_v20, %v6944_v19  ;;  %v1137_v23 = vpop.f32.mrb[1].mxu0  ;;  %v7050_v20 = vadd.s32 64, %v6949_v29 }
 0x12f   : > { %v1138_v24 = vadd.f32 %v6944_v19, %v1137_v23  ;;  %v6086_v25 = vpop.f32.mrb[2].mxu0 }
 0x130   : > { %v1266_v26 = vmax.f32 %v1146_v22, 0.0  ;;  %v1149_v27 = vadd.f32 %v6086_v25, %v6944_v19  ;;  %v1140_v28 = vpop.f32.mrb[3].mxu0  ;;  %9837 = vst [vmem:[#allocation38_spill] sm:$0xff] %v7050_v20 }
 0x131   : > { %v1264_v30 = vmax.f32 %v1138_v24, 0.0  ;;  %v1141_v31 = vadd.f32 %v6944_v19, %v1140_v28  ;;  %v7063_v28 = vadd.s32 80, %v6949_v29 }
 0x132   : > { %1298 = vst.msk [vmem:[#allocation2 + $0x28] sm:$0xff] %vm9773_vm1, %v1266_v26  ;;  %v1267_v32 = vmax.f32 %v1149_v27, 0.0  ;;  %v7060_v27 = vadd.s32 72, %v6949_v29 }
 0x133   : > { %1296 = vst.msk [vmem:[#allocation2 + $0x18] sm:$0xff] %vm9773_vm1, %v1264_v30  ;;  %v1265_v33 = vmax.f32 %v1141_v31, 0.0  ;;  %9839 = vst [vmem:[#allocation40_spill] sm:$0xff] %v7063_v28  ;;  %v7066_v30 = vadd.s32 88, %v6949_v29 }
 0x134   : > { %1299 = vst.msk [vmem:[#allocation2 + $0x30] sm:$0xff] %vm9773_vm1, %v1267_v32  ;;  %9838 = vst [vmem:[#allocation39_spill] sm:$0xff] %v7060_v27  ;;  %v2832_v32 = vld [vmem:[%s6709_s25] sm:$0xff] }
 0x135   : > { %1297 = vst.msk [vmem:[#allocation2 + $0x20] sm:$0xff] %vm9773_vm1, %v1265_v33  ;;  %v6089_v36 = vpop.f32.mrb[4].mxu0  ;;  %9840 = vst [vmem:[#allocation41_spill] sm:$0xff] %v7066_v30  ;;  %6116 = vmatpush3.msra.mxu1 %v2832_v32 }
 0x136   : > { %v1162_v39 = vadd.f32 %v6089_v36, %v6944_v19  ;;  %v1153_v40 = vpop.f32.mrb[5].mxu0  ;;  %v7071_v36 = vadd.s32 96, %v6949_v29  ;;  %6120 = vmatprep.subr.mxu1 %v9850_v35 }
 0x137   : > { %v1154_v44 = vadd.f32 %v6944_v19, %v1153_v40  ;;  %v6090_v45 = vpop.f32.mrb[6].mxu0 }
 0x138   : > { %v1270_v46 = vmax.f32 %v1162_v39, 0.0  ;;  %v1165_v47 = vadd.f32 %v6090_v45, %v6944_v19  ;;  %v6968_v48 = vpop.f32.mrb[7].mxu0  ;;  %9841 = vst [vmem:[#allocation42_spill] sm:$0xff] %v7071_v36  ;;  %v7080_v45 = vadd.s32 112, %v6949_v29 }
 0x139   : > { %v1268_v52 = vmax.f32 %v1154_v44, 0.0  ;;  %v1959_v51 = vld [vmem:[#allocation2 + $0x28] sm:$0xff]  ;;  %v1157_v18 = vadd.f32 %v6944_v19, %v6968_v48 }
 0x13a   : > { %1302 = vst.msk [vmem:[#allocation2 + $0x48] sm:$0xff] %vm9773_vm1, %v1270_v46  ;;  %v1271_v56 = vmax.f32 %v1165_v47, 0.0  ;;  %v1957_v31 = vld [vmem:[#allocation2 + $0x18] sm:$0xff]  ;;  %9843 = vst [vmem:[#allocation44_spill] sm:$0xff] %v7080_v45  ;;  %v7083_v46 = vadd.s32 120, %v6949_v29  ;;  %v7086_v47 = vadd.s32 128, %v6949_v29  ;;  %v7131_v41 = vmul.f32 %v6972_v49, %v1959_v51 }
 0x13b   : > { %1300 = vst.msk [vmem:[#allocation2 + $0x38] sm:$0xff] %vm9773_vm1, %v1268_v52  ;;  %v1749_v39 = vld [vmem:[#allocation2 + $0x17] sm:$0xff]  ;;  %v2029_v62 = vmul.f32 %v6982_v57, %v1957_v31  ;;  %v7134_v23 = vmul.f32 %v6982_v57, %v1959_v51  ;;  %v1752_v44 = vld [vmem:[#allocation2 + $0x2f] sm:$0xff]  ;;  %v7163_v48 = vmul.f32 %v6972_v49, %v1957_v31  ;;  %v1269_v28 = vmax.f32 %v1157_v18, 0.0 }
 0x13c   : > { %1303 = vst.msk [vmem:[#allocation2 + $0x50] sm:$0xff] %vm9773_vm1, %v1271_v56  ;;  %v7076_v40 = vld [vmem:[#allocation2 + $0x1f] sm:$0xff]  ;;  %9844 = vst [vmem:[#allocation45_spill] sm:$0xff] %v7083_v46  ;;  %v7097_v56 = vadd.s32 152, %v6949_v29  ;;  %v1821_v42 = vmul.f32 %v6990_v59, %v1749_v39  ;;  %v7114_v26 = vld [vmem:[#allocation2 + $0x27] sm:$0xff]  ;;  %v7181_v31 = vmul.f32 %v6990_v59, %v1752_v44 }
 0x13d   : > { %v7020_v7 = vpop.f32.mrb[8].mxu0  ;;  %9845 = vst [vmem:[#allocation46_spill] sm:$0xff] %v7086_v47  ;;  %v7088_v52 = vld [vmem:[#allocation2 + $0x20] sm:$0xff]  ;;  %v1822_v38 = vmul.f32 %v6990_v59, %v7076_v40  ;;  %v2061_v32 = vadd.f32 %v2029_v62, %v7014_v5  ;;  %v2164_v24 = vld [vmem:[#allocation2 + $0x11] sm:$0xff]  ;;  %v7138_v46 = vld [vmem:[%s6699_s17 + $0x8] ss:$0 sm:$0xff]  ;;  %v1891_v54 = vmul.f32 %v7018_v6, %v7114_v26  ;;  %v7160_v47 = vmul.f32 %v6975_v50, %v1749_v39 }
 0x13e   : > { %v7030_v11 = vpop.f32.mrb[9].mxu0  ;;  %9848 = vst [vmem:[#allocation49_spill] sm:$0xff] %v7097_v56  ;;  %v2030_v55 = vmul.f32 %v6982_v57, %v7088_v52  ;;  %v7121_v22 = vld [vmem:[#allocation2 + $0x21] sm:$0xff]  ;;  %v2099_v56 = vmul.f32 %v6986_v58, %v1959_v51  ;;  %v1853_v61 = vadd.f32 %v1821_v42, %v7011_v4  ;;  %v7150_v53 = vld [vmem:[#allocation2 + $0x30] sm:$0xff]  ;;  %v7166_v42 = vld [vmem:[#allocation2 + $0x19] sm:$0xff]  ;;  %v2200_v37 = vmul.f32 %v6994_v60, %v2164_v24 }
 0x13f   : > { %v7047_v17 = vpop.f32.mrb[10].mxu0  ;;  %v7152_v5 = vld [vmem:[#allocation2 + $0x29] sm:$0xff]  ;;  %v1854_v62 = vadd.f32 %v1822_v38, %v7039_v14  ;;  %v2238_v4 = vmul.f32 %v7027_v9, %v7121_v22  ;;  %v9855_v38 = vand.u32 15, %v6998_v0  ;;  %v9856_v14 = vmov 0  ;;  %1301 = vst.msk [vmem:[#allocation2 + $0x40] sm:$0xff] %vm9773_vm1, %v1269_v28 }
 0x140   : > { %v7056_v25 = vpop.f32.mrb[11].mxu0  ;;  %v2062_v51 = vadd.f32 %v2030_v55, %v7042_v15  ;;  %v7178_v39 = vmul.f32 %v6975_v50, %v1752_v44  ;;  %v1892_v55 = vmul.f32 %v7018_v6, %v1752_v44  ;;  %v2131_v15 = vadd.f32 %v2099_v56, %v2061_v32 }
 0x141   : > { %vm7172_vm3 = vcmp.lt.s32.totalorder %v9855_v38, 15  ;;  %v2100_v45 = vmul.f32 %v6986_v58, %v7150_v53  ;;  %v2307_v38 = vmul.f32 %v7138_v46, %v7152_v5  ;;  %v1923_v24 = vadd.f32 %v1891_v54, %v1853_v61 }
 0x142   : > { %v7157_v21 = vld [vmem:[#allocation2 + $0x31] sm:$0xff]  ;;  %v9857_v14 = vsel %vm7172_vm3, 4294967295, %v9856_v14  ;;  %v1924_v36 = vadd.f32 %v1892_v55, %v1854_v62  ;;  %v2237_v27 = vmul.f32 %v7027_v9, %v7166_v42  ;;  %v2270_v44 = vadd.f32 %v2238_v4, %v2200_v37 }
 0x143   : > { %9858 = vst [vmem:[#allocation52_spill] sm:$0xff] %v9857_v14  ;;  %v2308_v0 = vmul.f32 %v7138_v46, %v7157_v21  ;;  %v2132_v20 = vadd.f32 %v2100_v45, %v2062_v51  ;;  %v1178_v56 = vadd.f32 %v7020_v7, %v6944_v19  ;;  %v1170_v32 = vadd.f32 %v6944_v19, %v7030_v11  ;;  %v2171_v35 = vld [vmem:[#allocation2 + $0x49] sm:$0xff] }
 0x144   : > { %v1181_v54 = vadd.f32 %v7047_v17, %v6944_v19  ;;  %v1173_v61 = vadd.f32 %v6944_v19, %v7056_v25  ;;  %v2269_v17 = vadd.f32 %v2237_v27, %v7045_v16 }
 0x145   : > { %v7103_v63 = vpop.f32.mrb[12].mxu0  ;;  %v2340_v62 = vadd.f32 %v2308_v0, %v2270_v44  ;;  %v1274_v7 = vmax.f32 %v1178_v56, 0.0  ;;  %v1272_v51 = vmax.f32 %v1170_v32, 0.0  ;;  %v9859_v44 = vand.u32 15, %v7001_v1 }
 0x146   : > { %v1185_v34 = vpop.f32.mrb[13].mxu0  ;;  %v1194_v18 = vadd.f32 %v7103_v63, %v6944_v19  ;;  %v1275_v4 = vmax.f32 %v1181_v54, 0.0  ;;  %v1273_v55 = vmax.f32 %v1173_v61, 0.0  ;;  %v2467_v63 = vsel %vm7142_vm2, %v1923_v24, 0.0  ;;  %v1753_v24 = vld [vmem:[#allocation2 + $0x37] sm:$0xff] }
 0x147   : > { %v6098_v43 = vpop.f32.mrb[14].mxu0  ;;  %v1186_v37 = vadd.f32 %v6944_v19, %v1185_v34  ;;  %1306 = vst.msk [vmem:[#allocation2 + $0x68] sm:$0xff] %vm9773_vm1, %v1274_v7  ;;  %1304 = vst.msk [vmem:[#allocation2 + $0x58] sm:$0xff] %vm9773_vm1, %v1272_v51  ;;  %vm7226_vm4 = vcmp.gt.s32.totalorder %v9859_v44, 0  ;;  %v2628_v32 = vsel %vm7172_vm3, %v2340_v62, 0.0  ;;  %v2500_v7 = vadd.f32 %v2132_v20, %v1924_v36  ;;  %v1961_v51 = vld [vmem:[#allocation2 + $0x38] sm:$0xff] }
 0x148   : > { %v7123_v33 = vpop.f32.mrb[15].mxu0  ;;  %v1197_v11 = vadd.f32 %v6098_v43, %v6944_v19  ;;  %v1278_v28 = vmax.f32 %v1194_v18, 0.0  ;;  %1307 = vst.msk [vmem:[#allocation2 + $0x70] sm:$0xff] %vm9773_vm1, %v1275_v4  ;;  %1305 = vst.msk [vmem:[#allocation2 + $0x60] sm:$0xff] %vm9773_vm1, %v1273_v55  ;;  %v2063_v4 = vadd.f32 %v7134_v23, %v7163_v48  ;;  %v7245_v62 = vmul.f32 %v6972_v49, %v7150_v53  ;;  %v1963_v48 = vld [vmem:[#allocation2 + $0x48] sm:$0xff] }
 0x149   : > { %v1276_v12 = vmax.f32 %v1186_v37, 0.0  ;;  %v1189_v34 = vadd.f32 %v6944_v19, %v7123_v33  ;;  %v1823_v33 = vmul.f32 %v6990_v59, %v7114_v26  ;;  %v2339_v37 = vadd.f32 %v2307_v38, %v2269_v17 }
 0x14a   : > { %v1279_v25 = vmax.f32 %v1197_v11, 0.0  ;;  %1310 = vst.msk [vmem:[#allocation2 + $0x88] sm:$0xff] %vm9773_vm1, %v1278_v28  ;;  %v2032_v55 = vmul.f32 %v6982_v57, %v7150_v53  ;;  %v2239_v23 = vmul.f32 %v7027_v9, %v7152_v5  ;;  %v1994_v36 = vmul.f32 %v6972_v49, %v7088_v52 }
 0x14b   : > { %1308 = vst.msk [vmem:[#allocation2 + $0x78] sm:$0xff] %vm9773_vm1, %v1276_v12  ;;  %v1277_v12 = vmax.f32 %v1189_v34, 0.0  ;;  %v2201_v53 = vmul.f32 %v6994_v60, %v7166_v42  ;;  %v2660_v38 = vadd.f32 %v2628_v32, %v2500_v7  ;;  %v7265_v28 = vmul.f32 %v6994_v60, %v7152_v5  ;;  %v7306_v7 = vld [vmem:[#allocation2 + $0x40] sm:$0xff] }
 0x14c   : > { %1311 = vst.msk [vmem:[#allocation2 + $0x90] sm:$0xff] %vm9773_vm1, %v1279_v25  ;;  %v1787_v17 = vmul.f32 %v6975_v50, %v7114_v26  ;;  %v1855_v25 = vadd.f32 %v1823_v33, %v7160_v47  ;;  %v2033_v34 = vmul.f32 %v6982_v57, %v1961_v51  ;;  %v1825_v52 = vmul.f32 %v6990_v59, %v1753_v24  ;;  %v7281_v47 = vld [vmem:[#allocation2 + $0x47] sm:$0xff] }
 0x14d   : > { %v6101_v30 = vpop.f32.mrb[16].mxu0  ;;  %1309 = vst.msk [vmem:[#allocation2 + $0x80] sm:$0xff] %vm9773_vm1, %v1277_v12  ;;  %v2101_v42 = vmul.f32 %v6986_v58, %v1961_v51  ;;  %v2035_v5 = vmul.f32 %v6982_v57, %v1963_v48  ;;  %v1997_v26 = vmul.f32 %v6972_v49, %v1961_v51  ;;  %v9862_v33 = vand.u32 15, %v7008_v3  ;;  %v7308_v51 = vld [vmem:[#allocation2 + $0x39] sm:$0xff] }
 0x14e   : > { %v1201_v13 = vpop.f32.mrb[17].mxu0  ;;  %v1210_v0 = vadd.f32 %v6101_v30, %v6944_v19  ;;  %v1786_v30 = vmul.f32 %v6975_v50, %v7076_v40  ;;  %v2271_v44 = vadd.f32 %v2239_v23, %v2201_v53  ;;  %v7290_v12 = vmul.f32 %v6972_v49, %v1963_v48 }
 0x14f   : > { %v6102_v29 = vpop.f32.mrb[18].mxu0  ;;  %v1202_v43 = vadd.f32 %v6944_v19, %v1201_v13  ;;  %vm7285_vm6 = vcmp.gt.s32.totalorder %v9862_v33, 0  ;;  %v1857_v23 = vadd.f32 %v1825_v52, %v1787_v17  ;;  %v9870_v53 = vand.u32 15, %v7005_v2 }
 0x150   : > { %v1204_v45 = vpop.f32.mrb[19].mxu0  ;;  %v1213_v16 = vadd.f32 %v6102_v29, %v6944_v19  ;;  %v1282_v13 = vmax.f32 %v1210_v0, 0.0  ;;  %v1856_v0 = vadd.f32 %v7181_v31, %v1786_v30  ;;  %v9863_v31 = vmov 0 }
 0x151   : > { %v1205_v27 = vadd.f32 %v6944_v19, %v1204_v45  ;;  %v1280_v40 = vmax.f32 %v1202_v43, 0.0  ;;  %v2499_v45 = vadd.f32 %v2467_v63, %v2131_v15  ;;  %v1893_v15 = vmul.f32 %v7018_v6, %v1753_v24 }
 0x152   : > { %v1283_v54 = vmax.f32 %v1213_v16, 0.0  ;;  %1314 = vst.msk [vmem:[#allocation2 + $0xa8] sm:$0xff] %vm9773_vm1, %v1282_v13  ;;  %v2202_v43 = vmul.f32 %v6994_v60, %v7121_v22  ;;  %v7277_v16 = vld [vmem:[%s6704_s21] ss:$0 sm:$0xff]  ;;  %v9864_v31 = vsel %vm7285_vm6, 4294967295, %v9863_v31  ;;  %v2064_v30 = vadd.f32 %v2032_v55, %v1994_v36  ;;  %v1756_v13 = vld [vmem:[#allocation2 + $0x4f] sm:$0xff] }
 0x153   : > { %v1281_v61 = vmax.f32 %v1205_v27, 0.0  ;;  %1312 = vst.msk [vmem:[#allocation2 + $0x98] sm:$0xff] %vm9773_vm1, %v1280_v40  ;;  %v2659_v63 = vadd.f32 %v2499_v45, %v2339_v37  ;;  %v1925_v27 = vadd.f32 %v1893_v15, %v1855_v25  ;;  %9865 = vst [vmem:[#allocation53_spill] sm:$0xff] %v9864_v31  ;;  %v7293_v22 = vadd.f32 %v7277_v16, %v2660_v38  ;;  %v7304_v45 = vld [vmem:[#allocation2 + $0x3f] sm:$0xff] }
 0x154   : > { %1315 = vst.msk [vmem:[#allocation2 + $0xb0] sm:$0xff] %vm9773_vm1, %v1283_v54  ;;  %v2103_v40 = vmul.f32 %v6986_v58, %v1963_v48  ;;  %v7299_v54 = vmul.f32 %v6975_v50, %v1753_v24  ;;  %v2240_v37 = vmul.f32 %v7027_v9, %v7157_v21  ;;  %v2133_v36 = vadd.f32 %v2101_v42, %v2063_v4  ;;  %v1964_v42 = vld [vmem:[#allocation2 + $0x50] sm:$0xff] }
 0x155   : > { %v7231_v29 = vpop.f32.mrb[20].mxu0  ;;  %1313 = vst.msk [vmem:[#allocation2 + $0xa0] sm:$0xff] %vm9773_vm1, %v1281_v61  ;;  %9866 = vst [vmem:[#allocation54_spill] sm:$0xff] %v7293_v22  ;;  %v2065_v61 = vadd.f32 %v2033_v34, %v7131_v41  ;;  %v7313_v15 = vadd.f32 %v7277_v16, %v2659_v63  ;;  %v1895_v24 = vmul.f32 %v7018_v6, %v7281_v47  ;;  %v7317_v41 = vld [vmem:[#allocation2 + $0x41] sm:$0xff]  ;;  %vm7321_vm7 = vcmp.lt.s32.totalorder %v9870_v53, 15 }
 0x156   : > { %v7235_v18 = vpop.f32.mrb[21].mxu0  ;;  %v7327_v25 = vadd.f32 %v2035_v5, %v1997_v26  ;;  %v2204_v34 = vmul.f32 %v6994_v60, %v7157_v21  ;;  %v2469_v4 = vsel %vm7226_vm4, %v1925_v27, 0.0  ;;  %v7334_v17 = vmul.f32 %v6975_v50, %v1756_v13 }
 0x157   : > { %v7239_v11 = vpop.f32.mrb[22].mxu0  ;;  %9869 = vst [vmem:[#allocation57_spill] sm:$0xff] %v7313_v15  ;;  %v1894_v33 = vmul.f32 %v7018_v6, %v7304_v45  ;;  %v2102_v5 = vmul.f32 %v6986_v58, %v7306_v7  ;;  %v2309_v21 = vmul.f32 %v7138_v46, %v7308_v51  ;;  %v2135_v26 = vadd.f32 %v2103_v40, %v2065_v61 }
 0x158   : > { %v7253_v20 = vpop.f32.mrb[23].mxu0  ;;  %v2272_v56 = vadd.f32 %v2240_v37, %v2202_v43  ;;  %v2241_v27 = vmul.f32 %v7027_v9, %v7308_v51  ;;  %v2310_v53 = vmul.f32 %v7138_v46, %v7317_v41  ;;  %v2501_v3 = vadd.f32 %v2469_v4, %v2133_v36 }
 0x159   : > { %v1828_v2 = vmul.f32 %v6990_v59, %v1756_v13  ;;  %v1927_v1 = vadd.f32 %v1895_v24, %v1857_v23  ;;  %v1896_v14 = vmul.f32 %v7018_v6, %v1756_v13  ;;  %v7353_v10 = vmul.f32 %v6972_v49, %v1964_v42 }
 0x15a   : > { %v1826_v43 = vmul.f32 %v6990_v59, %v7304_v45  ;;  %v2034_v40 = vmul.f32 %v6982_v57, %v7306_v7  ;;  %v9875_v61 = vmax.f32 %v7293_v22, 0.0  ;;  %v1926_v36 = vadd.f32 %v1894_v33, %v1856_v0 }
 0x15b   : > { %v2134_v4 = vadd.f32 %v2102_v5, %v2064_v30  ;;  %v2341_v52 = vadd.f32 %v2309_v21, %v2271_v44  ;;  %v2036_v13 = vmul.f32 %v6982_v57, %v1964_v42  ;;  %v2104_v24 = vmul.f32 %v6986_v58, %v1964_v42  ;;  %v7385_v21 = vld [vmem:[#allocation2 + $0x51] sm:$0xff] }
 0x15c   : > { %v2763_v37 = vsel %vm9773_vm1, %v9875_v61, 0.0  ;;  %v7373_v61 = vmul.f32 %v6994_v60, %v2171_v35  ;;  %v2243_v0 = vmul.f32 %v7027_v9, %v2171_v35  ;;  %v2471_v30 = vsel %vm7285_vm6, %v1927_v1, 0.0 }
 0x15d   : > { %v7295_v32 = vpop.f32.mrb[24].mxu0  ;;  %v1858_v33 = vadd.f32 %v1826_v43, %v7178_v39  ;;  %v2066_v5 = vadd.f32 %v2034_v40, %v7245_v62  ;;  %v2242_v1 = vmul.f32 %v7027_v9, %v7317_v41  ;;  %v1827_v39 = vmul.f32 %v6990_v59, %v7281_v47 }
 0x15e   : > { %9867 = vst [vmem:[#allocation55_spill] sm:$0xff] %v7295_v32  ;;  %v7310_v55 = vpop.f32.mrb[25].mxu0  ;;  %v9878_v32 = vmax.f32 %v7313_v15, 0.0  ;;  %v2503_v43 = vadd.f32 %v2471_v30, %v2135_v26  ;;  %v7421_v48 = vadd.f32 %v6944_v19, %v7235_v18  ;;  %v9889_v26 = vld [vmem:[#allocation29_spill] sm:$0xff] }
 0x15f   : > { %9868 = vst [vmem:[#allocation56_spill] sm:$0xff] %v7310_v55  ;;  %v7325_v38 = vpop.f32.mrb[26].mxu0 }
 0x160   : > { %9873 = vst [vmem:[#allocation58_spill] sm:$0xff] %v7325_v38  ;;  %v7336_v63 = vpop.f32.mrb[27].mxu0  ;;  %v2342_v38 = vadd.f32 %v2310_v53, %v2272_v56  ;;  %v2762_v22 = vsel %vm9773_vm1, %v9878_v32, 0.0  ;;  %v9880_v32 = vand.u32 15, %v7023_v8  ;;  %v9881_v56 = vmov 0 }
 0x161   : > { %9874 = vst [vmem:[#allocation59_spill] sm:$0xff] %v7336_v63  ;;  %v2273_v63 = vadd.f32 %v2241_v27, %v7265_v28  ;;  %v7380_v42 = vadd.f32 %v2763_v37, %v2762_v22  ;;  %v2311_v28 = vmul.f32 %v7138_v46, %v2171_v35  ;;  %v2502_v22 = vadd.f32 %v2134_v4, %v1926_v36  ;;  %v7405_v37 = vld [vmem:[#allocation2 + $0x57] sm:$0xff] }
 0x162   : > { %vm7389_vm8 = vcmp.lt.s32.totalorder %v9880_v32, 15  ;;  %v2661_v53 = vadd.f32 %v2501_v3, %v2341_v52  ;;  %v7399_v35 = vadd.f32 %v7231_v29, %v6944_v19  ;;  %v2630_v40 = vsel %vm7321_vm7, %v2342_v38, 0.0  ;;  %v9885_v32 = vld [vmem:[#allocation36_spill] sm:$0xff] }
 0x163   : > { %v9882_v56 = vsel %vm7389_vm8, 4294967295, %v9881_v56  ;;  %v2343_v62 = vadd.f32 %v2311_v28, %v2273_v63  ;;  %v9886_v8 = vand.u32 15, %v9885_v32  ;;  %v1790_v3 = vmul.f32 %v6975_v50, %v7304_v45  ;;  %v1965_v28 = vld [vmem:[#allocation2 + $0x58] sm:$0xff] }
 0x164   : > { %9883 = vst [vmem:[#allocation63_spill] sm:$0xff] %v9882_v56  ;;  %v1998_v29 = vmul.f32 %v6972_v49, %v7306_v7  ;;  %v2312_v63 = vmul.f32 %v7138_v46, %v7385_v21  ;;  %v1928_v38 = vadd.f32 %v1896_v14, %v1858_v33  ;;  %v2136_v52 = vadd.f32 %v2104_v24, %v2066_v5  ;;  %v1967_v24 = vld [vmem:[#allocation2 + $0x68] sm:$0xff]  ;;  %v7443_v32 = vld [vmem:[#allocation2 + $0x5f] sm:$0xff] }
 0x165   : > { %v7362_v23 = vpop.f32.mrb[28].mxu0  ;;  %vm7409_vm9 = vcmp.gt.s32.totalorder %v9886_v8, 0  ;;  %v2205_v8 = vmul.f32 %v6994_v60, %v7308_v51  ;;  %v7426_v36 = vadd.s32 168, %v9889_v26  ;;  %v2274_v4 = vadd.f32 %v2242_v1, %v2204_v34 }
 0x166   : > { %9876 = vst [vmem:[#allocation60_spill] sm:$0xff] %v7362_v23  ;;  %v7367_v55 = vpop.f32.mrb[29].mxu0  ;;  %v2662_v45 = vadd.f32 %v2630_v40, %v2502_v22  ;;  %v7429_v30 = vadd.f32 %v7277_v16, %v2661_v53  ;;  %v1897_v7 = vmul.f32 %v7018_v6, %v7405_v37  ;;  %v1791_v19 = vmul.f32 %v6975_v50, %v7281_v47 }
 0x167   : > { %9877 = vst [vmem:[#allocation61_spill] sm:$0xff] %v7367_v55  ;;  %v7378_v44 = vpop.f32.mrb[30].mxu0  ;;  %9890 = vst [vmem:[#allocation65_spill] sm:$0xff] %v7426_v36  ;;  %v1859_v14 = vadd.f32 %v1827_v39, %v7299_v54  ;;  %v2663_v18 = vadd.f32 %v2503_v43, %v2343_v62  ;;  %v1829_v51 = vmul.f32 %v6990_v59, %v7405_v37  ;;  %v7445_v54 = vld [vmem:[#allocation2 + $0x67] sm:$0xff] }
 0x168   : > { %9879 = vst [vmem:[#allocation62_spill] sm:$0xff] %v7378_v44  ;;  %v7393_v27 = vpop.f32.mrb[31].mxu0  ;;  %9891 = vst [vmem:[#allocation66_spill] sm:$0xff] %v7429_v30  ;;  %v1860_v33 = vadd.f32 %v1828_v2, %v1790_v3  ;;  %v2068_v34 = vadd.f32 %v2036_v13, %v1998_v29  ;;  %v2206_v5 = vmul.f32 %v6994_v60, %v7317_v41  ;;  %v7447_v39 = vld [vmem:[#allocation2 + $0x60] sm:$0xff]  ;;  %v9892_v62 = vld [vmem:[#allocation38_spill] sm:$0xff]  ;;  %v9894_v13 = vmov 0 }
 0x169   : > { %9884 = vst [vmem:[#allocation64_spill] sm:$0xff] %v7393_v27  ;;  %v2344_v1 = vadd.f32 %v2312_v63, %v2274_v4  ;;  %v2275_v22 = vadd.f32 %v2243_v0, %v2205_v8  ;;  %v2504_v53 = vadd.f32 %v2136_v52, %v1928_v38  ;;  %v2105_v40 = vmul.f32 %v6986_v58, %v1965_v28  ;;  %v7462_v29 = vld [vmem:[#allocation2 + $0x59] sm:$0xff]  ;;  %v7464_v63 = vld [vmem:[#allocation2 + $0x61] sm:$0xff] }
 0x16a   : > { %v2244_v47 = vmul.f32 %v7027_v9, %v7385_v21  ;;  %v9893_v2 = vand.u32 15, %v9892_v62  ;;  %v7456_v41 = vadd.f32 %v7277_v16, %v2662_v45  ;;  %v7460_v43 = vmul.f32 %v6972_v49, %v1967_v24  ;;  %v9898_v38 = vld [vmem:[#allocation37_spill] sm:$0xff] }
 0x16b   : > { %v1929_v3 = vadd.f32 %v1897_v7, %v1859_v14  ;;  %v9899_v52 = vand.u32 15, %v9898_v38  ;;  %v7473_v4 = vadd.f32 %v7277_v16, %v2663_v18  ;;  %v2039_v45 = vmul.f32 %v6982_v57, %v1967_v24 }
 0x16c   : > { %vm7451_vm10 = vcmp.gt.s32.totalorder %v9893_v2, 0  ;;  %9897 = vst [vmem:[#allocation67_spill] sm:$0xff] %v7456_v41  ;;  %v1861_v62 = vadd.f32 %v1829_v51, %v1791_v19  ;;  %v2037_v2 = vmul.f32 %v6982_v57, %v1965_v28  ;;  %v2632_v7 = vsel %vm7389_vm8, %v2344_v1, 0.0 }
 0x16d   : > { %v9895_v13 = vsel %vm7451_vm10, 4294967295, %v9894_v13  ;;  %vm7468_vm11 = vcmp.lt.s32.totalorder %v9899_v52, 15  ;;  %9902 = vst [vmem:[#allocation68_spill] sm:$0xff] %v7473_v4  ;;  %v1898_v14 = vmul.f32 %v7018_v6, %v7443_v32  ;;  %v1899_v52 = vmul.f32 %v7018_v6, %v7445_v54 }
 0x16e   : > { %9896 = vst [vmem:[#allocation38_spill] sm:$0xff] %v9895_v13  ;;  %v2106_v0 = vmul.f32 %v6986_v58, %v7447_v39  ;;  %v2137_v18 = vadd.f32 %v2105_v40, %v7327_v25  ;;  %v2276_v38 = vadd.f32 %v2244_v47, %v2206_v5  ;;  %v2313_v19 = vmul.f32 %v7138_v46, %v7462_v29 }
 0x16f   : > { %v2314_v51 = vmul.f32 %v7138_v46, %v7464_v63  ;;  %v9903_v56 = vmax.f32 %v7429_v30, 0.0  ;;  %v2001_v36 = vmul.f32 %v6972_v49, %v1965_v28  ;;  %v2473_v26 = vsel %vm7409_vm9, %v1929_v3, 0.0 }
 0x170   : > { %v9726_v25 = vmax.f32 %v7473_v4, 0.0  ;;  %v2069_v5 = vadd.f32 %v2037_v2, %v7290_v12  ;;  %v2664_v40 = vadd.f32 %v2632_v7, %v2504_v53  ;;  %v2245_v47 = vmul.f32 %v7027_v9, %v7462_v29 }
 0x171   : > { %v2765_v15 = vsel %vm9773_vm1, %v9903_v56, 0.0  ;;  %v2107_v27 = vmul.f32 %v6986_v58, %v1967_v24  ;;  %v1930_v1 = vadd.f32 %v1898_v14, %v1860_v33  ;;  %v1931_v44 = vadd.f32 %v1899_v52, %v1861_v62  ;;  %v2175_v33 = vld [vmem:[#allocation2 + $0x69] sm:$0xff] }
 0x172   : > { %v2138_v30 = vadd.f32 %v2106_v0, %v2068_v34  ;;  %v2766_v56 = vadd.f32 %v2765_v15, %v7380_v42  ;;  %v2505_v55 = vadd.f32 %v2473_v26, %v2137_v18  ;;  %v2345_v28 = vadd.f32 %v2313_v19, %v2275_v22  ;;  %v1760_v34 = vld [vmem:[#allocation2 + $0x6f] sm:$0xff] }
 0x173   : > { %v2346_v23 = vadd.f32 %v2314_v51, %v2276_v38  ;;  %v9904_v31 = vmax.f32 %v7456_v41, 0.0  ;;  %v1793_v12 = vmul.f32 %v6975_v50, %v7405_v37  ;;  %v7508_v53 = vadd.f32 %v2039_v45, %v2001_v36  ;;  %v1968_v22 = vld [vmem:[#allocation2 + $0x70] sm:$0xff] }
 0x174   : > { %v2208_v24 = vmul.f32 %v6994_v60, %v7385_v21  ;;  %v2769_v15 = vsel %vm9773_vm1, %v9726_v25, 0.0  ;;  %v2139_v42 = vadd.f32 %v2107_v27, %v2069_v5  ;;  %v7516_v26 = vadd.f32 %v7277_v16, %v2664_v40 }
 0x175   : > { %v2767_v3 = vsel %vm9773_vm1, %v9904_v31, 0.0  ;;  %v2277_v0 = vadd.f32 %v2245_v47, %v7373_v61  ;;  %v1830_v37 = vmul.f32 %v6990_v59, %v7443_v32  ;;  %v2038_v36 = vmul.f32 %v6982_v57, %v7447_v39 }
 0x176   : > { %9905 = vst [vmem:[#allocation69_spill] sm:$0xff] %v7516_v26  ;;  %v2475_v21 = vsel %vm7451_vm10, %v1931_v44, 0.0  ;;  %v2506_v38 = vadd.f32 %v2138_v30, %v1930_v1  ;;  %v2768_v45 = vadd.f32 %v2767_v3, %v2766_v56  ;;  %v2315_v27 = vmul.f32 %v7138_v46, %v2175_v33  ;;  %v1761_v56 = vld [vmem:[#allocation2 + $0x77] sm:$0xff] }
 0x177   : > { %v2634_v62 = vsel %vm7468_vm11, %v2346_v23, 0.0  ;;  %v2665_v2 = vadd.f32 %v2505_v55, %v2345_v28  ;;  %v7529_v7 = vmul.f32 %v6975_v50, %v1760_v34  ;;  %v1832_v61 = vmul.f32 %v6990_v59, %v1760_v34  ;;  %v9907_v28 = vld [vmem:[#allocation40_spill] sm:$0xff] }
 0x178   : > { %v1900_v14 = vmul.f32 %v7018_v6, %v1760_v34  ;;  %v7534_v52 = vmul.f32 %v6972_v49, %v1968_v22  ;;  %v9725_v44 = vmax.f32 %v7516_v26, 0.0  ;;  %v2040_v30 = vmul.f32 %v6982_v57, %v1968_v22  ;;  %v9911_v34 = vld [vmem:[#allocation39_spill] sm:$0xff] }
 0x179   : > { %v2347_v18 = vadd.f32 %v2315_v27, %v2277_v0  ;;  %v2507_v19 = vadd.f32 %v2475_v21, %v2139_v42  ;;  %v2108_v8 = vmul.f32 %v6986_v58, %v1968_v22  ;;  %v1862_v55 = vadd.f32 %v1830_v37, %v7334_v17  ;;  %v7562_v42 = vld [vmem:[#allocation2 + $0x71] sm:$0xff] }
 0x17a   : > { %v2070_v23 = vadd.f32 %v2038_v36, %v7353_v10  ;;  %v2666_v51 = vadd.f32 %v2634_v62, %v2506_v38  ;;  %v2770_v1 = vadd.f32 %v2769_v15, %v2768_v45  ;;  %v1794_v5 = vmul.f32 %v6975_v50, %v7443_v32  ;;  %v1969_v27 = vld [vmem:[#allocation2 + $0x78] sm:$0xff] }
 0x17b   : > { %v1831_v40 = vmul.f32 %v6990_v59, %v7445_v54  ;;  %v7546_v47 = vadd.f32 %v7277_v16, %v2665_v2  ;;  %v9908_v31 = vand.u32 15, %v9907_v28  ;;  %v7555_v10 = vmul.f32 %v6994_v60, %v2175_v33 }
 0x17c   : > { %v2247_v17 = vmul.f32 %v7027_v9, %v2175_v33  ;;  %v1795_v32 = vmul.f32 %v6975_v50, %v7445_v54  ;;  %v2002_v15 = vmul.f32 %v6972_v49, %v7447_v39  ;;  %v9912_v22 = vand.u32 15, %v9911_v34 }
 0x17d   : > { %9906 = vst [vmem:[#allocation70_spill] sm:$0xff] %v7546_v47  ;;  %vm7550_vm12 = vcmp.gt.s32.totalorder %v9908_v31, 0  ;;  %v9913_v0 = vmov 0  ;;  %v2771_v37 = vsel %vm9773_vm1, %v9725_v44, 0.0  ;;  %v2209_v33 = vmul.f32 %v6994_v60, %v7462_v29 }
 0x17e   : > { %vm7566_vm13 = vcmp.lt.s32.totalorder %v9912_v22, 15  ;;  %v2246_v54 = vmul.f32 %v7027_v9, %v7464_v63  ;;  %v2667_v36 = vadd.f32 %v2507_v19, %v2347_v18  ;;  %v1932_v39 = vadd.f32 %v1900_v14, %v1862_v55  ;;  %v1971_v14 = vld [vmem:[#allocation2 + $0x88] sm:$0xff] }
 0x17f   : > { %v9914_v0 = vsel %vm7566_vm13, 4294967295, %v9913_v0  ;;  %v2140_v21 = vadd.f32 %v2108_v8, %v2070_v23  ;;  %v7578_v38 = vadd.f32 %v7277_v16, %v2666_v51  ;;  %v1901_v45 = vmul.f32 %v7018_v6, %v1761_v56  ;;  %v9918_v51 = vld [vmem:[#allocation42_spill] sm:$0xff] }
 0x180   : > { %9915 = vst [vmem:[#allocation40_spill] sm:$0xff] %v9914_v0  ;;  %v1863_v62 = vadd.f32 %v1831_v40, %v1793_v12  ;;  %v1864_v2 = vadd.f32 %v1832_v61, %v1794_v5  ;;  %v9724_v28 = vmax.f32 %v7546_v47, 0.0  ;;  %v2316_v31 = vmul.f32 %v7138_v46, %v7562_v42  ;;  %v7591_v61 = vld [vmem:[#allocation2 + $0x87] sm:$0xff] }
 0x181   : > { %9916 = vst [vmem:[#allocation39_spill] sm:$0xff] %v7578_v38  ;;  %v2772_v29 = vadd.f32 %v2771_v37, %v2770_v1  ;;  %v2072_v34 = vadd.f32 %v2040_v30, %v2002_v15  ;;  %v2210_v18 = vmul.f32 %v6994_v60, %v7464_v63  ;;  %v1833_v19 = vmul.f32 %v6990_v59, %v1761_v56 }
 0x182   : > { %v2278_v8 = vadd.f32 %v2246_v54, %v2208_v24  ;;  %v2279_v55 = vadd.f32 %v2247_v17, %v2209_v33  ;;  %v7588_v23 = vadd.f32 %v7277_v16, %v2667_v36  ;;  %v2041_v12 = vmul.f32 %v6982_v57, %v1969_v27 }
 0x183   : > { %v9919_v5 = vand.u32 15, %v9918_v51  ;;  %v9920_v1 = vmov 0  ;;  %v2508_v30 = vadd.f32 %v2140_v21, %v1932_v39  ;;  %v9727_v63 = vmax.f32 %v7578_v38, 0.0  ;;  %v1762_v39 = vld [vmem:[#allocation2 + $0x7f] sm:$0xff] }
 0x184   : > { %9917 = vst [vmem:[#allocation71_spill] sm:$0xff] %v7588_v23  ;;  %v1933_v40 = vadd.f32 %v1901_v45, %v1863_v62  ;;  %v2109_v24 = vmul.f32 %v6986_v58, %v1969_v27  ;;  %v2773_v17 = vsel %vm9773_vm1, %v9724_v28, 0.0  ;;  %v7605_v15 = vmul.f32 %v6972_v49, %v1971_v14  ;;  %v1970_v45 = vld [vmem:[#allocation2 + $0x80] sm:$0xff] }
 0x185   : > { %vm7595_vm14 = vcmp.gt.s32.totalorder %v9919_v5, 0  ;;  %v2043_v22 = vmul.f32 %v6982_v57, %v1971_v14  ;;  %v2348_v37 = vadd.f32 %v2316_v31, %v2278_v8  ;;  %v2111_v33 = vmul.f32 %v6986_v58, %v1971_v14  ;;  %v7613_v62 = vld [vmem:[#allocation2 + $0x79] sm:$0xff] }
 0x186   : > { %v9921_v1 = vsel %vm7595_vm14, 4294967295, %v9920_v1  ;;  %v1865_v54 = vadd.f32 %v1833_v19, %v1795_v32  ;;  %v2248_v36 = vmul.f32 %v7027_v9, %v7562_v42  ;;  %v1903_v21 = vmul.f32 %v7018_v6, %v7591_v61  ;;  %v7621_v32 = vld [vmem:[#allocation2 + $0x81] sm:$0xff] }
 0x187   : > { %9922 = vst [vmem:[#allocation42_spill] sm:$0xff] %v9921_v1  ;;  %v7617_v5 = vmul.f32 %v6975_v50, %v1761_v56  ;;  %v2005_v31 = vmul.f32 %v6972_v49, %v1969_v27  ;;  %v2073_v14 = vadd.f32 %v2041_v12, %v7460_v43  ;;  %v9923_v19 = vld [vmem:[#allocation41_spill] sm:$0xff]  ;;  %v2774_v44 = vadd.f32 %v2773_v17, %v2772_v29  ;;  %v1764_v12 = vld [vmem:[#allocation2 + $0x8f] sm:$0xff] }
 0x188   : > { %v9924_v8 = vand.u32 15, %v9923_v19  ;;  %v2775_v25 = vsel %vm9773_vm1, %v9727_v63, 0.0  ;;  %v2141_v56 = vadd.f32 %v2109_v24, %v7508_v53  ;;  %v2477_v27 = vsel %vm7550_vm12, %v1933_v40, 0.0 }
 0x189   : > { %v2636_v43 = vsel %vm7566_vm13, %v2348_v37, 0.0  ;;  %v1902_v19 = vmul.f32 %v7018_v6, %v1762_v39  ;;  %v2249_v29 = vmul.f32 %v7027_v9, %v7613_v62  ;;  %v2280_v17 = vadd.f32 %v2248_v36, %v2210_v18  ;;  %v1972_v36 = vld [vmem:[#allocation2 + $0x90] sm:$0xff] }
 0x18a   : > { %vm7625_vm15 = vcmp.lt.s32.totalorder %v9924_v8, 15  ;;  %v2110_v8 = vmul.f32 %v6986_v58, %v1970_v45  ;;  %v1935_v51 = vadd.f32 %v1903_v21, %v1865_v54  ;;  %v2317_v63 = vmul.f32 %v7138_v46, %v7613_v62  ;;  %v2179_v21 = vld [vmem:[#allocation2 + $0x89] sm:$0xff] }
 0x18b   : > { %v2318_v53 = vmul.f32 %v7138_v46, %v7621_v32  ;;  %v9927_v3 = vmax.f32 %v7588_v23, 0.0  ;;  %v7648_v24 = vadd.f32 %v2043_v22, %v2005_v31  ;;  %v2143_v37 = vadd.f32 %v2111_v33, %v2073_v14 }
 0x18c   : > { %v2212_v0 = vmul.f32 %v6994_v60, %v7562_v42  ;;  %v2776_v13 = vadd.f32 %v2775_v25, %v2774_v44  ;;  %v2509_v38 = vadd.f32 %v2477_v27, %v2141_v56  ;;  %v2668_v18 = vadd.f32 %v2636_v43, %v2508_v30 }
 0x18d   : > { %v2777_v40 = vsel %vm9773_vm1, %v9927_v3, 0.0  ;;  %v7653_v54 = vmul.f32 %v6975_v50, %v1764_v12  ;;  %v1836_v47 = vmul.f32 %v6990_v59, %v1764_v12  ;;  %v1934_v26 = vadd.f32 %v1902_v19, %v1864_v2 }
 0x18e   : > { %v2142_v23 = vadd.f32 %v2110_v8, %v2072_v34  ;;  %v2281_v3 = vadd.f32 %v2249_v29, %v7555_v10  ;;  %v1904_v22 = vmul.f32 %v7018_v6, %v1764_v12  ;;  %v2349_v33 = vadd.f32 %v2317_v63, %v2279_v55  ;;  %v7674_v63 = vld [vmem:[#allocation2 + $0x97] sm:$0xff] }
 0x18f   : > { %v2350_v31 = vadd.f32 %v2318_v53, %v2280_v17  ;;  %v2479_v25 = vsel %vm7595_vm14, %v1935_v51, 0.0  ;;  %v7661_v44 = vmul.f32 %v6972_v49, %v1972_v36  ;;  %v2044_v42 = vmul.f32 %v6982_v57, %v1972_v36  ;;  %v9929_v51 = vld [vmem:[#allocation44_spill] sm:$0xff] }
 0x190   : > { %v2319_v30 = vmul.f32 %v7138_v46, %v2179_v21  ;;  %v1834_v14 = vmul.f32 %v6990_v59, %v1762_v39  ;;  %v7667_v2 = vadd.f32 %v7277_v16, %v2668_v18  ;;  %v2112_v10 = vmul.f32 %v6986_v58, %v1972_v36  ;;  %v1973_v36 = vld [vmem:[#allocation2 + $0x98] sm:$0xff] }
 0x191   : > { %v7671_v34 = vmul.f32 %v6994_v60, %v2179_v21  ;;  %v2042_v55 = vmul.f32 %v6982_v57, %v1970_v45  ;;  %v9930_v56 = vand.u32 15, %v9929_v51  ;;  %v1835_v43 = vmul.f32 %v6990_v59, %v7591_v61 }
 0x192   : > { %9928 = vst [vmem:[#allocation41_spill] sm:$0xff] %v7667_v2  ;;  %v2351_v12 = vadd.f32 %v2319_v30, %v2281_v3  ;;  %v2510_v19 = vadd.f32 %v2142_v23, %v1934_v26  ;;  %v2511_v8 = vadd.f32 %v2479_v25, %v2143_v37  ;;  %v2778_v29 = vadd.f32 %v2777_v40, %v2776_v13  ;;  %v7692_v3 = vld [vmem:[#allocation2 + $0x91] sm:$0xff] }
 0x193   : > { %vm7678_vm4 = vcmp.gt.s32.totalorder %v9930_v56, 0  ;;  %v1798_v17 = vmul.f32 %v6975_v50, %v1762_v39  ;;  %v2638_v53 = vsel %vm7625_vm15, %v2350_v31, 0.0  ;;  %v2669_v18 = vadd.f32 %v2509_v38, %v2349_v33  ;;  %v9933_v26 = vld [vmem:[#allocation43_spill] sm:$0xff] }
 0x194   : > { %v2251_v51 = vmul.f32 %v7027_v9, %v2179_v21  ;;  %v1866_v56 = vadd.f32 %v1834_v14, %v7529_v7  ;;  %v2006_v1 = vmul.f32 %v6972_v49, %v1970_v45  ;;  %v1905_v4 = vmul.f32 %v7018_v6, %v7674_v63 }
 0x195   : > { %v9934_v13 = vand.u32 15, %v9933_v26  ;;  %v9935_v23 = vmov 0  ;;  %v9737_v38 = vmax.f32 %v7667_v2, 0.0  ;;  %v1799_v28 = vmul.f32 %v6975_v50, %v7591_v61 }
 0x196   : > { %v2074_v7 = vadd.f32 %v2042_v55, %v7534_v52  ;;  %v2250_v39 = vmul.f32 %v7027_v9, %v7621_v32  ;;  %v1867_v45 = vadd.f32 %v1835_v43, %v7617_v5  ;;  %v2670_v40 = vadd.f32 %v2638_v53, %v2510_v19 }
 0x197   : > { %vm7696_vm7 = vcmp.lt.s32.totalorder %v9934_v13, 15  ;;  %v2671_v37 = vadd.f32 %v2511_v8, %v2351_v12  ;;  %v2045_v21 = vmul.f32 %v6982_v57, %v1973_v36  ;;  %v7708_v33 = vadd.f32 %v1836_v47, %v1798_v17  ;;  %v1975_v12 = vld [vmem:[#allocation2 + $0xa8] sm:$0xff]  ;;  %v7747_v13 = vld [vmem:[#allocation2 + $0x9f] sm:$0xff] }
 0x198   : > { %v9936_v23 = vsel %vm7696_vm7, 4294967295, %v9935_v23  ;;  %v7711_v31 = vadd.f32 %v7277_v16, %v2669_v18  ;;  %v2113_v25 = vmul.f32 %v6986_v58, %v1973_v36  ;;  %v2320_v61 = vmul.f32 %v7138_v46, %v7692_v3 }
 0x199   : > { %9937 = vst [vmem:[#allocation44_spill] sm:$0xff] %v9936_v23  ;;  %v1936_v52 = vadd.f32 %v1904_v22, %v1866_v56  ;;  %v2076_v30 = vadd.f32 %v2044_v42, %v2006_v1  ;;  %v2213_v14 = vmul.f32 %v6994_v60, %v7613_v62  ;;  %v1937_v5 = vadd.f32 %v1905_v4, %v1867_v45  ;;  %v9954_v23 = vld [vmem:[#allocation60_spill] sm:$0xff] }
 0x19a   : > { %9938 = vst [vmem:[#allocation43_spill] sm:$0xff] %v7711_v31  ;;  %v2779_v55 = vsel %vm9773_vm1, %v9737_v38, 0.0  ;;  %v2144_v47 = vadd.f32 %v2112_v10, %v2074_v7  ;;  %v2282_v43 = vadd.f32 %v2250_v39, %v2212_v0  ;;  %v1837_v19 = vmul.f32 %v6990_v59, %v7674_v63  ;;  %v7749_v7 = vld [vmem:[#allocation2 + $0xa7] sm:$0xff] }
 0x19b   : > { %v2214_v8 = vmul.f32 %v6994_v60, %v7621_v32  ;;  %v7726_v22 = vadd.f32 %v7277_v16, %v2670_v40  ;;  %v7729_v1 = vadd.f32 %v7277_v16, %v2671_v37  ;;  %v2077_v4 = vadd.f32 %v2045_v21, %v7605_v15  ;;  %v9952_v38 = vld [vmem:[#allocation58_spill] sm:$0xff] }
 0x19c   : > { %v9736_v62 = vmax.f32 %v7711_v31, 0.0  ;;  %v2145_v42 = vadd.f32 %v2113_v25, %v7648_v24  ;;  %v2252_v0 = vmul.f32 %v7027_v9, %v7692_v3  ;;  %v2352_v10 = vadd.f32 %v2320_v61, %v2282_v43 }
 0x19d   : > { %9939 = vst [vmem:[#allocation72_spill] sm:$0xff] %v7726_v22  ;;  %9940 = vst [vmem:[#allocation73_spill] sm:$0xff] %v7729_v1  ;;  %v7736_v17 = vadd.f32 %v2779_v55, %v2778_v29  ;;  %v2283_v53 = vadd.f32 %v2251_v51, %v2213_v14  ;;  %v2115_v32 = vmul.f32 %v6986_v58, %v1975_v12  ;;  %v2481_v18 = vsel %vm7678_vm4, %v1937_v5, 0.0  ;;  %v7751_v29 = vld [vmem:[#allocation2 + $0xa0] sm:$0xff]  ;;  %v9941_v51 = vld [vmem:[#allocation46_spill] sm:$0xff] }
 0x19e   : > { %v2512_v56 = vadd.f32 %v2144_v47, %v1936_v52  ;;  %v7742_v26 = vmul.f32 %v6972_v49, %v1975_v12  ;;  %v7745_v15 = vmul.f32 %v6982_v57, %v1975_v12  ;;  %v1869_v24 = vadd.f32 %v1837_v19, %v1799_v28  ;;  %v7771_v14 = vld [vmem:[#allocation2 + $0x99] sm:$0xff]  ;;  %v7773_v5 = vld [vmem:[#allocation2 + $0xa1] sm:$0xff] }
 0x19f   : > { %v9942_v39 = vand.u32 15, %v9941_v51  ;;  %v9943_v45 = vmov 0  ;;  %v7762_v37 = vmul.f32 %v6972_v49, %v1973_v36  ;;  %v7764_v28 = vadd.f32 %v2115_v32, %v2077_v4  ;;  %v9946_v55 = vld [vmem:[#allocation45_spill] sm:$0xff]  ;;  %v9950_v32 = vld [vmem:[#allocation55_spill] sm:$0xff] }
 0x1a0   : > { %v2781_v21 = vsel %vm9773_vm1, %v9736_v62, 0.0  ;;  %v2284_v25 = vadd.f32 %v2252_v0, %v2214_v8  ;;  %v2513_v61 = vadd.f32 %v2481_v18, %v2145_v42  ;;  %v2640_v52 = vsel %vm7696_vm7, %v2352_v10, 0.0  ;;  %v6541_v42 = vld [vmem:[%s9822_s13] ss:$0 sm:$0xff] }
 0x1a1   : > { %vm7755_vm9 = vcmp.gt.s32.totalorder %v9942_v39, 0  ;;  %v9947_v47 = vand.u32 15, %v9946_v55  ;;  %v1906_v43 = vmul.f32 %v7018_v6, %v7747_v13  ;;  %v1907_v12 = vmul.f32 %v7018_v6, %v7749_v7 }
 0x1a2   : > { %v9944_v45 = vsel %vm7755_vm9, 4294967295, %v9943_v45  ;;  %v2114_v19 = vmul.f32 %v6986_v58, %v7751_v29  ;;  %v1286_v8 = vmax.f32 %v7399_v35, 0.0  ;;  %v1284_v4 = vmax.f32 %v7421_v48, 0.0 }
 0x1a3   : > { %9945 = vst [vmem:[#allocation46_spill] sm:$0xff] %v9944_v45  ;;  %vm7777_vm11 = vcmp.lt.s32.totalorder %v9947_v47, 15  ;;  %v1229_v0 = vadd.f32 %v6541_v42, %v7239_v11  ;;  %v1221_v10 = vadd.f32 %v6541_v42, %v7253_v20  ;;  %v1242_v18 = vadd.f32 %v6541_v42, %v9950_v32  ;;  %v9951_v47 = vld [vmem:[#allocation56_spill] sm:$0xff] }
 0x1a4   : > { %v2672_v51 = vadd.f32 %v2640_v52, %v2512_v56  ;;  %v2321_v39 = vmul.f32 %v7138_v46, %v7771_v14  ;;  %v2322_v55 = vmul.f32 %v7138_v46, %v7773_v5  ;;  %1318 = vst.msk [vmem:[#allocation2 + $0xc8] sm:$0xff] %vm9773_vm1, %v1286_v8  ;;  %v1234_v35 = vadd.f32 %v6541_v42, %v9951_v47  ;;  %v9953_v8 = vld [vmem:[#allocation59_spill] sm:$0xff] }
 0x1a5   : > { %v2253_v48 = vmul.f32 %v7027_v9, %v7771_v14  ;;  %1316 = vst.msk [vmem:[#allocation2 + $0xb8] sm:$0xff] %vm9773_vm1, %v1284_v4  ;;  %v1287_v11 = vmax.f32 %v1229_v0, 0.0  ;;  %v1285_v20 = vmax.f32 %v1221_v10, 0.0  ;;  %v1290_v62 = vmax.f32 %v1242_v18, 0.0  ;;  %v9955_v0 = vld [vmem:[#allocation61_spill] sm:$0xff] }
 0x1a6   : > { %v1938_v56 = vadd.f32 %v1906_v43, %v7708_v33  ;;  %v1939_v52 = vadd.f32 %v1907_v12, %v1869_v24  ;;  %v1288_v32 = vmax.f32 %v1234_v35, 0.0  ;;  %v1245_v40 = vadd.f32 %v6541_v42, %v9952_v38  ;;  %v2183_v18 = vld [vmem:[#allocation2 + $0xa9] sm:$0xff] }
 0x1a7   : > { %v2146_v27 = vadd.f32 %v2114_v19, %v2076_v30  ;;  %1319 = vst.msk [vmem:[#allocation2 + $0xd0] sm:$0xff] %vm9773_vm1, %v1287_v11  ;;  %1317 = vst.msk [vmem:[#allocation2 + $0xc0] sm:$0xff] %vm9773_vm1, %v1285_v20  ;;  %v1237_v47 = vadd.f32 %v6541_v42, %v9953_v8  ;;  %v1258_v4 = vadd.f32 %v6541_v42, %v9954_v23  ;;  %v9956_v38 = vld [vmem:[#allocation62_spill] sm:$0xff] }
 0x1a8   : > { %1322 = vst.msk [vmem:[#allocation2 + $0xe8] sm:$0xff] %vm9773_vm1, %v1290_v62  ;;  %v1250_v10 = vadd.f32 %v6541_v42, %v9955_v0  ;;  %v2353_v31 = vadd.f32 %v2321_v39, %v2283_v53  ;;  %v2354_v33 = vadd.f32 %v2322_v55, %v2284_v25  ;;  %1320 = vst.msk [vmem:[#allocation2 + $0xd8] sm:$0xff] %vm9773_vm1, %v1288_v32  ;;  %v1291_v24 = vmax.f32 %v1245_v40, 0.0  ;;  %v9957_v53 = vld [vmem:[#allocation64_spill] sm:$0xff]  ;;  %v1768_v55 = vld [vmem:[#allocation2 + $0xaf] sm:$0xff] }
 0x1a9   : > { %v1261_v30 = vadd.f32 %v6541_v42, %v9956_v38  ;;  %v2285_v43 = vadd.f32 %v2253_v48, %v7671_v34  ;;  %v1289_v12 = vmax.f32 %v1237_v47, 0.0  ;;  %v1294_v19 = vmax.f32 %v1258_v4, 0.0 }
 0x1aa   : > { %v1292_v35 = vmax.f32 %v1250_v10, 0.0  ;;  %v2782_v62 = vadd.f32 %v2781_v21, %v7736_v17  ;;  %v2483_v23 = vsel %vm7755_vm9, %v1939_v52, 0.0  ;;  %1323 = vst.msk [vmem:[#allocation2 + $0xf0] sm:$0xff] %vm9773_vm1, %v1291_v24  ;;  %v1253_v25 = vadd.f32 %v6541_v42, %v9957_v53  ;;  %v9966_v53 = vld [vmem:[#allocation47_spill] sm:$0xff] }
 0x1ab   : > { %v1295_v11 = vmax.f32 %v1261_v30, 0.0  ;;  %v9958_v39 = vmax.f32 %v7726_v22, 0.0  ;;  %v2323_v34 = vmul.f32 %v7138_v46, %v2183_v18  ;;  %v1838_v48 = vmul.f32 %v6990_v59, %v7747_v13  ;;  %1321 = vst.msk [vmem:[#allocation2 + $0xe0] sm:$0xff] %vm9773_vm1, %v1289_v12  ;;  %1326 = vst.msk [vmem:[#allocation2 + $0x108] sm:$0xff] %vm9773_vm1, %v1294_v19 }
 0x1ac   : > { %v2514_v20 = vadd.f32 %v2146_v27, %v1938_v56  ;;  %1324 = vst.msk [vmem:[#allocation2 + $0xf8] sm:$0xff] %vm9773_vm1, %v1292_v35  ;;  %v7828_v17 = vadd.f32 %v7277_v16, %v2672_v51  ;;  %v2642_v21 = vsel %vm7777_vm11, %v2354_v33, 0.0  ;;  %v2673_v42 = vadd.f32 %v2513_v61, %v2353_v31  ;;  %v1976_v27 = vld [vmem:[#allocation2 + $0xb0] sm:$0xff] }
 0x1ad   : > { %v2783_v40 = vsel %vm9773_vm1, %v9958_v39, 0.0  ;;  %1327 = vst.msk [vmem:[#allocation2 + $0x110] sm:$0xff] %vm9773_vm1, %v1295_v11  ;;  %v1293_v46 = vmax.f32 %v1253_v25, 0.0  ;;  %v1801_v52 = vmul.f32 %v6975_v50, %v7674_v63  ;;  %v2046_v56 = vmul.f32 %v6982_v57, %v7751_v29  ;;  %v1769_v35 = vld [vmem:[#allocation2 + $0xb7] sm:$0xff] }
 0x1ae   : > { %9959 = vst [vmem:[#allocation45_spill] sm:$0xff] %v7828_v17  ;;  %v2355_v32 = vadd.f32 %v2323_v34, %v2285_v43  ;;  %v2515_v8 = vadd.f32 %v2483_v23, %v7764_v28  ;;  %v9960_v51 = vmax.f32 %v7729_v1, 0.0  ;;  %v7843_v31 = vadd.f32 %v7745_v15, %v7762_v37  ;;  %v9962_v23 = vld [vmem:[#allocation48_spill] sm:$0xff] }
 0x1af   : > { %v2216_v61 = vmul.f32 %v6994_v60, %v7692_v3  ;;  %v7848_v63 = vmul.f32 %v6975_v50, %v1768_v55  ;;  %1325 = vst.msk [vmem:[#allocation2 + $0x100] sm:$0xff] %vm9773_vm1, %v1293_v46  ;;  %v2784_v36 = vadd.f32 %v2783_v40, %v2782_v62  ;;  %v1840_v4 = vmul.f32 %v6990_v59, %v1768_v55  ;;  %v2184_v62 = vld [vmem:[#allocation2 + $0xb1] sm:$0xff] }
 0x1b0   : > { %v2785_v47 = vsel %vm9773_vm1, %v9960_v51, 0.0  ;;  %v1908_v28 = vmul.f32 %v7018_v6, %v1768_v55  ;;  %v2674_v0 = vadd.f32 %v2642_v21, %v2514_v20  ;;  %v9742_v10 = vmax.f32 %v7828_v17, 0.0 }
 0x1b1   : > { %v7855_v33 = vmul.f32 %v6972_v49, %v1976_v27  ;;  %v1870_v15 = vadd.f32 %v1838_v48, %v7653_v54  ;;  %v7859_v3 = vadd.f32 %v7277_v16, %v2673_v42  ;;  %v2048_v37 = vmul.f32 %v6982_v57, %v1976_v27  ;;  %v1977_v42 = vld [vmem:[#allocation2 + $0xb8] sm:$0xff] }
 0x1b2   : > { %v2116_v24 = vmul.f32 %v6986_v58, %v1976_v27  ;;  %v2078_v38 = vadd.f32 %v2046_v56, %v7661_v44  ;;  %v2675_v30 = vadd.f32 %v2515_v8, %v2355_v32  ;;  %v7865_v43 = vmul.f32 %v6994_v60, %v2183_v18  ;;  %v7902_v56 = vld [vmem:[%s6699_s17 + $0x8] ss:$0 sm:$0xff] }
 0x1b3   : > { %9961 = vst [vmem:[#allocation55_spill] sm:$0xff] %v7859_v3  ;;  %v1802_v12 = vmul.f32 %v6975_v50, %v7747_v13  ;;  %v1839_v19 = vmul.f32 %v6990_v59, %v7749_v7  ;;  %v2010_v54 = vmul.f32 %v6972_v49, %v7751_v29  ;;  %v9963_v11 = vand.u32 15, %v9962_v23 }
 0x1b4   : > { %v9967_v25 = vand.u32 15, %v9966_v53  ;;  %v9968_v39 = vmov 0  ;;  %v2786_v13 = vadd.f32 %v2785_v47, %v2784_v36  ;;  %v2255_v40 = vmul.f32 %v7027_v9, %v2183_v18 }
 0x1b5   : > { %vm7875_vm12 = vcmp.gt.s32.totalorder %v9963_v11, 0  ;;  %v2254_v29 = vmul.f32 %v7027_v9, %v7773_v5  ;;  %v7889_v55 = vadd.f32 %v7277_v16, %v2674_v0  ;;  %v2787_v34 = vsel %vm9773_vm1, %v9742_v10, 0.0 }
 0x1b6   : > { %vm7881_vm15 = vcmp.lt.s32.totalorder %v9967_v25, 15  ;;  %v1940_v48 = vadd.f32 %v1908_v28, %v1870_v15  ;;  %v2217_v20 = vmul.f32 %v6994_v60, %v7771_v14  ;;  %v9741_v21 = vmax.f32 %v7859_v3, 0.0  ;;  %v1979_v15 = vld [vmem:[#allocation2 + $0xc8] sm:$0xff] }
 0x1b7   : > { %v9969_v39 = vsel %vm7881_vm15, 4294967295, %v9968_v39  ;;  %9971 = vst [vmem:[#allocation58_spill] sm:$0xff] %v7889_v55  ;;  %v2148_v46 = vadd.f32 %v2116_v24, %v2078_v38  ;;  %v7898_v18 = vadd.f32 %v7277_v16, %v2675_v30  ;;  %v1909_v27 = vmul.f32 %v7018_v6, %v1769_v35 }
 0x1b8   : > { %9970 = vst [vmem:[#allocation56_spill] sm:$0xff] %v9969_v39  ;;  %v2324_v32 = vmul.f32 %v7902_v56, %v2184_v62  ;;  %v1803_v8 = vmul.f32 %v6975_v50, %v7749_v7  ;;  %v1871_v51 = vadd.f32 %v1839_v19, %v1801_v52  ;;  %v7907_v47 = vadd.f32 %v1840_v4, %v1802_v12 }
 0x1b9   : > { %9972 = vst [vmem:[#allocation59_spill] sm:$0xff] %v7898_v18  ;;  %v7909_v14 = vadd.f32 %v2048_v37, %v2010_v54  ;;  %v2788_v36 = vadd.f32 %v2787_v34, %v2786_v13  ;;  %v2286_v28 = vadd.f32 %v2254_v29, %v2216_v61  ;;  %v9740_v0 = vmax.f32 %v7889_v55, 0.0  ;;  %v9975_v13 = vld [vmem:[#allocation29_spill] sm:$0xff] }
 0x1ba   : > { %v2049_v24 = vmul.f32 %v6982_v57, %v1977_v42  ;;  %v2218_v38 = vmul.f32 %v6994_v60, %v7773_v5  ;;  %v7915_v30 = vadd.f32 %v2255_v40, %v2217_v20  ;;  %v2789_v7 = vsel %vm9773_vm1, %v9741_v21, 0.0  ;;  %v2185_v21 = vld [vmem:[#allocation2 + $0xb9] sm:$0xff] }
 0x1bb   : > { %v2117_v52 = vmul.f32 %v6986_v58, %v1977_v42  ;;  %v2516_v4 = vadd.f32 %v2148_v46, %v1940_v48  ;;  %v1941_v61 = vadd.f32 %v1909_v27, %v1871_v51  ;;  %v2356_v12 = vadd.f32 %v2324_v32, %v2286_v28  ;;  %v1772_v48 = vld [vmem:[#allocation2 + $0xcf] sm:$0xff] }
 0x1bc   : > { %v2051_v19 = vmul.f32 %v6982_v57, %v1979_v15  ;;  %v1841_v54 = vmul.f32 %v6990_v59, %v1769_v35  ;;  %v2013_v23 = vmul.f32 %v6972_v49, %v1977_v42  ;;  %v2256_v5 = vmul.f32 %v7027_v9, %v2184_v62  ;;  %v1980_v51 = vld [vmem:[#allocation2 + $0xd0] sm:$0xff] }
 0x1bd   : > { %v7926_v11 = vadd.f32 %v2789_v7, %v2788_v36  ;;  %v7931_v53 = vsel %vm9773_vm1, %v9740_v0, 0.0  ;;  %v2081_v25 = vadd.f32 %v2049_v24, %v7742_v26  ;;  %v7935_v40 = vadd.s32 176, %v9975_v13  ;;  %v1770_v36 = vld [vmem:[#allocation2 + $0xbf] sm:$0xff] }
 0x1be   : > { %9974 = vst [vmem:[#allocation61_spill] sm:$0xff] %v7931_v53  ;;  %v7938_v29 = vmul.f32 %v6972_v49, %v1979_v15  ;;  %v2149_v34 = vadd.f32 %v2117_v52, %v7843_v31  ;;  %v7942_v20 = vadd.s32 184, %v9975_v13  ;;  %v7945_v42 = vadd.s32 192, %v9975_v13  ;;  %v1771_v52 = vld [vmem:[#allocation2 + $0xc7] sm:$0xff] }
 0x1bf   : > { %9973 = vst [vmem:[#allocation60_spill] sm:$0xff] %v7926_v11  ;;  %v2119_v46 = vmul.f32 %v6986_v58, %v1979_v15  ;;  %v1805_v27 = vmul.f32 %v6975_v50, %v1769_v35  ;;  %v2485_v26 = vsel %vm7875_vm12, %v1941_v61, 0.0  ;;  %v2644_v32 = vsel %vm7881_vm15, %v2356_v12, 0.0  ;;  %v1978_v0 = vld [vmem:[#allocation2 + $0xc0] sm:$0xff]  ;;  %v9977_v15 = vld [vmem:[#allocation50_spill] sm:$0xff] }
 0x1c0   : > { %9976 = vst [vmem:[#allocation62_spill] sm:$0xff] %v7942_v20  ;;  %v1873_v31 = vadd.f32 %v1841_v54, %v1803_v8  ;;  %v7953_v28 = vadd.f32 %v2051_v19, %v2013_v23  ;;  %v2220_v24 = vmul.f32 %v6994_v60, %v2184_v62  ;;  %v2288_v7 = vadd.f32 %v2256_v5, %v2218_v38  ;;  %v2186_v19 = vld [vmem:[#allocation2 + $0xc1] sm:$0xff]  ;;  %v8149_v20 = vld [vmem:[#allocation2 + $0xf0] sm:$0xff] }
 0x1c1   : > { %v9978_v10 = vand.u32 15, %v9977_v15  ;;  %v9979_v35 = vmov 0  ;;  %v2151_v44 = vadd.f32 %v2119_v46, %v2081_v25  ;;  %v7963_v61 = vmul.f32 %v6975_v50, %v1772_v48  ;;  %v9982_v62 = vld [vmem:[#allocation49_spill] sm:$0xff] }
 0x1c2   : > { %v1844_v8 = vmul.f32 %v6990_v59, %v1772_v48  ;;  %v1912_v12 = vmul.f32 %v7018_v6, %v1772_v48  ;;  %v9983_v38 = vand.u32 15, %v9982_v62  ;;  %v2517_v23 = vadd.f32 %v2485_v26, %v2149_v34  ;;  %v2187_v25 = vld [vmem:[#allocation2 + $0xc9] sm:$0xff] }
 0x1c3   : > { %vm7958_vm4 = vcmp.gt.s32.totalorder %v9978_v10, 0  ;;  %v2676_v10 = vadd.f32 %v2644_v32, %v2516_v4  ;;  %v7974_v5 = vmul.f32 %v6972_v49, %v1980_v51  ;;  %v1842_v46 = vmul.f32 %v6990_v59, %v1770_v36 }
 0x1c4   : > { %v9980_v35 = vsel %vm7958_vm4, 4294967295, %v9979_v35  ;;  %vm7969_vm11 = vcmp.lt.s32.totalorder %v9983_v38, 15  ;;  %v1910_v15 = vmul.f32 %v7018_v6, %v1770_v36  ;;  %v1911_v37 = vmul.f32 %v7018_v6, %v1771_v52 }
 0x1c5   : > { %9981 = vst [vmem:[#allocation64_spill] sm:$0xff] %v9980_v35  ;;  %v2118_v48 = vmul.f32 %v6986_v58, %v1978_v0  ;;  %v2325_v62 = vmul.f32 %v7902_v56, %v2185_v21  ;;  %v2052_v38 = vmul.f32 %v6982_v57, %v1980_v51  ;;  %v2120_v39 = vmul.f32 %v6986_v58, %v1980_v51 }
 0x1c6   : > { %v1806_v4 = vmul.f32 %v6975_v50, %v1770_v36  ;;  %v2326_v34 = vmul.f32 %v7902_v56, %v2186_v19  ;;  %v7986_v26 = vmul.f32 %v6994_v60, %v2187_v25  ;;  %v2259_v32 = vmul.f32 %v7027_v9, %v2187_v25 }
 0x1c7   : > { %v1843_v45 = vmul.f32 %v6990_v59, %v1771_v52  ;;  %v2050_v55 = vmul.f32 %v6982_v57, %v1978_v0  ;;  %v7992_v3 = vadd.f32 %v7277_v16, %v2676_v10  ;;  %v1874_v17 = vadd.f32 %v1842_v46, %v7848_v63 }
 0x1c8   : > { %9986 = vst [vmem:[#allocation48_spill] sm:$0xff] %v7986_v26  ;;  %v2014_v51 = vmul.f32 %v6972_v49, %v1978_v0  ;;  %v2257_v36 = vmul.f32 %v7027_v9, %v2185_v21  ;;  %v1942_v1 = vadd.f32 %v1910_v15, %v7907_v47  ;;  %v1943_v22 = vadd.f32 %v1911_v37, %v1873_v31  ;;  %v1773_v26 = vld [vmem:[#allocation2 + $0xd7] sm:$0xff] }
 0x1c9   : > { %9987 = vst [vmem:[#allocation47_spill] sm:$0xff] %v7992_v3  ;;  %v2150_v2 = vadd.f32 %v2118_v48, %v7909_v14  ;;  %v2357_v41 = vadd.f32 %v2325_v62, %v7915_v30  ;;  %v2327_v18 = vmul.f32 %v7902_v56, %v2187_v25  ;;  %v1807_v53 = vmul.f32 %v6975_v50, %v1771_v52  ;;  %v8005_v47 = vld [vmem:[#allocation2 + $0xd8] sm:$0xff]  ;;  %v1775_v48 = vld [vmem:[#allocation2 + $0xe7] sm:$0xff] }
 0x1ca   : > { %v1876_v11 = vadd.f32 %v1844_v8, %v1806_v4  ;;  %v2358_v16 = vadd.f32 %v2326_v34, %v2288_v7  ;;  %v1875_v10 = vadd.f32 %v1843_v45, %v1805_v27  ;;  %v2082_v63 = vadd.f32 %v2050_v55, %v7855_v33  ;;  %v2188_v52 = vld [vmem:[#allocation2 + $0xd1] sm:$0xff]  ;;  %v8016_v27 = vld [vmem:[#allocation2 + $0xe8] sm:$0xff]  ;;  %v8036_v15 = vld [vmem:[#allocation2 + $0xd9] sm:$0xff] }
 0x1cb   : > { %v2221_v0 = vmul.f32 %v6994_v60, %v2185_v21  ;;  %v2258_v46 = vmul.f32 %v7027_v9, %v2186_v19  ;;  %v8008_v37 = vadd.f32 %v1912_v12, %v1874_v17  ;;  %v8010_v30 = vadd.f32 %v2052_v38, %v2014_v51  ;;  %v8050_v62 = vld [vmem:[#allocation2 + $0xe0] sm:$0xff] }
 0x1cc   : > { %v2289_v31 = vadd.f32 %v2257_v36, %v7865_v43  ;;  %v2222_v45 = vmul.f32 %v6994_v60, %v2186_v19  ;;  %v2487_v33 = vsel %vm7958_vm4, %v1943_v22, 0.0  ;;  %v2518_v55 = vadd.f32 %v2150_v2, %v1942_v1  ;;  %v8053_v38 = vld [vmem:[%s6704_s21] ss:$0 sm:$0xff]  ;;  %v10005_v3 = vld [vmem:[#allocation65_spill] sm:$0xff] }
 0x1cd   : > { %9988 = vst [vmem:[#allocation50_spill] sm:$0xff] %v8008_v37  ;;  %v2677_v21 = vadd.f32 %v2517_v23, %v2357_v41  ;;  %v2646_v7 = vsel %vm7969_vm11, %v2358_v16, 0.0  ;;  %v1845_v17 = vmul.f32 %v6990_v59, %v1773_v26  ;;  %v1913_v8 = vmul.f32 %v7018_v6, %v1773_v26  ;;  %v1774_v23 = vld [vmem:[#allocation2 + $0xdf] sm:$0xff]  ;;  %9993 = vst [vmem:[#allocation77_spill] sm:$0xff] %v8053_v38 }
 0x1ce   : > { %v2121_v43 = vmul.f32 %v6986_v58, %v8005_v47  ;;  %v8024_v12 = vadd.f32 %v2120_v39, %v2082_v63  ;;  %v2290_v19 = vadd.f32 %v2258_v46, %v2220_v24  ;;  %v2291_v25 = vadd.f32 %v2259_v32, %v2221_v0  ;;  %v8069_v63 = vld [vmem:[#allocation2 + $0xe1] sm:$0xff] }
 0x1cf   : > { %v2260_v2 = vmul.f32 %v7027_v9, %v2188_v52  ;;  %v8027_v41 = vadd.f32 %v2327_v18, %v2289_v31  ;;  %v8029_v22 = vadd.f32 %v2487_v33, %v2151_v44  ;;  %v8033_v1 = vmul.f32 %v6986_v58, %v8016_v27  ;;  %v1778_v14 = vld [vmem:[#allocation2 + $0xff] sm:$0xff] }
 0x1d0   : > { %9989 = vst [vmem:[#allocation49_spill] sm:$0xff] %v8024_v12  ;;  %v2328_v54 = vmul.f32 %v7902_v56, %v2188_v52  ;;  %v8038_v39 = vadd.f32 %v2646_v7, %v2518_v55  ;;  %v8041_v24 = vmul.f32 %v6975_v50, %v1773_v26  ;;  %v8045_v18 = vmul.f32 %v6982_v57, %v8005_v47 }
 0x1d1   : > { %9990 = vst [vmem:[#allocation74_spill] sm:$0xff] %v8027_v41  ;;  %9991 = vst [vmem:[#allocation75_spill] sm:$0xff] %v8029_v22  ;;  %v8048_v44 = vmul.f32 %v6994_v60, %v2188_v52  ;;  %v8056_v4 = vadd.f32 %v8053_v38, %v2677_v21  ;;  %v8058_v34 = vadd.f32 %v1845_v17, %v1807_v53  ;;  %v8086_v52 = vadd.s32 200, %v9975_v13  ;;  %v1816_v41 = vld [vmem:[#allocation2 + $0x10f] sm:$0xff] }
 0x1d2   : > { %9992 = vst [vmem:[#allocation76_spill] sm:$0xff] %v8038_v39  ;;  %v8060_v32 = vadd.f32 %v1913_v8, %v1875_v10  ;;  %v8063_v26 = vadd.f32 %v2121_v43, %v7953_v28  ;;  %v8065_v51 = vadd.f32 %v2260_v2, %v2222_v45  ;;  %v1846_v36 = vmul.f32 %v6990_v59, %v1774_v23  ;;  %v1815_v39 = vld [vmem:[#allocation2 + $0x107] sm:$0xff] }
 0x1d3   : > { %9994 = vst [vmem:[#allocation78_spill] sm:$0xff] %v8056_v4  ;;  %v1914_v16 = vmul.f32 %v7018_v6, %v1774_v23  ;;  %v2329_v0 = vmul.f32 %v7902_v56, %v8036_v15  ;;  %v8073_v46 = vadd.f32 %v2328_v54, %v2290_v19  ;;  %v1847_v53 = vmul.f32 %v6990_v59, %v1775_v48  ;;  %v1777_v54 = vld [vmem:[#allocation2 + $0xf7] sm:$0xff] }
 0x1d4   : > { %9995 = vst [vmem:[#allocation79_spill] sm:$0xff] %v8063_v26  ;;  %v1915_v10 = vmul.f32 %v7018_v6, %v1775_v48  ;;  %v8079_v28 = vmul.f32 %v6982_v57, %v8050_v62  ;;  %v8083_v31 = vmul.f32 %v6986_v58, %v8050_v62  ;;  %9997 = vst [vmem:[#allocation81_spill] sm:$0xff] %v8086_v52  ;;  %v8089_v45 = vadd.s32 208, %v9975_v13  ;;  %v8154_v52 = vld [vmem:[#allocation2 + $0xf8] sm:$0xff] }
 0x1d5   : > { %9996 = vst [vmem:[#allocation80_spill] sm:$0xff] %v8073_v46  ;;  %v8092_v33 = vadd.s32 216, %v9975_v13  ;;  %v8096_v55 = vmul.f32 %v7027_v9, %v8036_v15  ;;  %v8100_v21 = vmul.f32 %v7027_v9, %v8069_v63  ;;  %v8103_v7 = vadd.s32 224, %v9975_v13  ;;  %10006 = vst [vmem:[#allocation65_spill] sm:$0xff] %v8154_v52 }
 0x1d6   : > { %9998 = vst [vmem:[#allocation82_spill] sm:$0xff] %v8089_v45  ;;  %v8106_v17 = vadd.s32 232, %v9975_v13  ;;  %v8108_v8 = vadd.f32 %v1914_v16, %v1876_v11  ;;  %v8112_v43 = vmul.f32 %v7902_v56, %v8069_v63  ;;  %v8114_v19 = vadd.f32 %v2329_v0, %v2291_v25  ;;  %v1776_v16 = vld [vmem:[#allocation2 + $0xef] sm:$0xff]  ;;  %v1886_v11 = vld [vmem:[#allocation2 + $0x11f] sm:$0xff] }
 0x1d7   : > { %9999 = vst [vmem:[#allocation83_spill] sm:$0xff] %v8092_v33  ;;  %10000 = vst [vmem:[#allocation84_spill] sm:$0xff] %v8103_v7  ;;  %v8117_v2 = vadd.s32 240, %v9975_v13  ;;  %v8120_v35 = vadd.s32 248, %v9975_v13  ;;  %v1849_v4 = vmul.f32 %v6990_v59, %v1777_v54  ;;  %v1850_v38 = vmul.f32 %v6990_v59, %v1778_v14  ;;  %v1885_v7 = vld [vmem:[#allocation2 + $0x117] sm:$0xff] }
 0x1d8   : > { %10001 = vst [vmem:[#allocation85_spill] sm:$0xff] %v8106_v17  ;;  %10002 = vst [vmem:[#allocation86_spill] sm:$0xff] %v8108_v8  ;;  %v1810_v26 = vmul.f32 %v6975_v50, %v1774_v23  ;;  %v1848_v22 = vmul.f32 %v6990_v59, %v1776_v16  ;;  %v1851_v25 = vmul.f32 %v6990_v59, %v1815_v39 }
 0x1d9   : > { %10003 = vst [vmem:[#allocation87_spill] sm:$0xff] %v8114_v19  ;;  %10004 = vst [vmem:[#allocation88_spill] sm:$0xff] %v8117_v2  ;;  %v1811_v0 = vmul.f32 %v6975_v50, %v1775_v48  ;;  %v1812_v19 = vmul.f32 %v6975_v50, %v1776_v16  ;;  %v1814_v13 = vmul.f32 %v6975_v50, %v1778_v14 }
 0x1da   : > { %v1852_v8 = vmul.f32 %v6990_v59, %v1816_v41  ;;  %v1813_v17 = vmul.f32 %v6975_v50, %v1777_v54  ;;  %v1878_v33 = vadd.f32 %v1846_v36, %v7963_v61  ;;  %v1917_v23 = vmul.f32 %v7018_v6, %v1777_v54 }
 0x1db   : > { %v1918_v2 = vmul.f32 %v7018_v6, %v1778_v14  ;;  %v1881_v12 = vadd.f32 %v1849_v4, %v1811_v0  ;;  %v1882_v48 = vadd.f32 %v1850_v38, %v1812_v19  ;;  %v1919_v37 = vmul.f32 %v7018_v6, %v1815_v39  ;;  %v8156_v38 = vld [vmem:[#allocation2 + $0x100] sm:$0xff] }
 0x1dc   : > { %v1879_v45 = vadd.f32 %v1847_v53, %v8041_v24  ;;  %v1880_v46 = vadd.f32 %v1848_v22, %v1810_v26  ;;  %v1883_v59 = vadd.f32 %v1851_v25, %v1813_v17  ;;  %v1916_v50 = vmul.f32 %v7018_v6, %v1776_v16  ;;  %10007 = vst [vmem:[#allocation89_spill] sm:$0xff] %v8156_v38  ;;  %v2093_v16 = vld [vmem:[#allocation2 + $0x118] sm:$0xff] }
 0x1dd   : > { %v1884_v61 = vadd.f32 %v1852_v8, %v1814_v13  ;;  %v1920_v36 = vmul.f32 %v7018_v6, %v1816_v41  ;;  %v1921_v54 = vmul.f32 %v7018_v6, %v1885_v7  ;;  %v1922_v14 = vmul.f32 %v7018_v6, %v1886_v11  ;;  %v8167_v13 = vld [vmem:[#allocation2 + $0x108] sm:$0xff]  ;;  %v8169_v41 = vld [vmem:[#allocation2 + $0x110] sm:$0xff] }
 0x1de   : > { %v8159_v39 = vadd.f32 %v1915_v10, %v8058_v34  ;;  %v8161_v22 = vadd.f32 %v1916_v50, %v1878_v33  ;;  %v8163_v24 = vadd.f32 %v1917_v23, %v1879_v45  ;;  %v8165_v4 = vadd.f32 %v1918_v2, %v1880_v46  ;;  %v2094_v23 = vld [vmem:[#allocation2 + $0x120] sm:$0xff] }
 0x1df   : > { %v8171_v26 = vadd.f32 %v1919_v37, %v1881_v12  ;;  %v8173_v6 = vadd.f32 %v1920_v36, %v1882_v48  ;;  %v2017_v53 = vmul.f32 %v6972_v49, %v8005_v47  ;;  %v2018_v34 = vmul.f32 %v6972_v49, %v8050_v62 }
 0x1e0   : > { %v2055_v10 = vmul.f32 %v6982_v57, %v8016_v27  ;;  %v2056_v46 = vmul.f32 %v6982_v57, %v8149_v20  ;;  %v2057_v45 = vmul.f32 %v6982_v57, %v8154_v52  ;;  %v2058_v37 = vmul.f32 %v6982_v57, %v8156_v38 }
 0x1e1   : > { %v2021_v12 = vmul.f32 %v6972_v49, %v8154_v52  ;;  %v2022_v33 = vmul.f32 %v6972_v49, %v8156_v38  ;;  %v2059_v7 = vmul.f32 %v6982_v57, %v8167_v13  ;;  %v2060_v17 = vmul.f32 %v6982_v57, %v8169_v41 }
 0x1e2   : > { %v8195_v8 = vadd.f32 %v1921_v54, %v1883_v59  ;;  %v8197_v19 = vadd.f32 %v1922_v14, %v1884_v61  ;;  %v2019_v2 = vmul.f32 %v6972_v49, %v8016_v27  ;;  %v2020_v11 = vmul.f32 %v6972_v49, %v8149_v20 }
 0x1e3   : > { %v2085_v25 = vadd.f32 %v8045_v18, %v7938_v29  ;;  %v2086_v0 = vadd.f32 %v8079_v28, %v7974_v5  ;;  %v2125_v57 = vmul.f32 %v6986_v58, %v8154_v52  ;;  %v2126_v48 = vmul.f32 %v6986_v58, %v8156_v38  ;;  %v2191_v18 = vld [vmem:[#allocation2 + $0xe9] sm:$0xff] }
 0x1e4   : > { %v2087_v59 = vadd.f32 %v2055_v10, %v2017_v53  ;;  %v2088_v50 = vadd.f32 %v2056_v46, %v2018_v34  ;;  %v2089_v61 = vadd.f32 %v2057_v45, %v2019_v2  ;;  %v2090_v36 = vadd.f32 %v2058_v37, %v2020_v11  ;;  %v2192_v34 = vld [vmem:[#allocation2 + $0xf1] sm:$0xff]  ;;  %v2193_v10 = vld [vmem:[#allocation2 + $0xf9] sm:$0xff]  ;;  %v2194_v46 = vld [vmem:[#allocation2 + $0x101] sm:$0xff] }
 0x1e5   : > { %v2091_v54 = vadd.f32 %v2059_v7, %v2021_v12  ;;  %v2092_v49 = vadd.f32 %v2060_v17, %v2022_v33  ;;  %v2124_v14 = vmul.f32 %v6986_v58, %v8149_v20  ;;  %v2129_v29 = vmul.f32 %v6986_v58, %v2093_v16  ;;  %v2232_v7 = vld [vmem:[#allocation2 + $0x111] sm:$0xff]  ;;  %v2231_v11 = vld [vmem:[#allocation2 + $0x109] sm:$0xff] }
 0x1e6   : > { %v2127_v5 = vmul.f32 %v6986_v58, %v8167_v13  ;;  %v2128_v28 = vmul.f32 %v6986_v58, %v8169_v41  ;;  %v2130_v38 = vmul.f32 %v6986_v58, %v2094_v23  ;;  %v2154_v53 = vadd.f32 %v8083_v31, %v8010_v30 }
 0x1e7   : > { %v2155_v45 = vadd.f32 %v8033_v1, %v2085_v25  ;;  %v8222_v37 = vadd.f32 %v2124_v14, %v2086_v0  ;;  %v8224_v12 = vadd.f32 %v2125_v57, %v2087_v59  ;;  %v8226_v33 = vadd.f32 %v2126_v48, %v2088_v50 }
 0x1e8   : > { %v8228_v17 = vadd.f32 %v2127_v5, %v2089_v61  ;;  %v8230_v2 = vadd.f32 %v2128_v28, %v2090_v36  ;;  %v2225_v58 = vmul.f32 %v6994_v60, %v8036_v15  ;;  %v2263_v30 = vmul.f32 %v7027_v9, %v2191_v18  ;;  %v10030_v36 = vld [vmem:[#allocation86_spill] sm:$0xff] }
 0x1e9   : > { %v8235_v31 = vadd.f32 %v2129_v29, %v2091_v54  ;;  %v2264_v1 = vmul.f32 %v7027_v9, %v2192_v34  ;;  %v2265_v16 = vmul.f32 %v7027_v9, %v2193_v10  ;;  %v2266_v25 = vmul.f32 %v7027_v9, %v2194_v46 }
 0x1ea   : > { %v8240_v0 = vadd.f32 %v2130_v38, %v2092_v49  ;;  %v2226_v23 = vmul.f32 %v6994_v60, %v8069_v63  ;;  %v2230_v57 = vmul.f32 %v6994_v60, %v2194_v46  ;;  %v2268_v15 = vmul.f32 %v7027_v9, %v2232_v7  ;;  %v10011_v63 = vld [vmem:[#allocation48_spill] sm:$0xff] }
 0x1eb   : > { %v2227_v48 = vmul.f32 %v6994_v60, %v2191_v18  ;;  %v2228_v59 = vmul.f32 %v6994_v60, %v2192_v34  ;;  %v8249_v50 = vmul.f32 %v6994_v60, %v2193_v10  ;;  %v10008_v61 = vand.u32 15, %v7935_v40 }
 0x1ec   : > { %v8258_v38 = vmul.f32 %v7027_v9, %v2231_v11  ;;  %v2293_v54 = vadd.f32 %v8096_v55, %v10011_v63  ;;  %v2294_v49 = vadd.f32 %v8100_v21, %v8048_v44  ;;  %v2295_v14 = vadd.f32 %v2263_v30, %v2225_v58 }
 0x1ed   : > { %vm8253_vm12 = vcmp.gt.s32.totalorder %v10008_v61, 0  ;;  %v2296_v29 = vadd.f32 %v2264_v1, %v2226_v23  ;;  %v2297_v5 = vadd.f32 %v2265_v16, %v2227_v48  ;;  %v2298_v60 = vadd.f32 %v2266_v25, %v2228_v59  ;;  %v10018_v1 = vld [vmem:[#allocation62_spill] sm:$0xff]  ;;  %v10028_v23 = vld [vmem:[#allocation49_spill] sm:$0xff]  ;;  %v10049_v25 = vld [vmem:[#allocation60_spill] sm:$0xff] }
 0x1ee   : > { %v10012_v28 = vand.u32 15, %v10005_v3  ;;  %v10013_v40 = vmov 0  ;;  %v8270_v61 = vadd.f32 %v2268_v15, %v2230_v57  ;;  %v2331_v9 = vmul.f32 %v7902_v56, %v2191_v18  ;;  %v10029_v57 = vld [vmem:[#allocation79_spill] sm:$0xff] }
 0x1ef   : > { %v2332_v52 = vmul.f32 %v7902_v56, %v2192_v34  ;;  %v2489_v44 = vsel %vm8253_vm12, %v8060_v32, 0.0  ;;  %v2333_v55 = vmul.f32 %v7902_v56, %v2193_v10  ;;  %v2334_v21 = vmul.f32 %v7902_v56, %v2194_v46  ;;  %v10022_v10 = vld [vmem:[#allocation80_spill] sm:$0xff]  ;;  %v10043_v32 = vld [vmem:[#allocation83_spill] sm:$0xff] }
 0x1f0   : > { %vm8266_vm11 = vcmp.lt.s32.totalorder %v10012_v28, 15  ;;  %v2362_v3 = vadd.f32 %v8112_v43, %v8065_v51  ;;  %v10015_v58 = vand.u32 15, %v7945_v42  ;;  %v10016_v30 = vmov 0  ;;  %v10023_v42 = vld [vmem:[#allocation82_spill] sm:$0xff] }
 0x1f1   : > { %v10014_v40 = vsel %vm8266_vm11, 4294967295, %v10013_v40  ;;  %v2335_v18 = vmul.f32 %v7902_v56, %v2231_v11  ;;  %v2336_v34 = vmul.f32 %v7902_v56, %v2232_v7  ;;  %v10019_v16 = vand.u32 15, %v10018_v1  ;;  %v10027_v11 = vld [vmem:[#allocation50_spill] sm:$0xff] }
 0x1f2   : > { %vm8283_vm0 = vcmp.gt.s32.totalorder %v10015_v58, 0  ;;  %v2648_v51 = vsel %vm8266_vm11, %v10022_v10, 0.0  ;;  %v2363_v43 = vadd.f32 %v2331_v9, %v2293_v54  ;;  %v10024_v46 = vand.u32 15, %v10023_v42  ;;  %v10031_v28 = vld [vmem:[#allocation74_spill] sm:$0xff]  ;;  %v10032_v54 = vld [vmem:[#allocation75_spill] sm:$0xff]  ;;  %v10033_v58 = vld [vmem:[#allocation81_spill] sm:$0xff] }
 0x1f3   : > { %v10017_v30 = vsel %vm8283_vm0, 4294967295, %v10016_v30  ;;  %vm8291_vm12 = vcmp.lt.s32.totalorder %v10019_v16, 15  ;;  %v2520_v7 = vadd.f32 %v10028_v23, %v10027_v11  ;;  %v2521_v15 = vadd.f32 %v2489_v44, %v10029_v57 }
 0x1f4   : > { %vm8300_vm5 = vcmp.gt.s32.totalorder %v10024_v46, 0  ;;  %v2364_v48 = vadd.f32 %v2332_v52, %v2294_v49  ;;  %v2491_v59 = vsel %vm8283_vm0, %v8159_v39, 0.0  ;;  %v2522_v63 = vadd.f32 %v2154_v53, %v10030_v36  ;;  %v10037_v52 = vld [vmem:[#allocation76_spill] sm:$0xff]  ;;  %v10038_v49 = vld [vmem:[#allocation77_spill] sm:$0xff] }
 0x1f5   : > { %v2679_v9 = vadd.f32 %v10032_v54, %v10031_v28  ;;  %v10034_v1 = vand.u32 15, %v10033_v58  ;;  %v10035_v16 = vmov 0  ;;  %v2650_v10 = vsel %vm8291_vm12, %v2362_v3, 0.0  ;;  %v10039_v53 = vld [vmem:[#allocation84_spill] sm:$0xff] }
 0x1f6   : > { %v2680_v44 = vadd.f32 %v2648_v51, %v2520_v7  ;;  %v8323_v42 = vadd.f32 %v10038_v49, %v10037_v52  ;;  %v2365_v39 = vadd.f32 %v2333_v55, %v2295_v14  ;;  %v2366_v46 = vadd.f32 %v2334_v21, %v2296_v29  ;;  %v10047_v7 = vld [vmem:[#allocation87_spill] sm:$0xff]  ;;  %v10048_v29 = vld [vmem:[#allocation78_spill] sm:$0xff] }
 0x1f7   : > { %vm8315_vm1 = vcmp.lt.s32.totalorder %v10034_v1, 15  ;;  %v10040_v11 = vand.u32 15, %v10039_v53  ;;  %v10041_v23 = vmov 0  ;;  %v2493_v57 = vsel %vm8300_vm5, %v8163_v24, 0.0  ;;  %v10050_v24 = vld [vmem:[#allocation61_spill] sm:$0xff]  ;;  %v10051_v1 = vld [vmem:[#allocation59_spill] sm:$0xff] }
 0x1f8   : > { %v10036_v16 = vsel %vm8315_vm1, 4294967295, %v10035_v16  ;;  %v2523_v36 = vadd.f32 %v2491_v59, %v2155_v45  ;;  %v10044_v3 = vand.u32 15, %v10043_v32  ;;  %v2681_v14 = vadd.f32 %v2521_v15, %v10047_v7  ;;  %v10054_v53 = vld [vmem:[#allocation47_spill] sm:$0xff]  ;;  %v2302_v7 = vld [vmem:[#allocation2 + $0x121] sm:$0xff] }
 0x1f9   : > { %vm8327_vm0 = vcmp.gt.s32.totalorder %v10040_v11, 0  ;;  %v2748_v55 = vmax.f32 %v10048_v29, 0.0  ;;  %v2652_v21 = vsel %vm8315_vm1, %v2364_v48, 0.0  ;;  %v2682_v28 = vadd.f32 %v2650_v10, %v2522_v63  ;;  %v10057_v63 = vld [vmem:[#allocation88_spill] sm:$0xff] }
 0x1fa   : > { %v10042_v23 = vsel %vm8327_vm0, 4294967295, %v10041_v23  ;;  %vm8336_vm12 = vcmp.lt.s32.totalorder %v10044_v3, 15  ;;  %v8345_v54 = vadd.f32 %v10038_v49, %v2679_v9  ;;  %v2792_v45 = vadd.f32 %v10050_v24, %v10049_v25 }
 0x1fb   : > { %v8350_v59 = vadd.f32 %v10038_v49, %v2680_v44  ;;  %v2749_v58 = vmax.f32 %v8323_v42, 0.0  ;;  %v10052_v52 = vmax.f32 %v10051_v1, 0.0  ;;  %vm10053_vm5 = vcmask 64512  }
 0x1fc   : > { %v10055_v11 = vmax.f32 %v10054_v53, 0.0  ;;  %vm10056_vm11 = vmmov %vm10053_vm5  ;;  %v10058_v10 = vand.u32 15, %v10057_v63  ;;  %v2495_v44 = vsel %vm8327_vm0, %v8171_v26, 0.0  ;;  %v2524_v32 = vadd.f32 %v8222_v37, %v8161_v22 }
 0x1fd   : > { %v2793_v15 = vsel %vm10053_vm5, %v10052_v52, 0.0  ;;  %v2525_v25 = vadd.f32 %v2493_v57, %v8224_v12  ;;  %v2526_v24 = vadd.f32 %v8226_v33, %v8165_v4  ;;  %v8374_v52 = vadd.f32 %v10038_v49, %v2681_v14 }
 0x1fe   : > { %v2795_v48 = vsel %vm10056_vm11, %v10055_v11, 0.0  ;;  %vm8361_vm1 = vcmp.gt.s32.totalorder %v10058_v10, 0  ;;  %v2794_v3 = vadd.f32 %v2793_v15, %v2792_v45  ;;  %vm10061_vm11 = vmmov %vm10053_vm5  ;;  %v2654_v26 = vsel %vm8336_vm12, %v2366_v46, 0.0  ;;  %v2301_v46 = vld [vmem:[#allocation2 + $0x119] sm:$0xff]  ;;  %v10062_v15 = vld [vmem:[#allocation85_spill] sm:$0xff] }
 0x1ff   : > { %v2797_v11 = vsel %vm10061_vm11, %v2748_v55, 0.0  ;;  %v2683_v63 = vadd.f32 %v2523_v36, %v2363_v43  ;;  %v2684_v10 = vadd.f32 %v2652_v21, %v2524_v32  ;;  %v8382_v37 = vadd.f32 %v10038_v49, %v2682_v28 }
 0x200   : > { %v2796_v22 = vadd.f32 %v2795_v48, %v2794_v3  ;;  %v2750_v12 = vmax.f32 %v8345_v54, 0.0  ;;  %v2751_v4 = vmax.f32 %v8350_v59, 0.0  ;;  %v2799_v33 = vsel %vm10053_vm5, %v2749_v58, 0.0 }
 0x201   : > { %v2338_v57 = vmul.f32 %v7902_v56, %v2302_v7  ;;  %v2367_v14 = vadd.f32 %v2335_v18, %v2297_v5  ;;  %v2368_v45 = vadd.f32 %v2336_v34, %v2298_v60  ;;  %v2497_v43 = vsel %vm8361_vm1, %v8195_v8, 0.0  ;;  %vm10066_vm1 = vmmov %vm10053_vm5 }
 0x202   : > { %v2798_v51 = vadd.f32 %v2797_v11, %v2796_v22  ;;  %v2527_v36 = vadd.f32 %v2495_v44, %v8228_v17  ;;  %v2685_v21 = vadd.f32 %v2525_v25, %v2365_v39  ;;  %v2752_v28 = vmax.f32 %v8374_v52, 0.0  ;;  %vm10067_vm11 = vmmov %vm10066_vm1 }
 0x203   : > { %v10063_v48 = vand.u32 15, %v10062_v15  ;;  %v10064_v32 = vmov 0  ;;  %v2686_v3 = vadd.f32 %v2654_v26, %v2526_v24  ;;  %v8402_v5 = vadd.f32 %v10038_v49, %v2683_v63  ;;  %vm10068_vm5 = vmmov %vm10066_vm1 }
 0x204   : > { %v2800_v60 = vadd.f32 %v2799_v33, %v2798_v51  ;;  %v8405_v18 = vadd.f32 %v10038_v49, %v2684_v10  ;;  %v2753_v8 = vmax.f32 %v8382_v37, 0.0  ;;  %v2801_v17 = vsel %vm10066_vm1, %v2750_v12, 0.0 }
 0x205   : > { %vm8397_vm12 = vcmp.lt.s32.totalorder %v10063_v48, 15  ;;  %v2803_v34 = vsel %vm10067_vm11, %v2751_v4, 0.0  ;;  %v2299_v39 = vadd.f32 %v8258_v38, %v8249_v50  ;;  %v2337_v9 = vmul.f32 %v7902_v56, %v2301_v46  ;;  %vm10072_vm11 = vmmov %vm10068_vm5 }
 0x206   : > { %v10065_v32 = vsel %vm8397_vm12, 4294967295, %v10064_v32  ;;  %v2370_v44 = vadd.f32 %v2338_v57, %v8270_v61  ;;  %v2802_v7 = vadd.f32 %v2801_v17, %v2800_v60  ;;  %v2528_v25 = vadd.f32 %v8230_v2, %v8173_v6 }
 0x207   : > { %v2529_v24 = vadd.f32 %v2497_v43, %v8235_v31  ;;  %v8422_v11 = vadd.f32 %v10038_v49, %v2685_v21  ;;  %v2805_v26 = vsel %vm10068_vm5, %v2752_v28, 0.0  ;;  %v10069_v63 = vand.u32 15, %v8120_v35 }
 0x208   : > { %v2656_v56 = vsel %vm8397_vm12, %v2368_v45, 0.0  ;;  %v2687_v38 = vadd.f32 %v2527_v36, %v2367_v14  ;;  %v2804_v6 = vadd.f32 %v2803_v34, %v2802_v7  ;;  %v8436_v2 = vadd.f32 %v10038_v49, %v2686_v3 }
 0x209   : > { %vm8429_vm1 = vcmp.lt.s32.totalorder %v10069_v63, 15  ;;  %v2754_v31 = vmax.f32 %v8402_v5, 0.0  ;;  %v2755_v61 = vmax.f32 %v8405_v18, 0.0  ;;  %v2807_v35 = vsel %vm10072_vm11, %v2753_v8, 0.0  ;;  %vm10073_vm11 = vmmov %vm10068_vm5 }
 0x20a   : > { %v2369_v10 = vadd.f32 %v2337_v9, %v2299_v39  ;;  %v2806_v22 = vadd.f32 %v2805_v26, %v2804_v6  ;;  %v2530_v33 = vadd.f32 %v8240_v0, %v8197_v19  ;;  %v2688_v57 = vadd.f32 %v2656_v56, %v2528_v25 }
 0x20b   : > { %v2756_v14 = vmax.f32 %v8422_v11, 0.0  ;;  %v2658_v45 = vsel %vm8429_vm1, %v2370_v44, 0.0  ;;  %v8449_v43 = vadd.f32 %v10038_v49, %v2687_v38  ;;  %v2757_v36 = vmax.f32 %v8436_v2, 0.0  ;;  %vm10074_vm1 = vmmov %vm10068_vm5  ;;  %v8583_v11 = vld [vmem:[%s6734_s19] ss:$0 sm:$0xff] }
 0x20c   : > { %v2689_v51 = vadd.f32 %v2529_v24, %v2369_v10  ;;  %v2808_v46 = vadd.f32 %v2807_v35, %v2806_v22  ;;  %v2809_v21 = vsel %vm10068_vm5, %v2754_v31, 0.0  ;;  %v2811_v19 = vsel %vm10073_vm11, %v2755_v61, 0.0  ;;  %vm10075_vm5 = vmmov %vm10074_vm1 }
 0x20d   : > { %v2690_v15 = vadd.f32 %v2658_v45, %v2530_v33  ;;  %v8459_v48 = vadd.f32 %v10038_v49, %v2688_v57  ;;  %v2813_v3 = vsel %vm10074_vm1, %v2756_v14, 0.0  ;;  %v2758_v34 = vmax.f32 %v8449_v43, 0.0  ;;  %vm10076_vm11 = vmmov %vm10074_vm1 }
 0x20e   : > { %v2810_v0 = vadd.f32 %v2809_v21, %v2808_v46  ;;  %v8465_v17 = vadd.f32 %v10038_v49, %v2689_v51  ;;  %v2815_v39 = vsel %vm10075_vm5, %v2757_v36, 0.0  ;;  %vm10078_vm5 = vmmov %vm10074_vm1  ;;  %vm3102_vm0 = vcmask 1043456  }
 0x20f   : > { %v8472_v44 = vadd.f32 %v10038_v49, %v2690_v15  ;;  %v2759_v7 = vmax.f32 %v8459_v48, 0.0  ;;  %v2817_v26 = vsel %vm10076_vm11, %v2758_v34, 0.0  ;;  %vm10079_vm12 = vmmov %vm10074_vm1  ;;  %v2833_v15 = vld [vmem:[%s6714_s29] sm:$0x1] }
 0x210   : > { %v2812_v60 = vadd.f32 %v2811_v19, %v2810_v0  ;;  %v2760_v24 = vmax.f32 %v8465_v17, 0.0  ;;  %vm10081_vm11 = vmmov %vm10074_vm1  ;;  %v10082_v19 = vmov 0.0   ;;  %v2908_v0 = vld [vmem:[%s10077_s3] sm:$0x3]  ;;  %s10231_s3 = sld [smem:[#allocation20_spill]] }
 0x211   : > { %v2761_v50 = vmax.f32 %v8472_v44, 0.0  ;;  %v2819_v56 = vsel %vm10074_vm1, %v2759_v7, 0.0  ;;  %vm10083_vm1 = vmmov 0  }
 0x212   : > { %v2814_v9 = vadd.f32 %v2813_v3, %v2812_v60  ;;  %v2821_v49 = vsel %vm10078_vm5, %v2760_v24, 0.0  ;;  %vm9780_vm5 = vcmask 1041408  }
 0x213   : > { %v2823_v35 = vsel %vm10079_vm12, %v2761_v50, 0.0  ;;  %vm9779_vm12 = vcmask 15360  }
 0x214   : > { %v2816_v25 = vadd.f32 %v2815_v39, %v2814_v9 }
 0x216   : > { %v2818_v63 = vadd.f32 %v2817_v26, %v2816_v25  ;;  %v3046_v25 = vld [vmem:[%s10080_s14] sm:$0xf] }
 0x217   : > { %v3104_v26 = vsel %vm3102_vm0, %v3046_v25, 0 }
 0x218   : > { %v2820_v38 = vadd.f32 %v2819_v56, %v2818_v63  ;;  %v3315_v63 = vld [vmem:[%s6739_s24] sm:$0xf] }
 0x219   : > { %6281 = vmatprep.subr.msk.bf16.mxu0 %vm3102_vm0, %v3315_v63  ;;  %v3372_v56 = vsel %vm3102_vm0, %v3315_v63, 0 }
 0x21a   : > { %v2822_v6 = vadd.f32 %v2821_v49, %v2820_v38  ;;  %6160 = vmatpush3.bf16.msra.mxu0 %v3372_v56  ;;  %v2909_v38 = vld [vmem:[%s10084_s8] sm:$0x1]  ;;  %s10281_s8 = smov 64  }
 0x21c   : > { %v2824_v10 = vadd.f32 %v2823_v35, %v2822_v6 }
 0x21e   : > { %v2825_v22 = vrot.slane %v2824_v10, 4 }
 0x220   : > { %v2826_v33 = vadd.f32 %v2825_v22, %v2824_v10 }
 0x222   : > { %v2827_v57 = vrot.slane %v2826_v33, 2 }
 0x224   : > { %v2828_v45 = vadd.f32 %v2827_v57, %v2826_v33 }
 0x226   : > { %v2829_v51 = vrot.slane %v2828_v45, 1 }
 0x228   : > { %v2830_v46 = vadd.f32 %v2829_v51, %v2828_v45  ;;  %v10085_v45 = vld [vmem:[#allocation30_spill] sm:$0xff] }
 0x22a   : > { %v2831_v21 = vmul.f32 0.00390625, %v2830_v46  ;;  %v10086_v46 = vld [vmem:[#allocation57_spill] sm:$0xff] }
 0x22c   : > { %6118 = vmatmul.mubr.msk.f32.vlgmr.msra.gmra.mrb[0].mxu1 %vm10081_vm11, %v2831_v21  ;;  %v10087_v21 = vmax.f32 %v10086_v46, 0.0 }
 0x22d   : > { %6122 = vmatprep.mubr.msk.f32.mxu1 %vm10083_vm1, %v10082_v19  ;;  %6121 = vmatpush3.msk.msra.mxu1 %vm9780_vm5, %v2908_v0 }
 0x22e   : > { %6280 = vmatprep.subr.msk.bf16.mxu1 %vm3102_vm0, %v3046_v25  ;;  %vm10098_vm0 = vmmov %vm10081_vm11 }
 0x22f   : > { %vm10099_vm11 = vmmov %vm10098_vm0 }
 0x230   : > { %vm10109_vm5 = vmmov %vm10098_vm0 }
 0x2ff   : > { %v2903_v3 = vpop.f32.mrb[0].mxu1 }
 0x300   : > { %v2904_v60 = vadd.f32 %v2903_v3, %v2833_v15  ;;  %v6119_v39 = vpop.f32.mrb[1].mxu1  ;;  %v10088_v15 = vld [vmem:[#allocation54_spill] sm:$0xff] }
 0x301   : > { %v10089_v3 = vmax.f32 %v10088_v15, 0.0  ;;  %v10090_v39 = vld [vmem:[#allocation66_spill] sm:$0xff] }
 0x302   : > { %v2907_v9 = vmax.f32 %v2904_v60, 0.0 }
 0x304   : > { %6123 = vmatmul.mubr.msk.f32.vlgmr.msra.gmra.mrb[2].mxu1 %vm9779_vm12, %v2907_v9  ;;  %v10091_v9 = vmax.f32 %v10090_v39, 0.0  ;;  %vm10100_vm12 = vmmov %vm10098_vm0  ;;  %v10103_v39 = vld [vmem:[#allocation39_spill] sm:$0xff] }
 0x305   : > { %6126 = vmatpush3.bf16.msra.mxu1 %v3104_v26  ;;  %v10092_v26 = vld [vmem:[#allocation67_spill] sm:$0xff] }
 0x306   : > { %v10093_v63 = vmax.f32 %v10092_v26, 0.0 }
 0x3d7   : > { %v2984_v49 = vpop.f32.mrb[2].mxu1 }
 0x3d8   : > { %v2985_v6 = vadd.f32 %v2984_v49, %v2909_v38  ;;  %v6124_v35 = vpop.f32.mrb[3].mxu1  ;;  %v10094_v38 = vld [vmem:[#allocation68_spill] sm:$0xff] }
 0x3d9   : > { %v10095_v49 = vmax.f32 %v10094_v38, 0.0  ;;  %v10096_v35 = vld [vmem:[#allocation69_spill] sm:$0xff] }
 0x3da   : > { %v5910_v10 = vmul.f32 -1.442695, %v2985_v6 }
 0x3dc   : > { %6533 = vpow2.f32 %v5910_v10  ;;  %v10097_v10 = vmax.f32 %v10096_v35, 0.0  ;;  %v10107_v35 = vld [vmem:[#allocation41_spill] sm:$0xff] }
 0x3e6   : > { %v6534_v22 = vpop.eup %6533 }
 0x3e7   : > { %v2991_v33 = vadd.f32 1.0, %v6534_v22 }
 0x3e9   : > { %6535 = vrcp.f32 %v2991_v33 }
 0x3f3   : > { %v6536_v57 = vpop.eup %6535 }
 0x3f4   : > { %v2997_v51 = vrot.slane %v6536_v57, %v10085_v45 }
 0x3f6   : > { %v2998_v0 = vmul.f32 %v2997_v51, %v10087_v21  ;;  %v2999_v60 = vmul.f32 %v2997_v51, %v10089_v3  ;;  %v3000_v25 = vmul.f32 %v2997_v51, %v10091_v9  ;;  %v3001_v56 = vmul.f32 %v2997_v51, %v10093_v63  ;;  %v10101_v21 = vld [vmem:[#allocation70_spill] sm:$0xff]  ;;  %v10105_v63 = vld [vmem:[#allocation71_spill] sm:$0xff] }
 0x3f7   : > { %v3002_v6 = vmul.f32 %v2997_v51, %v10095_v49  ;;  %v3003_v22 = vmul.f32 %v2997_v51, %v10097_v10  ;;  %v10102_v15 = vmax.f32 %v10101_v21, 0.0  ;;  %v10104_v9 = vmax.f32 %v10103_v39, 0.0  ;;  %v10114_v21 = vld [vmem:[#allocation73_spill] sm:$0xff] }
 0x3f8   : > { %v3030_v33 = vpack.c.bf16 %v2999_v60, %v2998_v0  ;;  %v3031_v57 = vpack.c.bf16 %v3001_v56, %v3000_v25  ;;  %v10106_v38 = vmax.f32 %v10105_v63, 0.0  ;;  %v10108_v10 = vmax.f32 %v10107_v35, 0.0  ;;  %v10110_v56 = vld [vmem:[#allocation43_spill] sm:$0xff] }
 0x3f9   : > { %v3032_v46 = vpack.c.bf16 %v3003_v22, %v3002_v6  ;;  %v3004_v3 = vmul.f32 %v2997_v51, %v10102_v15  ;;  %v3005_v26 = vmul.f32 %v2997_v51, %v10104_v9  ;;  %v10111_v6 = vmax.f32 %v10110_v56, 0.0  ;;  %v10116_v9 = vld [vmem:[#allocation45_spill] sm:$0xff] }
 0x3fa   : > { %6127 = vmatprep.mubr.msk.bf16.mxu1 %vm10098_vm0, %v3030_v33  ;;  %v3006_v49 = vmul.f32 %v2997_v51, %v10106_v38  ;;  %v3007_v0 = vmul.f32 %v2997_v51, %v10108_v10  ;;  %v10112_v33 = vld [vmem:[#allocation72_spill] sm:$0xff]  ;;  %v10115_v15 = vmax.f32 %v10114_v21, 0.0  ;;  %v10117_v63 = vmax.f32 %v10116_v9, 0.0 }
 0x3fb   : > { %6128 = vmatmul.mubr.msk.bf16.vlgmr.msra.gmra.mrb[4].mxu1 %vm10099_vm11, %v3031_v57  ;;  %v3033_v60 = vpack.c.bf16 %v3005_v26, %v3004_v3  ;;  %v3008_v22 = vmul.f32 %v2997_v51, %v10111_v6  ;;  %v10113_v57 = vmax.f32 %v10112_v33, 0.0  ;;  %vm10119_vm11 = vmmov %vm10098_vm0  ;;  %v10120_v3 = vld [vmem:[#allocation55_spill] sm:$0xff]  ;;  %v10124_v56 = vmax.f32 %v10051_v1, 0.0 }
 0x3fc   : > { %6131 = vmatprep.mubr.msk.bf16.mxu1 %vm10100_vm12, %v3032_v46  ;;  %v3034_v25 = vpack.c.bf16 %v3007_v0, %v3006_v49  ;;  %v3010_v39 = vmul.f32 %v2997_v51, %v10115_v15  ;;  %v3011_v38 = vmul.f32 %v2997_v51, %v10117_v63  ;;  %vm10118_vm12 = vmmov %vm10098_vm0  ;;  %v10121_v26 = vmax.f32 %v10120_v3, 0.0  ;;  %v10122_v0 = vld [vmem:[#allocation58_spill] sm:$0xff] }
 0x3fd   : > { %v3009_v46 = vmul.f32 %v2997_v51, %v10113_v57  ;;  %v3014_v6 = vmul.f32 %v2997_v51, %v10124_v56  ;;  %v10125_v33 = vmax.f32 %v10054_v53, 0.0  ;;  %v3019_v1 = vmul.f32 %v2997_v51, %v2751_v4 }
 0x3fe   : > { %v3036_v10 = vpack.c.bf16 %v3011_v38, %v3010_v39  ;;  %v3012_v49 = vmul.f32 %v2997_v51, %v10121_v26  ;;  %v3018_v39 = vmul.f32 %v2997_v51, %v2750_v12  ;;  %v3020_v63 = vmul.f32 %v2997_v51, %v2752_v28  ;;  %v6547_v38 = vld [vmem:[#allocation2 + $0x20] sm:$0xff] }
 0x3ff   : > { %v3035_v35 = vpack.c.bf16 %v3009_v46, %v3008_v22  ;;  %v3015_v57 = vmul.f32 %v2997_v51, %v10125_v33  ;;  %v3016_v22 = vmul.f32 %v2997_v51, %v2748_v55  ;;  %v3017_v46 = vmul.f32 %v2997_v51, %v2749_v58 }
 0x400   : > { %v3040_v9 = vpack.c.bf16 %v3019_v1, %v3018_v39  ;;  %v3021_v29 = vmul.f32 %v2997_v51, %v2753_v8  ;;  %v3022_v42 = vmul.f32 %v2997_v51, %v2754_v31  ;;  %v3023_v55 = vmul.f32 %v2997_v51, %v2755_v61  ;;  %v6551_v1 = vld [vmem:[#allocation2 + $0x40] sm:$0xff] }
 0x401   : > { %v3038_v15 = vpack.c.bf16 %v3015_v57, %v3014_v6  ;;  %v3039_v53 = vpack.c.bf16 %v3017_v46, %v3016_v22  ;;  %v3024_v58 = vmul.f32 %v2997_v51, %v2756_v14  ;;  %v3025_v52 = vmul.f32 %v2997_v51, %v2757_v36  ;;  %v6548_v57 = vld [vmem:[#allocation2 + $0x48] sm:$0xff]  ;;  %v6550_v46 = vld [vmem:[#allocation2 + $0x38] sm:$0xff] }
 0x402   : > { %v3041_v54 = vpack.c.bf16 %v3021_v29, %v3020_v63  ;;  %v3042_v59 = vpack.c.bf16 %v3023_v55, %v3022_v42  ;;  %v3026_v37 = vmul.f32 %v2997_v51, %v2758_v34  ;;  %v3027_v12 = vmul.f32 %v2997_v51, %v2759_v7  ;;  %v6544_v34 = vld [vmem:[#allocation2 + $0x28] sm:$0xff]  ;;  %v6545_v7 = vld [vmem:[#allocation2 + $0x30] sm:$0xff] }
 0x403   : > { %6132 = vmatmul.mubr.msk.bf16.gmra.mrb[8].mxu1 %vm10098_vm0, %v3033_v60  ;;  %v10123_v60 = vmax.f32 %v10122_v0, 0.0  ;;  %v3043_v4 = vpack.c.bf16 %v3025_v52, %v3024_v58  ;;  %v3028_v5 = vmul.f32 %v2997_v51, %v2760_v24  ;;  %v3029_v18 = vmul.f32 %v2997_v51, %v2761_v50  ;;  %v6546_v50 = vld [vmem:[#allocation2 + $0x18] sm:$0xff] }
 0x404   : > { %6135 = vmatprep.mubr.msk.bf16.mxu1 %vm10109_vm5, %v3034_v25  ;;  %vm10126_vm5 = vmmov %vm10098_vm0  ;;  %v3044_v28 = vpack.c.bf16 %v3027_v12, %v3026_v37  ;;  %v6552_v12 = vld [vmem:[#allocation2 + $0x68] sm:$0xff] }
 0x405   : > { %v3013_v25 = vmul.f32 %v2997_v51, %v10123_v60  ;;  %v3045_v8 = vpack.c.bf16 %v3029_v18, %v3028_v5  ;;  %v6554_v18 = vld [vmem:[#allocation2 + $0x58] sm:$0xff] }
 0x407   : > { %v3037_v21 = vpack.c.bf16 %v3013_v25, %v3012_v49 }
 0x40b   : > { %6136 = vmatmul.mubr.msk.bf16.gmra.mrb[12].mxu1 %vm10118_vm12, %v3035_v35  ;;  %vm10127_vm12 = vmmov %vm10098_vm0 }
 0x40c   : > { %6139 = vmatprep.mubr.msk.bf16.mxu1 %vm10119_vm11, %v3036_v10  ;;  %vm10128_vm11 = vmmov %vm10098_vm0 }
 0x413   : > { %6140 = vmatmul.mubr.msk.bf16.gmra.mrb[16].mxu1 %vm10126_vm5, %v3037_v21  ;;  %vm10129_vm5 = vmmov %vm10098_vm0 }
 0x414   : > { %6143 = vmatprep.mubr.msk.bf16.mxu1 %vm10098_vm0, %v3038_v15  ;;  %v6549_v15 = vld [vmem:[#allocation2 + $0x50] sm:$0xff] }
 0x41b   : > { %6144 = vmatmul.mubr.msk.bf16.gmra.mrb[20].mxu1 %vm10127_vm12, %v3039_v53  ;;  %vm10130_vm12 = vmmov %vm10098_vm0 }
 0x41c   : > { %6147 = vmatprep.mubr.msk.bf16.mxu1 %vm10128_vm11, %v3040_v9  ;;  %vm10131_vm11 = vmmov %vm10098_vm0 }
 0x423   : > { %6148 = vmatmul.mubr.msk.bf16.gmra.mrb[24].mxu1 %vm10129_vm5, %v3041_v54  ;;  %vm10132_vm5 = vmmov %vm10098_vm0 }
 0x424   : > { %6151 = vmatprep.mubr.msk.bf16.mxu1 %vm10098_vm0, %v3042_v59 }
 0x42b   : > { %6152 = vmatmul.mubr.msk.bf16.gmra.mrb[28].mxu1 %vm10130_vm12, %v3043_v4  ;;  %vm10133_vm12 = vmmov %vm10098_vm0 }
 0x42c   : > { %6155 = vmatprep.mubr.msk.bf16.mxu1 %vm10131_vm11, %v3044_v28  ;;  %vm10134_vm11 = vmmov %vm10098_vm0  ;;  %v6553_v28 = vld [vmem:[#allocation2 + $0x70] sm:$0xff] }
 0x433   : > { %6156 = vmatmul.mubr.msk.bf16.gmra.mrb[32].mxu1 %vm10132_vm5, %v3045_v8  ;;  %vm10135_vm5 = vmmov %vm10098_vm0 }
 0x434   : > { %6201 = vmatprep.mubr.msk.f32.mxu1 %vm10083_vm1, %v10082_v19 }
 0x4ce   : > { %v6129_v2 = vpop.f32.mrb[4].mxu1 }
 0x4cf   : > { %v3149_v31 = vadd.f32 %v6129_v2, %v8583_v11  ;;  %v3140_v61 = vpop.f32.mrb[5].mxu1  ;;  %v6555_v2 = vld [vmem:[#allocation2 + $0x60] sm:$0xff] }
 0x4d0   : > { %v3141_v14 = vadd.f32 %v8583_v11, %v3140_v61  ;;  %v6130_v43 = vpop.f32.mrb[6].mxu1 }
 0x4d1   : > { %v3152_v36 = vadd.f32 %v6130_v43, %v8583_v11  ;;  %v3143_v48 = vpop.f32.mrb[7].mxu1  ;;  %v3269_v44 = vadd.f32 %v6544_v34, %v3149_v31 }
 0x4d2   : > { %v3144_v17 = vadd.f32 %v8583_v11, %v3143_v48  ;;  %v3267_v51 = vadd.f32 %v6546_v50, %v3141_v14  ;;  %v6556_v50 = vld [vmem:[#allocation2 + $0x88] sm:$0xff] }
 0x4d3   : > { %v3270_v24 = vadd.f32 %v6545_v7, %v3152_v36 }
 0x4d4   : > { %v3268_v35 = vadd.f32 %v6547_v38, %v3144_v17  ;;  %v6557_v38 = vld [vmem:[#allocation2 + $0x90] sm:$0xff] }
 0x4d5   : > { %v3300_v10 = vpack.c.bf16 %v3270_v24, %v3269_v44 }
 0x4d6   : > { %v3299_v3 = vpack.c.bf16 %v3268_v35, %v3267_v51  ;;  %v6133_v26 = vpop.f32.mrb[8].mxu1 }
 0x4d7   : > { %v3165_v49 = vadd.f32 %v6133_v26, %v8583_v11  ;;  %v3156_v0 = vpop.f32.mrb[9].mxu1  ;;  %v6559_v26 = vld [vmem:[#allocation2 + $0x80] sm:$0xff] }
 0x4d8   : > { %v3157_v60 = vadd.f32 %v8583_v11, %v3156_v0  ;;  %v6134_v25 = vpop.f32.mrb[10].mxu1  ;;  %6161 = vmatprep.mubr.msk.bf16.mxu0 %vm10098_vm0, %v3299_v3 }
 0x4d9   : > { %v3168_v56 = vadd.f32 %v6134_v25, %v8583_v11  ;;  %v3159_v6 = vpop.f32.mrb[11].mxu1  ;;  %6162 = vmatmul.mubr.msk.bf16.vlgmr.msra.gmra.mrb[32].mxu0 %vm10133_vm12, %v3300_v10  ;;  %v3273_v21 = vadd.f32 %v6548_v57, %v3165_v49  ;;  %vm10136_vm12 = vmmov %vm10098_vm0  ;;  %v6558_v10 = vld [vmem:[#allocation2 + $0x78] sm:$0xff] }
 0x4da   : > { %v3160_v33 = vadd.f32 %v8583_v11, %v3159_v6  ;;  %v3271_v39 = vadd.f32 %v6550_v46, %v3157_v60  ;;  %v6560_v46 = vld [vmem:[#allocation2 + $0xa8] sm:$0xff] }
 0x4db   : > { %v3274_v22 = vadd.f32 %v6549_v15, %v3168_v56 }
 0x4dc   : > { %v3272_v53 = vadd.f32 %v6551_v1, %v3160_v33  ;;  %v6561_v1 = vld [vmem:[#allocation2 + $0xb0] sm:$0xff] }
 0x4dd   : > { %v3302_v9 = vpack.c.bf16 %v3274_v22, %v3273_v21 }
 0x4de   : > { %v3301_v63 = vpack.c.bf16 %v3272_v53, %v3271_v39  ;;  %v6137_v29 = vpop.f32.mrb[12].mxu1 }
 0x4df   : > { %v3181_v42 = vadd.f32 %v6137_v29, %v8583_v11  ;;  %v3172_v55 = vpop.f32.mrb[13].mxu1  ;;  %v6563_v29 = vld [vmem:[#allocation2 + $0xa0] sm:$0xff] }
 0x4e0   : > { %v3173_v54 = vadd.f32 %v8583_v11, %v3172_v55  ;;  %v6138_v59 = vpop.f32.mrb[14].mxu1  ;;  %6165 = vmatprep.mubr.msk.bf16.mxu0 %vm10134_vm11, %v3301_v63  ;;  %vm10137_vm11 = vmmov %vm10098_vm0 }
 0x4e1   : > { %v3184_v58 = vadd.f32 %v6138_v59, %v8583_v11  ;;  %v3175_v52 = vpop.f32.mrb[15].mxu1  ;;  %6166 = vmatmul.mubr.msk.bf16.gmra.mrb[36].mxu0 %vm10135_vm5, %v3302_v9  ;;  %v3277_v4 = vadd.f32 %v6552_v12, %v3181_v42  ;;  %vm10138_vm5 = vmmov %vm10098_vm0  ;;  %v6562_v9 = vld [vmem:[#allocation2 + $0x98] sm:$0xff] }
 0x4e2   : > { %v3176_v37 = vadd.f32 %v8583_v11, %v3175_v52  ;;  %v3275_v8 = vadd.f32 %v6554_v18, %v3173_v54  ;;  %v6564_v18 = vld [vmem:[#allocation2 + $0xc8] sm:$0xff] }
 0x4e3   : > { %v3278_v5 = vadd.f32 %v6553_v28, %v3184_v58 }
 0x4e4   : > { %v3276_v31 = vadd.f32 %v6555_v2, %v3176_v37  ;;  %v6565_v2 = vld [vmem:[#allocation2 + $0xd0] sm:$0xff] }
 0x4e5   : > { %v3304_v61 = vpack.c.bf16 %v3278_v5, %v3277_v4 }
 0x4e6   : > { %v3303_v14 = vpack.c.bf16 %v3276_v31, %v3275_v8  ;;  %v6141_v43 = vpop.f32.mrb[16].mxu1 }
 0x4e7   : > { %v3197_v36 = vadd.f32 %v6141_v43, %v8583_v11  ;;  %v3188_v48 = vpop.f32.mrb[17].mxu1  ;;  %v6567_v43 = vld [vmem:[#allocation2 + $0xc0] sm:$0xff] }
 0x4e8   : > { %v3189_v17 = vadd.f32 %v8583_v11, %v3188_v48  ;;  %v6142_v34 = vpop.f32.mrb[18].mxu1  ;;  %6169 = vmatprep.mubr.msk.bf16.mxu0 %vm10098_vm0, %v3303_v14 }
 0x4e9   : > { %v3200_v44 = vadd.f32 %v6142_v34, %v8583_v11  ;;  %v3191_v7 = vpop.f32.mrb[19].mxu1  ;;  %6170 = vmatmul.mubr.msk.bf16.gmra.mrb[40].mxu0 %vm10136_vm12, %v3304_v61  ;;  %v3281_v51 = vadd.f32 %v6556_v50, %v3197_v36  ;;  %vm10139_vm12 = vmmov %vm10098_vm0  ;;  %v6566_v61 = vld [vmem:[#allocation2 + $0xb8] sm:$0xff] }
 0x4ea   : > { %v3192_v24 = vadd.f32 %v8583_v11, %v3191_v7  ;;  %v3279_v3 = vadd.f32 %v6558_v10, %v3189_v17 }
 0x4eb   : > { %v3282_v35 = vadd.f32 %v6557_v38, %v3200_v44 }
 0x4ec   : > { %v3280_v49 = vadd.f32 %v6559_v26, %v3192_v24 }
 0x4ed   : > { %v3306_v0 = vpack.c.bf16 %v3282_v35, %v3281_v51 }
 0x4ee   : > { %v3305_v60 = vpack.c.bf16 %v3280_v49, %v3279_v3  ;;  %v6145_v25 = vpop.f32.mrb[20].mxu1 }
 0x4ef   : > { %v3213_v56 = vadd.f32 %v6145_v25, %v8583_v11  ;;  %v3204_v6 = vpop.f32.mrb[21].mxu1 }
 0x4f0   : > { %v3205_v33 = vadd.f32 %v8583_v11, %v3204_v6  ;;  %v6146_v57 = vpop.f32.mrb[22].mxu1  ;;  %6173 = vmatprep.mubr.msk.bf16.mxu0 %vm10137_vm11, %v3305_v60  ;;  %vm10140_vm11 = vmmov %vm10098_vm0 }
 0x4f1   : > { %v3216_v21 = vadd.f32 %v6146_v57, %v8583_v11  ;;  %v3207_v15 = vpop.f32.mrb[23].mxu1  ;;  %6174 = vmatmul.mubr.msk.bf16.gmra.mrb[44].mxu0 %vm10138_vm5, %v3306_v0  ;;  %v3285_v39 = vadd.f32 %v6560_v46, %v3213_v56  ;;  %vm10141_vm5 = vmmov %vm10098_vm0  ;;  %v10144_v46 = vld [vmem:[#allocation89_spill] sm:$0xff] }
 0x4f2   : > { %v3208_v22 = vadd.f32 %v8583_v11, %v3207_v15  ;;  %v3283_v63 = vadd.f32 %v6562_v9, %v3205_v33  ;;  %v10143_v15 = vld [vmem:[#allocation65_spill] sm:$0xff]  ;;  %v8642_v9 = vld [vmem:[%s6744_s30] ss:$0 sm:$0xff] }
 0x4f3   : > { %v3286_v53 = vadd.f32 %v6561_v1, %v3216_v21 }
 0x4f4   : > { %v3284_v42 = vadd.f32 %v6563_v29, %v3208_v22 }
 0x4f5   : > { %v3308_v55 = vpack.c.bf16 %v3286_v53, %v3285_v39 }
 0x4f6   : > { %v3307_v54 = vpack.c.bf16 %v3284_v42, %v3283_v63  ;;  %v6149_v59 = vpop.f32.mrb[24].mxu1 }
 0x4f7   : > { %v3229_v58 = vadd.f32 %v6149_v59, %v8583_v11  ;;  %v3220_v52 = vpop.f32.mrb[25].mxu1 }
 0x4f8   : > { %v3221_v37 = vadd.f32 %v8583_v11, %v3220_v52  ;;  %v6150_v12 = vpop.f32.mrb[26].mxu1  ;;  %6177 = vmatprep.mubr.msk.bf16.mxu0 %vm10098_vm0, %v3307_v54  ;;  %v3599_v52 = vld [vmem:[%s9824_s6] sm:$0xff] }
 0x4f9   : > { %v3232_v4 = vadd.f32 %v6150_v12, %v8583_v11  ;;  %v3223_v28 = vpop.f32.mrb[27].mxu1  ;;  %6178 = vmatmul.mubr.msk.bf16.gmra.mrb[48].mxu0 %vm10139_vm12, %v3308_v55  ;;  %v3289_v8 = vadd.f32 %v6564_v18, %v3229_v58  ;;  %vm10142_vm12 = vmmov %vm10098_vm0  ;;  %v8657_v18 = vrot.slane %v3599_v52, %v10085_v45 }
 0x4fa   : > { %v3224_v5 = vadd.f32 %v8583_v11, %v3223_v28  ;;  %v3287_v14 = vadd.f32 %v6566_v61, %v3221_v37  ;;  %v3601_v61 = vld [vmem:[#allocation3 + $0x7] sm:$0xff] }
 0x4fb   : > { %v3290_v31 = vadd.f32 %v6565_v2, %v3232_v4  ;;  %v10150_v4 = vld [vmem:[#allocation29_spill] sm:$0xff] }
 0x4fc   : > { %v3288_v36 = vadd.f32 %v6567_v43, %v3224_v5  ;;  %v10151_v28 = vsub.s32 1, %v10150_v4  ;;  %v10153_v2 = vsub.s32 4, %v10150_v4 }
 0x4fd   : > { %v3310_v48 = vpack.c.bf16 %v3290_v31, %v3289_v8 }
 0x4fe   : > { %v3309_v17 = vpack.c.bf16 %v3288_v36, %v3287_v14  ;;  %v6153_v34 = vpop.f32.mrb[28].mxu1  ;;  %v8654_v5 = vrot.slane %v3599_v52, %v10151_v28  ;;  %v8662_v31 = vrot.slane %v3599_v52, %v10153_v2  ;;  %v3809_v14 = vld [vmem:[#allocation3 + $0x8] sm:$0xff] }
 0x4ff   : > { %v3245_v44 = vadd.f32 %v6153_v34, %v8583_v11  ;;  %v3236_v7 = vpop.f32.mrb[29].mxu1  ;;  %v10155_v34 = vsub.s32 6, %v10150_v4 }
 0x500   : > { %v3237_v24 = vadd.f32 %v8583_v11, %v3236_v7  ;;  %v6154_v50 = vpop.f32.mrb[30].mxu1  ;;  %6181 = vmatprep.mubr.msk.bf16.mxu0 %vm10140_vm11, %v3309_v17  ;;  %vm10145_vm11 = vmmov %vm10098_vm0  ;;  %v3602_v7 = vld [vmem:[#allocation3 + $0xf] sm:$0xff] }
 0x501   : > { %v3248_v51 = vadd.f32 %v6154_v50, %v8583_v11  ;;  %v3239_v38 = vpop.f32.mrb[31].mxu1  ;;  %6182 = vmatmul.mubr.msk.bf16.gmra.mrb[52].mxu0 %vm10141_vm5, %v3310_v48  ;;  %v3293_v10 = vadd.f32 %v3245_v44, %v8016_v27  ;;  %vm10146_vm5 = vmmov %vm10098_vm0  ;;  %v10154_v48 = vsub.s32 3, %v10150_v4  ;;  %v8671_v44 = vrot.slane %v3599_v52, %v10155_v34 }
 0x502   : > { %v3240_v35 = vadd.f32 %v8583_v11, %v3239_v38  ;;  %v3291_v26 = vadd.f32 %v3237_v24, %v8005_v47  ;;  %v3810_v24 = vld [vmem:[#allocation3 + $0x10] sm:$0xff]  ;;  %v10156_v38 = vsub.s32 7, %v10150_v4 }
 0x503   : > { %v3294_v3 = vadd.f32 %v3248_v51, %v8149_v20  ;;  %v8667_v17 = vrot.slane %v3599_v52, %v10154_v48 }
 0x504   : > { %v3292_v49 = vadd.f32 %v3240_v35, %v8050_v62  ;;  %v8676_v35 = vrot.slane %v3599_v52, %v10156_v38 }
 0x505   : > { %v3312_v0 = vpack.c.bf16 %v3294_v3, %v3293_v10  ;;  %v10157_v10 = vsub.s32 2, %v10150_v4 }
 0x506   : > { %v3311_v60 = vpack.c.bf16 %v3292_v49, %v3291_v26  ;;  %v6157_v25 = vpop.f32.mrb[32].mxu1  ;;  %v4017_v26 = vld [vmem:[#allocation3 + $0x9] sm:$0xff] }
 0x507   : > { %v3261_v56 = vadd.f32 %v6157_v25, %v8583_v11  ;;  %v3252_v6 = vpop.f32.mrb[33].mxu1  ;;  %v8680_v3 = vrot.slane %v3599_v52, %v10157_v10  ;;  %v10158_v25 = vsub.s32 5, %v10150_v4 }
 0x508   : > { %v3253_v33 = vadd.f32 %v8583_v11, %v3252_v6  ;;  %v6158_v57 = vpop.f32.mrb[34].mxu1  ;;  %6185 = vmatprep.mubr.msk.bf16.mxu0 %vm10098_vm0, %v3311_v60  ;;  %vm10147_vm0 = vcmask 261120  }
 0x509   : > { %v3264_v27 = vadd.f32 %v6158_v57, %v8583_v11  ;;  %v3255_v21 = vpop.f32.mrb[35].mxu1  ;;  %6186 = vmatmul.mubr.msk.bf16.gmra.mrb[56].mxu0 %vm10142_vm12, %v3312_v0  ;;  %v3297_v47 = vadd.f32 %v3261_v56, %v8167_v13  ;;  %vm10148_vm12 = vmmov %vm10147_vm0  ;;  %v8685_v56 = vrot.slane %v3599_v52, %v10158_v25  ;;  %v3845_v57 = vmul.f32 %v8654_v5, %v3809_v14  ;;  %v8713_v14 = vld [vmem:[%s9824_s6 + $0x8] ss:$0 sm:$0xff] }
 0x50a   : > { %v3256_v20 = vadd.f32 %v8583_v11, %v3255_v21  ;;  %v3295_v22 = vadd.f32 %v3253_v33, %v10143_v15  ;;  %v3637_v33 = vmul.f32 %v8657_v18, %v3601_v61  ;;  %v3846_v15 = vmul.f32 %v8654_v5, %v3810_v24  ;;  %vm10172_vm1 = vmmov %vm10147_vm0 }
 0x50b   : > { %v3298_v62 = vadd.f32 %v3264_v27, %v8169_v41 }
 0x50c   : > { %v3296_v39 = vadd.f32 %v3256_v20, %v10144_v46 }
 0x50d   : > { %v3314_v1 = vpack.c.bf16 %v3298_v62, %v3297_v47  ;;  %v3638_v62 = vmul.f32 %v8657_v18, %v3602_v7 }
 0x50e   : > { %v3313_v53 = vpack.c.bf16 %v3296_v39, %v3295_v22 }
 0x510   : > { %6189 = vmatprep.mubr.msk.bf16.mxu0 %vm10145_vm11, %v3313_v53  ;;  %vm10149_vm11 = vmmov %vm10147_vm0 }
 0x511   : > { %6190 = vmatmul.mubr.msk.bf16.gmra.mrb[60].mxu0 %vm10146_vm5, %v3314_v1  ;;  %vm10152_vm5 = vmmov %vm10147_vm0 }
 0x5ac   : > { %v6163_v63 = vpop.f32.mrb[32].mxu0 }
 0x5ad   : > { %v3417_v11 = vadd.f32 %v6163_v63, %v8642_v9  ;;  %v3408_v29 = vpop.f32.mrb[33].mxu0  ;;  %v4053_v63 = vmul.f32 %v8680_v3, %v4017_v26 }
 0x5ae   : > { %v3409_v13 = vadd.f32 %v8642_v9, %v3408_v29  ;;  %v6164_v41 = vpop.f32.mrb[34].mxu0 }
 0x5af   : > { %v3537_v42 = vmax.f32 %v3417_v11, 0.0  ;;  %v3420_v55 = vadd.f32 %v6164_v41, %v8642_v9  ;;  %v3411_v54 = vpop.f32.mrb[35].mxu0 }
 0x5b0   : > { %v3535_v59 = vmax.f32 %v3409_v13, 0.0  ;;  %v3412_v58 = vadd.f32 %v8642_v9, %v3411_v54 }
 0x5b1   : > { %3569 = vst.msk [vmem:[#allocation3 + $0x28] sm:$0xff] %vm10147_vm0, %v3537_v42  ;;  %v3538_v37 = vmax.f32 %v3420_v55, 0.0 }
 0x5b2   : > { %3567 = vst.msk [vmem:[#allocation3 + $0x18] sm:$0xff] %vm10148_vm12, %v3535_v59  ;;  %v3536_v12 = vmax.f32 %v3412_v58, 0.0  ;;  %vm10159_vm12 = vmmov %vm10147_vm0 }
 0x5b3   : > { %3570 = vst.msk [vmem:[#allocation3 + $0x30] sm:$0xff] %vm10149_vm11, %v3538_v37  ;;  %vm10160_vm11 = vmmov %vm10147_vm0 }
 0x5b4   : > { %3568 = vst.msk [vmem:[#allocation3 + $0x20] sm:$0xff] %vm10152_vm5, %v3536_v12  ;;  %v6167_v8 = vpop.f32.mrb[36].mxu0  ;;  %vm10167_vm5 = vmmov %vm10147_vm0 }
 0x5b5   : > { %v3433_v43 = vadd.f32 %v6167_v8, %v8642_v9  ;;  %v3424_v36 = vpop.f32.mrb[37].mxu0 }
 0x5b6   : > { %v3425_v50 = vadd.f32 %v8642_v9, %v3424_v36  ;;  %v6168_v51 = vpop.f32.mrb[38].mxu0 }
 0x5b7   : > { %v3541_v49 = vmax.f32 %v3433_v43, 0.0  ;;  %v3436_v0 = vadd.f32 %v6168_v51, %v8642_v9  ;;  %v3427_v60 = vpop.f32.mrb[39].mxu0 }
 0x5b8   : > { %v3813_v6 = vld [vmem:[#allocation3 + $0x28] sm:$0xff]  ;;  %v3539_v27 = vmax.f32 %v3425_v50, 0.0  ;;  %v8700_v42 = vadd.f32 %v8642_v9, %v3427_v60 }
 0x5b9   : > { %v3603_v21 = vld [vmem:[#allocation3 + $0x17] sm:$0xff]  ;;  %3573 = vst.msk [vmem:[#allocation3 + $0x48] sm:$0xff] %vm10147_vm0, %v3541_v49  ;;  %v3542_v22 = vmax.f32 %v3436_v0, 0.0  ;;  %v3849_v11 = vmul.f32 %v8654_v5, %v3813_v6  ;;  %v3953_v29 = vmul.f32 %v8676_v35, %v3813_v6 }
 0x5ba   : > { %v3811_v20 = vld [vmem:[#allocation3 + $0x18] sm:$0xff]  ;;  %v3675_v46 = vmul.f32 %v8667_v17, %v3603_v21  ;;  %v3606_v1 = vld [vmem:[#allocation3 + $0x2f] sm:$0xff]  ;;  %3571 = vst.msk [vmem:[#allocation3 + $0x38] sm:$0xff] %vm10159_vm12, %v3539_v27  ;;  %vm10168_vm12 = vmmov %vm10147_vm0 }
 0x5bb   : > { %v4018_v47 = vld [vmem:[#allocation3 + $0x11] sm:$0xff]  ;;  %v3883_v39 = vmul.f32 %v8662_v31, %v3811_v20  ;;  %v4021_v13 = vld [vmem:[#allocation3 + $0x29] sm:$0xff]  ;;  %v3604_v41 = vld [vmem:[#allocation3 + $0x1f] sm:$0xff]  ;;  %3574 = vst.msk [vmem:[#allocation3 + $0x50] sm:$0xff] %vm10160_vm11, %v3542_v22  ;;  %v8704_v59 = vmul.f32 %v8657_v18, %v3606_v1  ;;  %v3746_v28 = vmul.f32 %v8671_v44, %v3606_v1 }
 0x5bc   : > { %v3814_v53 = vld [vmem:[#allocation3 + $0x30] sm:$0xff]  ;;  %v4054_v54 = vmul.f32 %v8680_v3, %v4018_v47  ;;  %v3605_v58 = vld [vmem:[#allocation3 + $0x27] sm:$0xff]  ;;  %v8706_v37 = vpop.f32.mrb[40].mxu0  ;;  %v3707_v12 = vadd.f32 %v3675_v46, %v3637_v33  ;;  %v4019_v2 = vld [vmem:[#allocation3 + $0x19] sm:$0xff]  ;;  %v8717_v36 = vmul.f32 %v8680_v3, %v4021_v13  ;;  %v3676_v34 = vmul.f32 %v8667_v17, %v3604_v41 }
 0x5bd   : > { %v3915_v55 = vadd.f32 %v3883_v39, %v3845_v57  ;;  %v3812_v52 = vld [vmem:[#allocation3 + $0x20] sm:$0xff]  ;;  %v8710_v8 = vmul.f32 %v8654_v5, %v3814_v53  ;;  %v3440_v61 = vpop.f32.mrb[41].mxu0  ;;  %v3954_v43 = vmul.f32 %v8676_v35, %v3814_v53  ;;  %v3745_v7 = vmul.f32 %v8671_v44, %v3605_v58  ;;  %vm10169_vm11 = vmmov %vm10147_vm0 }
 0x5be   : > { %v6172_v48 = vpop.f32.mrb[42].mxu0  ;;  %v4020_v24 = vld [vmem:[#allocation3 + $0x21] sm:$0xff]  ;;  %v3884_v38 = vmul.f32 %v8662_v31, %v3812_v52  ;;  %v4161_v10 = vmul.f32 %v8713_v14, %v4021_v13  ;;  %v3641_v26 = vmul.f32 %v8657_v18, %v3605_v58  ;;  %v3708_v49 = vadd.f32 %v3676_v34, %v3638_v62  ;;  %v8734_v52 = vld [vmem:[%s10162_s23] ss:$0 sm:$0xff] }
 0x5bf   : > { %v3443_v50 = vpop.f32.mrb[43].mxu0  ;;  %v3985_v51 = vadd.f32 %v3953_v29, %v3915_v55  ;;  %v3777_v0 = vadd.f32 %v3745_v7, %v3707_v12  ;;  %v4091_v25 = vmul.f32 %v8685_v56, %v4019_v2  ;;  %v4092_v57 = vmul.f32 %v8685_v56, %v4020_v24 }
 0x5c0   : > { %v3916_v60 = vadd.f32 %v3884_v38, %v3846_v15  ;;  %v3817_v6 = vld [vmem:[#allocation3 + $0x48] sm:$0xff]  ;;  %v3778_v47 = vadd.f32 %v3746_v28, %v3708_v49 }
 0x5c1   : > { %v3607_v33 = vld [vmem:[#allocation3 + $0x37] sm:$0xff]  ;;  %v4225_v21 = vsel %vm7142_vm2, %v3777_v0, 0.0  ;;  %v4123_v22 = vadd.f32 %v4091_v25, %v4053_v63  ;;  %v8729_v62 = vmul.f32 %v8654_v5, %v3817_v6  ;;  %v4124_v58 = vadd.f32 %v4092_v57, %v4054_v54  ;;  %vm10164_vm2 = vmmov %vm10147_vm0 }
 0x5c2   : > { %v3815_v20 = vld [vmem:[#allocation3 + $0x38] sm:$0xff]  ;;  %v4257_v46 = vadd.f32 %v4225_v21, %v3985_v51  ;;  %v3986_v1 = vadd.f32 %v3954_v43, %v3916_v60  ;;  %v3679_v13 = vmul.f32 %v8667_v17, %v3607_v33  ;;  %v3957_v12 = vmul.f32 %v8676_v35, %v3817_v6  ;;  %v3610_v43 = vld [vmem:[#allocation3 + $0x4f] sm:$0xff] }
 0x5c3   : > { %v4022_v15 = vld [vmem:[#allocation3 + $0x31] sm:$0xff]  ;;  %v4193_v29 = vadd.f32 %v4161_v10, %v4123_v22  ;;  %v3887_v41 = vmul.f32 %v8662_v31, %v3815_v20  ;;  %v8747_v0 = vmul.f32 %v8657_v18, %v3610_v43  ;;  %v3540_v57 = vmax.f32 %v8700_v42, 0.0 }
 0x5c4   : > { %v6175_v39 = vpop.f32.mrb[44].mxu0  ;;  %v4258_v34 = vadd.f32 %v3986_v1, %v3778_v47  ;;  %v4162_v7 = vmul.f32 %v8713_v14, %v4022_v15  ;;  %v8739_v51 = vadd.f32 %v3679_v13, %v3641_v26  ;;  %v8742_v38 = vmul.f32 %v8680_v3, %v4022_v15  ;;  %v3818_v10 = vld [vmem:[#allocation3 + $0x50] sm:$0xff] }
 0x5c5   : > { %v3456_v53 = vpop.f32.mrb[45].mxu0  ;;  %v4321_v28 = vadd.f32 %v4257_v46, %v4193_v29  ;;  %v3919_v2 = vadd.f32 %v3887_v41, %v3849_v11  ;;  %v8750_v11 = vmul.f32 %v8671_v44, %v3610_v43  ;;  %v8755_v26 = vmul.f32 %v8654_v5, %v3818_v10 }
 0x5c6   : > { %v6176_v55 = vpop.f32.mrb[46].mxu0  ;;  %v4194_v49 = vadd.f32 %v4162_v7, %v4124_v58  ;;  %v3449_v20 = vadd.f32 %v8706_v37, %v8642_v9  ;;  %v3441_v47 = vadd.f32 %v8642_v9, %v3440_v61  ;;  %v3452_v22 = vadd.f32 %v6172_v48, %v8642_v9  ;;  %v4493_v61 = vld [vmem:[%s10165_s2] sm:$0xff] }
 0x5c7   : > { %v3459_v63 = vpop.f32.mrb[47].mxu0  ;;  %v4360_v24 = vadd.f32 %v8734_v52, %v4321_v28  ;;  %v8744_v54 = vadd.f32 %v3957_v12, %v3919_v2  ;;  %v3444_v1 = vadd.f32 %v8642_v9, %v3443_v50  ;;  %v3465_v42 = vadd.f32 %v6175_v39, %v8642_v9  ;;  %v4494_v28 = vld [vmem:[%s10165_s2 + $0x8] sm:$0xff]  ;;  %v4025_v50 = vld [vmem:[#allocation3 + $0x49] sm:$0xff] }
 0x5c8   : > { %v4290_v33 = vsel %vm7172_vm3, %v4194_v49, 0.0  ;;  %vm10166_vm3 = vmmov %vm10147_vm0  ;;  %v3457_v15 = vadd.f32 %v8642_v9, %v3456_v53  ;;  %v3468_v29 = vadd.f32 %v6176_v55, %v8642_v9  ;;  %v3545_v58 = vmax.f32 %v3449_v20, 0.0 }
 0x5c9   : > { %v4392_v60 = vmax.f32 %v4360_v24, 0.0  ;;  %v4322_v21 = vadd.f32 %v4290_v33, %v4258_v34  ;;  %3572 = vst.msk [vmem:[#allocation3 + $0x40] sm:$0xff] %vm10166_vm3, %v3540_v57  ;;  %v3543_v37 = vmax.f32 %v3441_v47, 0.0  ;;  %v3546_v12 = vmax.f32 %v3452_v22, 0.0  ;;  %vm10171_vm3 = vmmov %vm10147_vm0 }
 0x5ca   : > { %v3544_v48 = vmax.f32 %v3444_v1, 0.0  ;;  %v3549_v2 = vmax.f32 %v3465_v42, 0.0  ;;  %v3547_v43 = vmax.f32 %v3457_v15, 0.0  ;;  %v3550_v34 = vmax.f32 %v3468_v29, 0.0  ;;  %3577 = vst.msk [vmem:[#allocation3 + $0x68] sm:$0xff] %vm10167_vm5, %v3545_v58  ;;  %vm10173_vm5 = vmmov %vm10147_vm0 }
 0x5cb   : > { %4424 = vst.msk [vmem:[#allocation4] sm:$0xff] %vm10164_vm2, %v4392_v60  ;;  %v4361_v41 = vadd.f32 %v8734_v52, %v4322_v21  ;;  %v3460_v39 = vadd.f32 %v8642_v9, %v3459_v63  ;;  %vm10170_vm2 = vmmov %vm10147_vm0  ;;  %v6263_v60 = vpack.c.bf16 %v4494_v28, %v4493_v61  ;;  %v3958_v63 = vmul.f32 %v8676_v35, %v3818_v10 }
 0x5cc   : > { %v6179_v25 = vpop.f32.mrb[48].mxu0  ;;  %3575 = vst.msk [vmem:[#allocation3 + $0x58] sm:$0xff] %vm10147_vm0, %v3543_v37  ;;  %v8787_v21 = vmul.f32 %v8680_v3, %v4025_v50 }
 0x5cd   : > { %v3472_v27 = vpop.f32.mrb[49].mxu0  ;;  %v4393_v7 = vmax.f32 %v4361_v41, 0.0  ;;  %3578 = vst.msk [vmem:[#allocation3 + $0x70] sm:$0xff] %vm10168_vm12, %v3546_v12  ;;  %v3481_v53 = vadd.f32 %v6179_v25, %v8642_v9  ;;  %v3548_v25 = vmax.f32 %v3460_v39, 0.0  ;;  %vm10175_vm12 = vmmov %vm10147_vm0 }
 0x5ce   : > { %v6180_v46 = vpop.f32.mrb[50].mxu0  ;;  %v3473_v55 = vadd.f32 %v8642_v9, %v3472_v27  ;;  %3576 = vst.msk [vmem:[#allocation3 + $0x60] sm:$0xff] %vm10169_vm11, %v3544_v48  ;;  %v6666_v27 = vmov 0.0|0.0   ;;  %vm10176_vm11 = vmmov %vm10147_vm0 }
 0x5cf   : > { %v3475_v13 = vpop.f32.mrb[51].mxu0  ;;  %3581 = vst.msk [vmem:[#allocation3 + $0x88] sm:$0xff] %vm10170_vm2, %v3549_v2  ;;  %v3484_v24 = vadd.f32 %v6180_v46, %v8642_v9  ;;  %v3553_v6 = vmax.f32 %v3481_v53, 0.0  ;;  %6262 = vmatprep.subr.bf16.mxu1 %v6666_v27  ;;  %v4165_v46 = vmul.f32 %v8713_v14, %v4025_v50  ;;  %vm10177_vm2 = vmmov %vm10147_vm0 }
 0x5d0   : > { %3579 = vst.msk [vmem:[#allocation3 + $0x78] sm:$0xff] %vm10171_vm3, %v3547_v43  ;;  %v3476_v49 = vadd.f32 %v8642_v9, %v3475_v13  ;;  %v3551_v33 = vmax.f32 %v3473_v55, 0.0  ;;  %6264 = vmatpush3.bf16.msra.mxu1 %v6263_v60  ;;  %v3608_v1 = vld [vmem:[#allocation3 + $0x3f] sm:$0xff]  ;;  %v3609_v42 = vld [vmem:[#allocation3 + $0x47] sm:$0xff]  ;;  %vm10191_vm3 = vmmov %vm10147_vm0 }
 0x5d1   : > { %3582 = vst.msk [vmem:[#allocation3 + $0x90] sm:$0xff] %vm10172_vm1, %v3550_v34  ;;  %v3554_v20 = vmax.f32 %v3484_v24, 0.0  ;;  %v3816_v15 = vld [vmem:[#allocation3 + $0x40] sm:$0xff]  ;;  %vm10174_vm1 = vmmov %vm10147_vm0  ;;  %6265 = vmatprep.subr.bf16.mxu1 %v6666_v27  ;;  %v3645_v41 = vmul.f32 %v8657_v18, %v3609_v42  ;;  %v3680_v58 = vmul.f32 %v8667_v17, %v3608_v1  ;;  %v3749_v12 = vmul.f32 %v8671_v44, %v3609_v42  ;;  %v3821_v53 = vld [vmem:[#allocation3 + $0x68] sm:$0xff] }
 0x5d2   : > { %4425 = vst.msk [vmem:[#allocation4 + $0x8] sm:$0xff] %vm10173_vm5, %v4393_v7  ;;  %v3552_v47 = vmax.f32 %v3476_v49, 0.0  ;;  %v3888_v61 = vmul.f32 %v8662_v31, %v3816_v15  ;;  %v4024_v28 = vld [vmem:[#allocation3 + $0x41] sm:$0xff]  ;;  %vm10193_vm5 = vmmov %vm10147_vm0 }
 0x5d3   : > { %3580 = vst.msk [vmem:[#allocation3 + $0x80] sm:$0xff] %vm10174_vm1, %v3548_v25  ;;  %v3712_v48 = vadd.f32 %v3680_v58, %v8704_v59  ;;  %v3781_v2 = vadd.f32 %v3749_v12, %v8739_v51  ;;  %v4096_v39 = vmul.f32 %v8685_v56, %v4024_v28  ;;  %v3611_v60 = vld [vmem:[#allocation3 + $0x57] sm:$0xff]  ;;  %vm10194_vm1 = vmmov %vm10147_vm0 }
 0x5d4   : > { %v6183_v57 = vpop.f32.mrb[52].mxu0  ;;  %3585 = vst.msk [vmem:[#allocation3 + $0xa8] sm:$0xff] %vm10147_vm0, %v3553_v6  ;;  %v3920_v43 = vadd.f32 %v3888_v61, %v8710_v8  ;;  %v3614_v58 = vld [vmem:[#allocation3 + $0x6f] sm:$0xff] }
 0x5d5   : > { %v3488_v22 = vpop.f32.mrb[53].mxu0  ;;  %3583 = vst.msk [vmem:[#allocation3 + $0x98] sm:$0xff] %vm10175_vm12, %v3551_v33  ;;  %v8794_v10 = vadd.f32 %v6183_v57, %v8642_v9  ;;  %v3782_v34 = vadd.f32 %v8750_v11, %v3712_v48  ;;  %v4229_v49 = vsel %vm7285_vm6, %v3781_v2, 0.0  ;;  %v4128_v8 = vadd.f32 %v4096_v39, %v8742_v38  ;;  %v3819_v11 = vld [vmem:[#allocation3 + $0x58] sm:$0xff]  ;;  %vm10179_vm6 = vmmov %vm10147_vm0 }
 0x5d6   : > { %v8797_v29 = vadd.f32 %v8642_v9, %v3488_v22  ;;  %v8799_v13 = vpop.f32.mrb[54].mxu0  ;;  %3586 = vst.msk [vmem:[#allocation3 + $0xb0] sm:$0xff] %vm10176_vm11, %v3554_v20  ;;  %v4023_v9 = vld [vmem:[#allocation3 + $0x39] sm:$0xff]  ;;  %v3990_v7 = vadd.f32 %v3958_v63, %v3920_v43  ;;  %v4261_v51 = vadd.f32 %v4229_v49, %v8744_v54  ;;  %v8828_v33 = vmul.f32 %v8654_v5, %v3821_v53  ;;  %v4026_v38 = vld [vmem:[#allocation3 + $0x51] sm:$0xff]  ;;  %v4029_v43 = vld [vmem:[#allocation3 + $0x69] sm:$0xff] }
 0x5d7   : > { %3584 = vst.msk [vmem:[#allocation3 + $0xa0] sm:$0xff] %vm10177_vm2, %v3552_v47  ;;  %v8806_v37 = vpop.f32.mrb[55].mxu0  ;;  %v4095_v50 = vmul.f32 %v8685_v56, %v4023_v9  ;;  %v3961_v47 = vmul.f32 %v8676_v35, %v3821_v53  ;;  %v3683_v22 = vmul.f32 %v8667_v17, %v3611_v60  ;;  %v4062_v61 = vmul.f32 %v8680_v3, %v4026_v38  ;;  %v3822_v9 = vld [vmem:[#allocation3 + $0x70] sm:$0xff]  ;;  %vm10195_vm12 = vmmov %vm10147_vm0 }
 0x5d8   : > { %v4262_v6 = vadd.f32 %v3990_v7, %v3782_v34  ;;  %v8846_v7 = vmul.f32 %v8657_v18, %v3614_v58  ;;  %v3754_v53 = vmul.f32 %v8671_v44, %v3614_v58  ;;  %v8853_v24 = vmul.f32 %v8654_v5, %v3822_v9  ;;  %vm10196_vm11 = vmmov %vm10147_vm0 }
 0x5d9   : > { %v4127_v59 = vadd.f32 %v4095_v50, %v8717_v36  ;;  %v3891_v36 = vmul.f32 %v8662_v31, %v3819_v11  ;;  %v3715_v42 = vadd.f32 %v3683_v22, %v3645_v41  ;;  %v3613_v50 = vld [vmem:[#allocation3 + $0x67] sm:$0xff]  ;;  %vm10197_vm2 = vmmov %vm10147_vm0 }
 0x5db   : > { %v4197_v20 = vadd.f32 %v4165_v46, %v4127_v59  ;;  %v3923_v15 = vadd.f32 %v3891_v36, %v8729_v62  ;;  %v4166_v46 = vmul.f32 %v8713_v14, %v4026_v38  ;;  %v3612_v62 = vld [vmem:[#allocation3 + $0x5f] sm:$0xff]  ;;  %v3962_v59 = vmul.f32 %v8676_v35, %v3822_v9 }
 0x5dc   : > { %v8816_v55 = vpop.f32.mrb[56].mxu0  ;;  %v3684_v22 = vmul.f32 %v8667_v17, %v3612_v62 }
 0x5dd   : > { %v8820_v25 = vpop.f32.mrb[57].mxu0  ;;  %v4325_v1 = vadd.f32 %v4261_v51, %v4197_v20  ;;  %v3993_v2 = vadd.f32 %v3961_v47, %v3923_v15  ;;  %v4198_v41 = vadd.f32 %v4166_v46, %v4128_v8  ;;  %v8859_v8 = vmul.f32 %v8680_v3, %v4029_v43  ;;  %v3820_v51 = vld [vmem:[#allocation3 + $0x60] sm:$0xff] }
 0x5de   : > { %v8825_v63 = vpop.f32.mrb[58].mxu0  ;;  %v4169_v20 = vmul.f32 %v8713_v14, %v4029_v43  ;;  %v3649_v47 = vmul.f32 %v8657_v18, %v3613_v50  ;;  %v3892_v38 = vmul.f32 %v8662_v31, %v3820_v51  ;;  %v4028_v15 = vld [vmem:[#allocation3 + $0x61] sm:$0xff]  ;;  %v3716_v58 = vadd.f32 %v3684_v22, %v8747_v0 }
 0x5df   : > { %v8830_v57 = vpop.f32.mrb[59].mxu0  ;;  %v4364_v54 = vadd.f32 %v8734_v52, %v4325_v1  ;;  %v4294_v60 = vsel %vm7389_vm8, %v4198_v41, 0.0  ;;  %v3753_v1 = vmul.f32 %v8671_v44, %v3613_v50  ;;  %vm10181_vm8 = vmmov %vm10147_vm0  ;;  %v4100_v62 = vmul.f32 %v8685_v56, %v4028_v15  ;;  %v3825_v50 = vld [vmem:[#allocation3 + $0x88] sm:$0xff] }
 0x5e0   : > { %v4326_v11 = vadd.f32 %v4294_v60, %v4262_v6  ;;  %v3924_v6 = vadd.f32 %v3892_v38, %v8755_v26  ;;  %v8876_v26 = vmul.f32 %v8654_v5, %v3825_v50 }
 0x5e1   : > { %v4396_v48 = vmax.f32 %v4364_v54, 0.0  ;;  %v4027_v54 = vld [vmem:[#allocation3 + $0x59] sm:$0xff]  ;;  %v3785_v46 = vadd.f32 %v3753_v1, %v3715_v42  ;;  %v4132_v0 = vadd.f32 %v4100_v62, %v4062_v61 }
 0x5e2   : > { %v4365_v36 = vadd.f32 %v8734_v52, %v4326_v11  ;;  %v4099_v43 = vmul.f32 %v8685_v56, %v4027_v54  ;;  %v3994_v41 = vadd.f32 %v3962_v59, %v3924_v6  ;;  %v3615_v11 = vld [vmem:[#allocation3 + $0x77] sm:$0xff]  ;;  %v3616_v62 = vld [vmem:[#allocation3 + $0x7f] sm:$0xff] }
 0x5e3   : > { %4428 = vst.msk [vmem:[#allocation4 + $0x20] sm:$0xff] %vm10179_vm6, %v4396_v48  ;;  %v3786_v48 = vadd.f32 %v3754_v53, %v3716_v58  ;;  %v4233_v51 = vsel %vm7451_vm10, %v3785_v46, 0.0  ;;  %v3823_v53 = vld [vmem:[#allocation3 + $0x78] sm:$0xff]  ;;  %v3687_v38 = vmul.f32 %v8667_v17, %v3615_v11  ;;  %vm10183_vm10 = vmmov %vm10147_vm0 }
 0x5e4   : > { %v8837_v12 = vpop.f32.mrb[60].mxu0  ;;  %v4397_v9 = vmax.f32 %v4365_v36, 0.0  ;;  %v4131_v49 = vadd.f32 %v4099_v43, %v8787_v21  ;;  %v4265_v42 = vadd.f32 %v4233_v51, %v3993_v2  ;;  %v3965_v36 = vmul.f32 %v8676_v35, %v3825_v50  ;;  %v4030_v21 = vld [vmem:[#allocation3 + $0x71] sm:$0xff]  ;;  %v4033_v43 = vld [vmem:[#allocation3 + $0x89] sm:$0xff]  ;;  %vm10198_vm6 = vmmov %vm10147_vm0 }
 0x5e5   : > { %v8841_v28 = vpop.f32.mrb[61].mxu0  ;;  %v4266_v1 = vadd.f32 %v3994_v41, %v3786_v48  ;;  %v3895_v54 = vmul.f32 %v8662_v31, %v3823_v53  ;;  %v3719_v58 = vadd.f32 %v3687_v38, %v3649_v47  ;;  %v3618_v2 = vld [vmem:[#allocation3 + $0x8f] sm:$0xff]  ;;  %v4066_v46 = vmul.f32 %v8680_v3, %v4030_v21  ;;  %v3617_v50 = vld [vmem:[#allocation3 + $0x87] sm:$0xff] }
 0x5e6   : > { %v8843_v34 = vpop.f32.mrb[62].mxu0  ;;  %4429 = vst.msk [vmem:[#allocation4 + $0x28] sm:$0xff] %vm10181_vm8, %v4397_v9  ;;  %v4201_v22 = vadd.f32 %v4169_v20, %v4131_v49  ;;  %v3826_v9 = vld [vmem:[#allocation3 + $0x90] sm:$0xff]  ;;  %v4170_v48 = vmul.f32 %v8713_v14, %v4030_v21  ;;  %v8887_v41 = vmul.f32 %v8657_v18, %v3618_v2  ;;  %v3758_v47 = vmul.f32 %v8671_v44, %v3618_v2  ;;  %vm10199_vm8 = vmmov %vm10147_vm0 }
 0x5e7   : > { %v8848_v39 = vpop.f32.mrb[63].mxu0  ;;  %v3927_v61 = vadd.f32 %v3895_v54, %v8828_v33  ;;  %v8891_v33 = vmul.f32 %v8654_v5, %v3826_v9  ;;  %v3966_v60 = vmul.f32 %v8676_v35, %v3826_v9  ;;  %v8895_v51 = vmul.f32 %v8680_v3, %v4033_v43 }
 0x5e8   : > { %v4329_v59 = vadd.f32 %v4265_v42, %v4201_v22  ;;  %v4202_v49 = vadd.f32 %v4170_v48, %v4132_v0  ;;  %v4173_v11 = vmul.f32 %v8713_v14, %v4033_v43  ;;  %v3824_v42 = vld [vmem:[#allocation3 + $0x80] sm:$0xff]  ;;  %v3688_v0 = vmul.f32 %v8667_v17, %v3616_v62  ;;  %v3829_v62 = vld [vmem:[#allocation3 + $0xa8] sm:$0xff] }
 0x5e9   : > { %v3997_v6 = vadd.f32 %v3965_v36, %v3927_v61  ;;  %v3653_v36 = vmul.f32 %v8657_v18, %v3617_v50  ;;  %v3757_v38 = vmul.f32 %v8671_v44, %v3617_v50  ;;  %v3896_v21 = vmul.f32 %v8662_v31, %v3824_v42  ;;  %v4032_v61 = vld [vmem:[#allocation3 + $0x81] sm:$0xff] }
 0x5ea   : > { %v4368_v15 = vadd.f32 %v8734_v52, %v4329_v59  ;;  %v4298_v53 = vsel %vm7566_vm13, %v4202_v49, 0.0  ;;  %v3720_v54 = vadd.f32 %v3688_v0, %v8846_v7  ;;  %vm10185_vm13 = vmmov %vm10147_vm0 }
 0x5eb   : > { %v4330_v59 = vadd.f32 %v4298_v53, %v4266_v1  ;;  %v3928_v48 = vadd.f32 %v3896_v21, %v8853_v24  ;;  %v4104_v1 = vmul.f32 %v8685_v56, %v4032_v61  ;;  %v3619_v53 = vld [vmem:[#allocation3 + $0x97] sm:$0xff]  ;;  %v8914_v24 = vmul.f32 %v8654_v5, %v3829_v62 }
 0x5ec   : > { %v4400_v20 = vmax.f32 %v4368_v15, 0.0  ;;  %v4031_v15 = vld [vmem:[#allocation3 + $0x79] sm:$0xff]  ;;  %v3790_v9 = vadd.f32 %v3758_v47, %v3720_v54  ;;  %v3691_v21 = vmul.f32 %v8667_v17, %v3619_v53 }
 0x5ed   : > { %v4369_v2 = vadd.f32 %v8734_v52, %v4330_v59  ;;  %v4103_v49 = vmul.f32 %v8685_v56, %v4031_v15  ;;  %v3998_v22 = vadd.f32 %v3966_v60, %v3928_v48  ;;  %v4136_v0 = vadd.f32 %v4104_v1, %v4066_v46  ;;  %v3620_v1 = vld [vmem:[#allocation3 + $0x9f] sm:$0xff] }
 0x5ee   : > { %4432 = vst.msk [vmem:[#allocation4 + $0x40] sm:$0xff] %vm10183_vm10, %v4400_v20  ;;  %v3789_v20 = vadd.f32 %v3757_v38, %v3719_v58  ;;  %v3827_v38 = vld [vmem:[#allocation3 + $0x98] sm:$0xff]  ;;  %v3969_v60 = vmul.f32 %v8676_v35, %v3829_v62  ;;  %v3621_v62 = vld [vmem:[#allocation3 + $0xa7] sm:$0xff]  ;;  %vm10200_vm10 = vmmov %vm10147_vm0 }
 0x5ef   : > { %v4401_v43 = vmax.f32 %v4369_v2, 0.0  ;;  %v4135_v7 = vadd.f32 %v4103_v49, %v8859_v8  ;;  %v4270_v59 = vadd.f32 %v3998_v22, %v3790_v9  ;;  %v3899_v15 = vmul.f32 %v8662_v31, %v3827_v38  ;;  %v4034_v8 = vld [vmem:[#allocation3 + $0x91] sm:$0xff]  ;;  %v4037_v49 = vld [vmem:[#allocation3 + $0xa9] sm:$0xff] }
 0x5f0   : > { %v4237_v42 = vsel %vm7595_vm14, %v3789_v20, 0.0  ;;  %v3723_v2 = vadd.f32 %v3691_v21, %v3653_v36  ;;  %v4070_v20 = vmul.f32 %v8680_v3, %v4034_v8  ;;  %v3830_v9 = vld [vmem:[#allocation3 + $0xb0] sm:$0xff]  ;;  %vm10187_vm14 = vmmov %vm10147_vm0  ;;  %v4177_v53 = vmul.f32 %v8713_v14, %v4037_v49 }
 0x5f1   : > { %4433 = vst.msk [vmem:[#allocation4 + $0x48] sm:$0xff] %vm10185_vm13, %v4401_v43  ;;  %v4269_v58 = vadd.f32 %v4237_v42, %v3997_v6  ;;  %v4205_v47 = vadd.f32 %v4173_v11, %v4135_v7  ;;  %v3931_v46 = vadd.f32 %v3899_v15, %v8876_v26  ;;  %v3622_v6 = vld [vmem:[#allocation3 + $0xaf] sm:$0xff]  ;;  %v4174_v43 = vmul.f32 %v8713_v14, %v4034_v8  ;;  %vm10201_vm13 = vmmov %vm10147_vm0 }
 0x5f2   : > { %v8925_v22 = vmul.f32 %v8657_v18, %v3622_v6  ;;  %v3762_v36 = vmul.f32 %v8671_v44, %v3622_v6  ;;  %v8929_v26 = vmul.f32 %v8654_v5, %v3830_v9  ;;  %v3970_v50 = vmul.f32 %v8676_v35, %v3830_v9 }
 0x5f3   : > { %v4333_v54 = vadd.f32 %v4269_v58, %v4205_v47  ;;  %v4001_v48 = vadd.f32 %v3969_v60, %v3931_v46  ;;  %v4206_v7 = vadd.f32 %v4174_v43, %v4136_v0  ;;  %v8933_v42 = vmul.f32 %v8680_v3, %v4037_v49  ;;  %v3828_v58 = vld [vmem:[#allocation3 + $0xa0] sm:$0xff] }
 0x5f4   : > { %v8939_v60 = vmul.f32 %v8657_v18, %v3621_v62  ;;  %v3692_v0 = vmul.f32 %v8667_v17, %v3620_v1  ;;  %v3761_v21 = vmul.f32 %v8671_v44, %v3621_v62  ;;  %v3900_v8 = vmul.f32 %v8662_v31, %v3828_v58  ;;  %v4036_v46 = vld [vmem:[#allocation3 + $0xa1] sm:$0xff] }
 0x5f5   : > { %v4372_v61 = vadd.f32 %v8734_v52, %v4333_v54  ;;  %v4302_v38 = vsel %vm7696_vm7, %v4206_v7, 0.0  ;;  %vm10189_vm7 = vmmov %vm10147_vm0 }
 0x5f6   : > { %v4334_v54 = vadd.f32 %v4302_v38, %v4270_v59  ;;  %v3724_v15 = vadd.f32 %v3692_v0, %v8887_v41  ;;  %v3793_v6 = vadd.f32 %v3761_v21, %v3723_v2  ;;  %v3932_v9 = vadd.f32 %v3900_v8, %v8891_v33 }
 0x5f7   : > { %v4404_v11 = vmax.f32 %v4372_v61, 0.0  ;;  %v4035_v61 = vld [vmem:[#allocation3 + $0x99] sm:$0xff]  ;;  %v4108_v59 = vmul.f32 %v8685_v56, %v4036_v46  ;;  %v3557_v33 = vmax.f32 %v8794_v10, 0.0  ;;  %v3555_v38 = vmax.f32 %v8797_v29, 0.0  ;;  %v4496_v46 = vld [vmem:[%s10165_s2 + $0x18] sm:$0xff] }
 0x5f8   : > { %v4373_v14 = vadd.f32 %v8734_v52, %v4334_v54  ;;  %v4107_v49 = vmul.f32 %v8685_v56, %v4035_v61  ;;  %v4002_v1 = vadd.f32 %v3970_v50, %v3932_v9  ;;  %v4241_v7 = vsel %vm7755_vm9, %v3793_v6, 0.0  ;;  %v6568_v50 = vld [vmem:[%s6744_s30] ss:$0 sm:$0xff]  ;;  %vm10192_vm9 = vmmov %vm10147_vm0 }
 0x5f9   : > { %4436 = vst.msk [vmem:[#allocation4 + $0x60] sm:$0xff] %vm10187_vm14, %v4404_v11  ;;  %v3794_v11 = vadd.f32 %v3762_v36, %v3724_v15  ;;  %v8953_v58 = vadd.f32 %v4108_v59, %v4070_v20  ;;  %v4273_v2 = vadd.f32 %v4241_v7, %v4001_v48  ;;  %v3500_v0 = vadd.f32 %v6568_v50, %v8799_v13  ;;  %vm10202_vm14 = vmmov %vm10147_vm0 }
 0x5fa   : > { %v4405_v43 = vmax.f32 %v4373_v14, 0.0  ;;  %v4139_v41 = vadd.f32 %v4107_v49, %v8895_v51  ;;  %v3492_v54 = vadd.f32 %v6568_v50, %v8806_v37  ;;  %3589 = vst.msk [vmem:[#allocation3 + $0xc8] sm:$0xff] %vm10191_vm3, %v3557_v33  ;;  %v3513_v51 = vadd.f32 %v6568_v50, %v8816_v55 }
 0x5fb   : > { %v8955_v36 = vadd.f32 %v4002_v1, %v3794_v11  ;;  %v3505_v20 = vadd.f32 %v6568_v50, %v8820_v25  ;;  %3587 = vst.msk [vmem:[#allocation3 + $0xb8] sm:$0xff] %vm10192_vm9, %v3555_v38  ;;  %v3558_v48 = vmax.f32 %v3500_v0, 0.0  ;;  %v3516_v13 = vadd.f32 %v6568_v50, %v8825_v63  ;;  %v4495_v63 = vld [vmem:[%s10165_s2 + $0x10] sm:$0xff]  ;;  %vm10209_vm9 = vmmov %vm10147_vm0  ;;  %s10227_s2 = sld [smem:[#allocation21_spill]] }
 0x5fc   : > { %4437 = vst.msk [vmem:[#allocation4 + $0x68] sm:$0xff] %vm10189_vm7, %v4405_v43  ;;  %v4209_v47 = vadd.f32 %v4177_v53, %v4139_v41  ;;  %v3556_v53 = vmax.f32 %v3492_v54, 0.0  ;;  %v3561_v29 = vmax.f32 %v3513_v51, 0.0  ;;  %v3508_v37 = vadd.f32 %v6568_v50, %v8830_v57  ;;  %v8979_v57 = vld [vmem:[#allocation4] ss:$2 sm:$0xff]  ;;  %vm10203_vm7 = vmmov %vm10147_vm0 }
 0x5fd   : > { %v3559_v15 = vmax.f32 %v3505_v20, 0.0  ;;  %3590 = vst.msk [vmem:[#allocation3 + $0xd0] sm:$0xff] %vm10193_vm5, %v3558_v48  ;;  %v3529_v55 = vadd.f32 %v6568_v50, %v8837_v12  ;;  %v3562_v8 = vmax.f32 %v3516_v13, 0.0  ;;  %v3532_v61 = vadd.f32 %v6568_v50, %v8843_v34  ;;  %v8986_v34 = vld [vmem:[%s9824_s6 + $0x8] ss:$0 sm:$0xff]  ;;  %s10280_s6 = smov 96  }
 0x5fe   : > { %v4337_v21 = vadd.f32 %v4273_v2, %v4209_v47  ;;  %3588 = vst.msk [vmem:[#allocation3 + $0xc0] sm:$0xff] %vm10194_vm1, %v3556_v53  ;;  %v3560_v14 = vmax.f32 %v3508_v37, 0.0  ;;  %v3524_v11 = vadd.f32 %v6568_v50, %v8848_v39  ;;  %v6266_v49 = vpack.c.bf16 %v4496_v46, %v4495_v63  ;;  %v9026_v46 = vld [vmem:[%s10162_s23] ss:$0 sm:$0xff]  ;;  %vm10211_vm1 = vmmov %vm10147_vm0 }
 0x5ff   : > { %3593 = vst.msk [vmem:[#allocation3 + $0xe8] sm:$0xff] %vm10147_vm0, %v3561_v29  ;;  %v3565_v6 = vmax.f32 %v3529_v55, 0.0  ;;  %v3566_v9 = vmax.f32 %v3532_v61, 0.0  ;;  %v8996_v7 = vsel %vm10202_vm14, %v8979_v57, 0.0  ;;  %vm10208_vm3 = vnez %v10014_v40  ;;  %vm10220_vm14 = vmmov %vm10211_vm1 }
 0x600   : > { %v4376_v10 = vadd.f32 %v8734_v52, %v4337_v21  ;;  %3591 = vst.msk [vmem:[#allocation3 + $0xd8] sm:$0xff] %vm10195_vm12, %v3559_v15  ;;  %v3521_v52 = vadd.f32 %v6568_v50, %v8841_v28  ;;  %v3564_v28 = vmax.f32 %v3524_v11, 0.0  ;;  %6267 = vmatpush3.bf16.msra.mxu1 %v6266_v49  ;;  %vm10210_vm5 = vnez %v10017_v30  ;;  %vm10213_vm12 = vmmov %vm10211_vm1 }
 0x601   : > { %3594 = vst.msk [vmem:[#allocation3 + $0xf0] sm:$0xff] %vm10197_vm2, %v3562_v8  ;;  %v3833_v43 = vld [vmem:[#allocation3 + $0xc8] sm:$0xff]  ;;  %6204 = vmatprep.subr.mxu1 %v10082_v19  ;;  %vm10215_vm2 = vnez %v10065_v32 }
 0x602   : > { %v4408_v25 = vmax.f32 %v4376_v10, 0.0  ;;  %v3563_v12 = vmax.f32 %v3521_v52, 0.0  ;;  %3592 = vst.msk [vmem:[#allocation3 + $0xe0] sm:$0xff] %vm10198_vm6, %v3560_v14  ;;  %v8989_v1 = vmul.f32 %v8654_v5, %v3833_v43  ;;  %v3973_v39 = vmul.f32 %v8676_v35, %v3833_v43  ;;  %v3623_v59 = vld [vmem:[#allocation3 + $0xb7] sm:$0xff]  ;;  %vm10216_vm6 = vmmov %vm10211_vm1 }
 0x603   : > { %3597 = vst.msk [vmem:[#allocation3 + $0x108] sm:$0xff] %vm10199_vm8, %v3565_v6  ;;  %v3831_v41 = vld [vmem:[#allocation3 + $0xb8] sm:$0xff]  ;;  %v3695_v2 = vmul.f32 %v8667_v17, %v3623_v59  ;;  %vm10217_vm8 = vmmov %vm10211_vm1 }
 0x604   : > { %4440 = vst.msk [vmem:[#allocation4 + $0x80] sm:$0xff] %vm10196_vm11, %v4408_v25  ;;  %v4038_v62 = vld [vmem:[#allocation3 + $0xb1] sm:$0xff]  ;;  %v3903_v47 = vmul.f32 %v8662_v31, %v3831_v41  ;;  %v4041_v20 = vld [vmem:[#allocation3 + $0xc9] sm:$0xff]  ;;  %vm10214_vm11 = vnez %v10042_v23 }
 0x605   : > { %3595 = vst.msk [vmem:[#allocation3 + $0xf8] sm:$0xff] %vm10200_vm10, %v3563_v12  ;;  %v4074_v33 = vmul.f32 %v8680_v3, %v4038_v62  ;;  %v3626_v38 = vld [vmem:[#allocation3 + $0xcf] sm:$0xff]  ;;  %v3727_v50 = vadd.f32 %v3695_v2, %v8939_v60  ;;  %v4178_v0 = vmul.f32 %v8986_v34, %v4038_v62  ;;  %v3624_v10 = vld [vmem:[#allocation3 + $0xbf] sm:$0xff]  ;;  %v3625_v29 = vld [vmem:[#allocation3 + $0xc7] sm:$0xff]  ;;  %v9018_v55 = vmul.f32 %v8680_v3, %v4041_v20 }
 0x606   : > { %3598 = vst.msk [vmem:[#allocation3 + $0x110] sm:$0xff] %vm10201_vm13, %v3566_v9  ;;  %v3834_v54 = vld [vmem:[#allocation3 + $0xd0] sm:$0xff]  ;;  %v3935_v21 = vadd.f32 %v3903_v47, %v8914_v24  ;;  %v9007_v51 = vmul.f32 %v8657_v18, %v3626_v38  ;;  %v3766_v53 = vmul.f32 %v8671_v44, %v3626_v38  ;;  %v3832_v25 = vld [vmem:[#allocation3 + $0xc0] sm:$0xff]  ;;  %v3661_v52 = vmul.f32 %v8657_v18, %v3625_v29  ;;  %v3837_v62 = vld [vmem:[#allocation3 + $0xe8] sm:$0xff] }
 0x607   : > { %3596 = vst.msk [vmem:[#allocation3 + $0x100] sm:$0xff] %vm10203_vm7, %v3564_v28  ;;  %v4210_v48 = vadd.f32 %v4178_v0, %v8953_v58  ;;  %v9012_v13 = vmul.f32 %v8654_v5, %v3834_v54  ;;  %v3974_v24 = vmul.f32 %v8676_v35, %v3834_v54  ;;  %v4181_v58 = vmul.f32 %v8986_v34, %v4041_v20  ;;  %v4039_v11 = vld [vmem:[#allocation3 + $0xb9] sm:$0xff]  ;;  %v4040_v12 = vld [vmem:[#allocation3 + $0xc1] sm:$0xff]  ;;  %v4042_v60 = vld [vmem:[#allocation3 + $0xd1] sm:$0xff] }
 0x608   : > { %v4005_v15 = vadd.f32 %v3973_v39, %v3935_v21  ;;  %v3696_v61 = vmul.f32 %v8667_v17, %v3624_v10  ;;  %v3765_v63 = vmul.f32 %v8671_v44, %v3625_v29  ;;  %v3904_v6 = vmul.f32 %v8662_v31, %v3832_v25  ;;  %v3627_v0 = vld [vmem:[#allocation3 + $0xd7] sm:$0xff]  ;;  %vm10218_vm10 = vmmov %vm10211_vm1 }
 0x609   : > { %v4306_v37 = vsel %vm7881_vm15, %v4210_v48, 0.0  ;;  %v4111_v39 = vmul.f32 %v8685_v56, %v4039_v11  ;;  %vm10205_vm15 = vmmov %vm10147_vm0  ;;  %v4112_v41 = vmul.f32 %v8685_v56, %v4040_v12  ;;  %v3835_v20 = vld [vmem:[#allocation3 + $0xd8] sm:$0xff]  ;;  %v3977_v48 = vmul.f32 %v8676_v35, %v3837_v62  ;;  %v3629_v11 = vld [vmem:[#allocation3 + $0xe7] sm:$0xff] }
 0x60a   : > { %v4338_v8 = vadd.f32 %v4306_v37, %v8955_v36  ;;  %v3728_v9 = vadd.f32 %v3696_v61, %v8925_v22  ;;  %v3797_v43 = vadd.f32 %v3765_v63, %v3727_v50  ;;  %v3936_v28 = vadd.f32 %v3904_v6, %v8929_v26  ;;  %v4045_v63 = vld [vmem:[#allocation3 + $0xe9] sm:$0xff]  ;;  %v3628_v6 = vld [vmem:[#allocation3 + $0xdf] sm:$0xff]  ;;  %vm10219_vm13 = vmmov %vm10211_vm1 }
 0x60b   : > { %v4143_v2 = vadd.f32 %v4111_v39, %v8933_v42  ;;  %v4144_v22 = vadd.f32 %v4112_v41, %v4074_v33  ;;  %v3873_v26 = vmul.f32 %v8654_v5, %v3837_v62  ;;  %v3699_v10 = vmul.f32 %v8667_v17, %v3627_v0  ;;  %v3630_v33 = vld [vmem:[#allocation3 + $0xef] sm:$0xff]  ;;  %v4043_v47 = vld [vmem:[#allocation3 + $0xd9] sm:$0xff]  ;;  %vm10221_vm7 = vmmov %vm10211_vm1 }
 0x60c   : > { %v4377_v14 = vadd.f32 %v9026_v46, %v4338_v8  ;;  %v3798_v49 = vadd.f32 %v3766_v53, %v3728_v9  ;;  %v4006_v59 = vadd.f32 %v3974_v24, %v3936_v28  ;;  %v4245_v38 = vsel %vm7958_vm4, %v3797_v43, 0.0  ;;  %v3838_v8 = vld [vmem:[#allocation3 + $0xf0] sm:$0xff]  ;;  %vm10207_vm4 = vmmov %vm10147_vm0  ;;  %v3836_v28 = vld [vmem:[#allocation3 + $0xe0] sm:$0xff] }
 0x60d   : > { %v4277_v50 = vadd.f32 %v4245_v38, %v4005_v15  ;;  %v4213_v54 = vadd.f32 %v4181_v58, %v4143_v2  ;;  %v3907_v29 = vmul.f32 %v8662_v31, %v3835_v20  ;;  %v3731_v37 = vadd.f32 %v3699_v10, %v3661_v52  ;;  %v4044_v38 = vld [vmem:[#allocation3 + $0xe1] sm:$0xff]  ;;  %v3631_v10 = vld [vmem:[#allocation3 + $0xf7] sm:$0xff] }
 0x60e   : > { %v4409_v36 = vmax.f32 %v4377_v14, 0.0  ;;  %v4278_v21 = vadd.f32 %v4006_v59, %v3798_v49  ;;  %v4078_v25 = vmul.f32 %v8680_v3, %v4042_v60  ;;  %v4182_v61 = vmul.f32 %v8986_v34, %v4042_v60 }
 0x60f   : > { %v4341_v53 = vadd.f32 %v4277_v50, %v4213_v54  ;;  %v3939_v24 = vadd.f32 %v3907_v29, %v8989_v1  ;;  %v9048_v14 = vmul.f32 %v8657_v18, %v3630_v33  ;;  %v3770_v52 = vmul.f32 %v8671_v44, %v3630_v33 }
 0x610   : > { %4441 = vst.msk [vmem:[#allocation4 + $0x88] sm:$0xff] %vm10205_vm15, %v4409_v36  ;;  %v4214_v12 = vadd.f32 %v4182_v61, %v4144_v22  ;;  %v9052_v1 = vmul.f32 %v8654_v5, %v3838_v8  ;;  %v3978_v9 = vmul.f32 %v8676_v35, %v3838_v8  ;;  %v9056_v43 = vmul.f32 %v8680_v3, %v4045_v63  ;;  %v4046_v8 = vld [vmem:[#allocation3 + $0xf1] sm:$0xff]  ;;  %vm10222_vm15 = vmmov %vm10211_vm1 }
 0x611   : > { %v4380_v42 = vadd.f32 %v9026_v46, %v4341_v53  ;;  %v4009_v58 = vadd.f32 %v3977_v48, %v3939_v24  ;;  %v4185_v36 = vmul.f32 %v8986_v34, %v4045_v63  ;;  %v3665_v39 = vmul.f32 %v8657_v18, %v3629_v11  ;;  %v3877_v48 = vld [vmem:[#allocation3 + $0x108] sm:$0xff] }
 0x612   : > { %v4310_v49 = vsel %vm10208_vm3, %v4214_v12, 0.0  ;;  %v3700_v59 = vmul.f32 %v8667_v17, %v3628_v6  ;;  %v3769_v62 = vmul.f32 %v8671_v44, %v3629_v11  ;;  %v3908_v2 = vmul.f32 %v8662_v31, %v3836_v28  ;;  %v3670_v11 = vld [vmem:[#allocation3 + $0x10f] sm:$0xff]  ;;  %vm10226_vm3 = vmmov %vm10211_vm1 }
 0x613   : > { %v4412_v15 = vmax.f32 %v4380_v42, 0.0  ;;  %v4342_v41 = vadd.f32 %v4310_v49, %v4278_v21  ;;  %v4115_v18 = vmul.f32 %v8685_v56, %v4043_v47  ;;  %v4116_v21 = vmul.f32 %v8685_v56, %v4044_v38  ;;  %v3839_v42 = vld [vmem:[#allocation3 + $0xf8] sm:$0xff] }
 0x614   : > { %v3732_v5 = vadd.f32 %v3700_v59, %v9007_v51  ;;  %v3801_v22 = vadd.f32 %v3769_v62, %v3731_v37  ;;  %v3940_v40 = vadd.f32 %v3908_v2, %v9012_v13  ;;  %v3981_v24 = vmul.f32 %v8676_v35, %v3877_v48  ;;  %v3632_v49 = vld [vmem:[#allocation3 + $0xff] sm:$0xff] }
 0x615   : > { %4444 = vst.msk [vmem:[#allocation4 + $0xa0] sm:$0xff] %vm10207_vm4, %v4412_v15  ;;  %v4381_v0 = vadd.f32 %v9026_v46, %v4342_v41  ;;  %v4147_v51 = vadd.f32 %v4115_v18, %v9018_v55  ;;  %v4148_v29 = vadd.f32 %v4116_v21, %v4078_v25  ;;  %v3703_v33 = vmul.f32 %v8667_v17, %v3631_v10  ;;  %vm10223_vm4 = vmmov %vm10211_vm1 }
 0x616   : > { %v3802_v50 = vadd.f32 %v3770_v52, %v3732_v5  ;;  %v4010_v20 = vadd.f32 %v3978_v9, %v3940_v40  ;;  %v4249_v53 = vsel %vm10210_vm5, %v3801_v22, 0.0  ;;  %v3911_v63 = vmul.f32 %v8662_v31, %v3839_v42  ;;  %v4085_v9 = vld [vmem:[#allocation3 + $0x109] sm:$0xff] }
 0x617   : > { %v4413_v54 = vmax.f32 %v4381_v0, 0.0  ;;  %v4281_v60 = vadd.f32 %v4249_v53, %v4009_v58  ;;  %v4217_v37 = vadd.f32 %v4185_v36, %v4147_v51  ;;  %v3735_v61 = vadd.f32 %v3703_v33, %v3665_v39  ;;  %v3878_v58 = vld [vmem:[#allocation3 + $0x110] sm:$0xff]  ;;  %v3669_v39 = vld [vmem:[#allocation3 + $0x107] sm:$0xff] }
 0x618   : > { %v4282_v13 = vadd.f32 %v4010_v20, %v3802_v50  ;;  %v3943_v6 = vadd.f32 %v3911_v63, %v3873_v26  ;;  %v4082_v30 = vmul.f32 %v8680_v3, %v4046_v8  ;;  %v4186_v52 = vmul.f32 %v8986_v34, %v4046_v8  ;;  %v4086_v36 = vld [vmem:[#allocation3 + $0x111] sm:$0xff]  ;;  %v3840_v26 = vld [vmem:[#allocation3 + $0x100] sm:$0xff] }
 0x619   : > { %4445 = vst.msk [vmem:[#allocation4 + $0xa8] sm:$0xff] %vm10209_vm9, %v4413_v54  ;;  %v4345_v15 = vadd.f32 %v4281_v60, %v4217_v37  ;;  %v3774_v28 = vmul.f32 %v8671_v44, %v3670_v11  ;;  %v3982_v41 = vmul.f32 %v8676_v35, %v3878_v58  ;;  %v4189_v3 = vmul.f32 %v8986_v34, %v4085_v9  ;;  %v4047_v50 = vld [vmem:[#allocation3 + $0xf9] sm:$0xff]  ;;  %v4048_v54 = vld [vmem:[#allocation3 + $0x101] sm:$0xff]  ;;  %vm10228_vm9 = vmmov %vm10211_vm1 }
 0x61a   : > { %v4013_v12 = vadd.f32 %v3981_v24, %v3943_v6  ;;  %v4218_v59 = vadd.f32 %v4186_v52, %v4148_v29  ;;  %v4190_v62 = vmul.f32 %v8986_v34, %v4086_v36  ;;  %vm10212_vm0 = vnez %v10036_v16  ;;  %v9099_v29 = vld [vmem:[#allocation4 + $0x20] ss:$2 sm:$0xff] }
 0x61b   : > { %v4384_v55 = vadd.f32 %v9026_v46, %v4345_v15  ;;  %v3704_v2 = vmul.f32 %v8667_v17, %v3632_v49  ;;  %v3773_v38 = vmul.f32 %v8671_v44, %v3669_v39  ;;  %v3912_v22 = vmul.f32 %v8662_v31, %v3840_v26  ;;  %v9105_v37 = vld [vmem:[#allocation4 + $0x60] ss:$2 sm:$0xff] }
 0x61c   : > { %v4314_v5 = vsel %vm10212_vm0, %v4218_v59, 0.0  ;;  %v4119_v21 = vmul.f32 %v8685_v56, %v4047_v50  ;;  %v4120_v17 = vmul.f32 %v8685_v56, %v4048_v54  ;;  %v9113_v33 = vld [vmem:[#allocation4 + $0x80] ss:$2 sm:$0xff]  ;;  %v4476_v32 = vsel %vm10218_vm10, %v9105_v37, 0.0 }
 0x61d   : > { %v4416_v25 = vmax.f32 %v4384_v55, 0.0  ;;  %v4346_v47 = vadd.f32 %v4314_v5, %v4282_v13  ;;  %v3736_v0 = vadd.f32 %v3704_v2, %v9048_v14  ;;  %v3805_v40 = vadd.f32 %v3773_v38, %v3735_v61  ;;  %v4497_v5 = vld [vmem:[%s10225_s22] sm:$0x1]  ;;  %v6520_v50 = vld [vmem:[%s10227_s2 + $0x8] sm:$0xff]   ;;  %s9785_s22 = smov 16  }
 0x61e   : > { %v3944_v34 = vadd.f32 %v3912_v22, %v9052_v1  ;;  %v4151_v44 = vadd.f32 %v4119_v21, %v9056_v43  ;;  %v4152_v14 = vadd.f32 %v4120_v17, %v4082_v30  ;;  %v9101_v1 = vld [vmem:[#allocation4 + $0x40] ss:$2 sm:$0xff]  ;;  %v4472_v43 = vsel %vm10216_vm6, %v9099_v29, 0.0 }
 0x61f   : > { %4448 = vst.msk [vmem:[#allocation4 + $0xc0] sm:$0xff] %vm10211_vm1, %v4416_v25  ;;  %v4385_v35 = vadd.f32 %v9026_v46, %v4346_v47  ;;  %v3806_v18 = vadd.f32 %v3774_v28, %v3736_v0  ;;  %v4253_v31 = vsel %vm10214_vm11, %v3805_v40, 0.0  ;;  %v4474_v23 = vsel %vm10217_vm8, %v9101_v1, 0.0  ;;  %v6519_v22 = vld [vmem:[%s10227_s2] sm:$0xff]   ;;  %vm10234_vm11 = vmmov %vm10226_vm3  ;;  %s10277_s2 = smov 112  }
 0x620   : > { %v4014_v16 = vadd.f32 %v3982_v41, %v3944_v34  ;;  %v4221_v48 = vadd.f32 %v4189_v3, %v4151_v44  ;;  %v4222_v51 = vadd.f32 %v4190_v62, %v4152_v14  ;;  %v4285_v53 = vadd.f32 %v4253_v31, %v4013_v12  ;;  %v4466_v63 = vld [vmem:[#allocation4 + $0xa0] ss:$2 sm:$0xff] }
 0x621   : > { %v4417_v20 = vmax.f32 %v4385_v35, 0.0  ;;  %v4473_v15 = vadd.f32 %v4472_v43, %v8996_v7  ;;  %v4478_v6 = vsel %vm10221_vm7, %v9113_v33, 0.0  ;;  %v4480_v11 = vsel %vm10222_vm15, %v4466_v63, 0.0  ;;  %v4572_v62 = vld [vmem:[%s10224_s16] sm:$0x3]  ;;  %s10233_s16 = sld [smem:[#allocation23_spill]] }
 0x622   : > { %v4286_v10 = vadd.f32 %v4014_v16, %v3806_v18  ;;  %v4318_v60 = vsel %vm10215_vm2, %v4222_v51, 0.0  ;;  %v4349_v56 = vadd.f32 %v4285_v53, %v4221_v48  ;;  %vm10229_vm5 = vmmov 0   ;;  %v4573_v35 = vld [vmem:[%s10231_s3] sm:$0x1]  ;;  %vm10235_vm2 = vmmov %vm10226_vm3  ;;  %s10237_s3 = sld [smem:[#allocation22_spill]] }
 0x623   : > { %4449 = vst.msk [vmem:[#allocation4 + $0xc8] sm:$0xff] %vm10213_vm12, %v4417_v20  ;;  %v4475_v55 = vadd.f32 %v4474_v23, %v4473_v15  ;;  %vm10230_vm1 = vcmask 1041408   ;;  %vm10232_vm0 = vcmask 15360   ;;  %vm9800_vm12 = vcmask 130048   ;;  %vm10236_vm6 = vmmov %vm10235_vm2 }
 0x624   : > { %v4350_v42 = vadd.f32 %v4318_v60, %v4286_v10  ;;  %v4388_v13 = vadd.f32 %v9026_v46, %v4349_v56  ;;  %916 = vst.msk [vmem:[#allocation5] sm:$0xff] %vm9800_vm12, %v10082_v19  ;;  %917 = vst.msk [vmem:[#allocation5 + $0x8] sm:$0xff] %vm9800_vm12, %v10082_v19 }
 0x625   : > { %918 = vst.msk [vmem:[#allocation5 + $0x50] sm:$0xff] %vm9800_vm12, %v10082_v19  ;;  %919 = vst.msk [vmem:[#allocation5 + $0x58] sm:$0xff] %vm9800_vm12, %v10082_v19 }
 0x626   : > { %v4389_v24 = vadd.f32 %v9026_v46, %v4350_v42  ;;  %v4420_v8 = vmax.f32 %v4388_v13, 0.0  ;;  %v4477_v46 = vadd.f32 %v4476_v32, %v4475_v55  ;;  %vm10238_vm8 = vmmov %vm10235_vm2  ;;  %v6667_v42 = vmov 0  }
 0x627   : > { %v6523_v43 = vld [vmem:[%s10233_s16 + $0x10] sm:$0xff]  }
 0x628   : > { %v4421_v61 = vmax.f32 %v4389_v24, 0.0  ;;  %4452 = vst.msk [vmem:[#allocation4 + $0xe0] sm:$0xff] %vm10219_vm13, %v4420_v8  ;;  %v4479_v25 = vadd.f32 %v4478_v6, %v4477_v46  ;;  %v5951_v23 = vld [vmem:[%s10237_s3] ss:$0 sm:$0xff]  ;;  %v10239_v6 = vld [vmem:[#allocation31_spill] sm:$0xff]  ;;  %s9783_s3 = smov 64  }
 0x629   : > { %v6525_v46 = vld [vmem:[%s10233_s16 + $0x20] sm:$0xff]  }
 0x62a   : > { %4453 = vst.msk [vmem:[#allocation4 + $0xe8] sm:$0xff] %vm10220_vm14, %v4421_v61  ;;  %v4468_v30 = vld [vmem:[#allocation4 + $0xc0] ss:$2 sm:$0xff]  ;;  %v4481_v58 = vadd.f32 %v4480_v11, %v4479_v25 }
 0x62b   : > { %v4482_v7 = vsel %vm10223_vm4, %v4468_v30, 0.0 }
 0x62c   : > { %v4483_v52 = vadd.f32 %v4482_v7, %v4481_v58  ;;  %v4916_v58 = vld [vmem:[#allocation5 + $0x8] sm:$0xff] }
 0x631   : > { %v4470_v12 = vld [vmem:[#allocation4 + $0xe0] ss:$2 sm:$0xff] }
 0x632   : > { %v4484_v9 = vsel %vm10226_vm3, %v4470_v12, 0.0 }
 0x633   : > { %v4485_v36 = vadd.f32 %v4484_v9, %v4483_v52  ;;  %v6526_v9 = vld [vmem:[%s10233_s16 + $0x28] sm:$0xff]  }
 0x635   : > { %v4486_v28 = vrot.slane %v4485_v36, 4 }
 0x637   : > { %v4487_v49 = vadd.f32 %v4486_v28, %v4485_v36 }
 0x639   : > { %v4488_v39 = vrot.slane %v4487_v49, 2 }
 0x63b   : > { %v4489_v59 = vadd.f32 %v4488_v39, %v4487_v49 }
 0x63d   : > { %v4490_v41 = vrot.slane %v4489_v59, 1 }
 0x63f   : > { %v4491_v26 = vadd.f32 %v4490_v41, %v4489_v59 }
 0x641   : > { %v4492_v3 = vmul.f32 0.015625, %v4491_v26  ;;  %v10244_v26 = vld [vmem:[#allocation32_spill] sm:$0xff] }
 0x643   : > { %6202 = vmatmul.mubr.msk.f32.vlgmr.msra.gmra.mrb[36].mxu1 %vm10228_vm9, %v4492_v3  ;;  %v4798_v3 = vand.u32 7, %v10244_v26 }
 0x644   : > { %6206 = vmatprep.mubr.msk.f32.mxu1 %vm10229_vm5, %v10082_v19  ;;  %6205 = vmatpush3.msk.msra.mxu1 %vm10230_vm1, %v4572_v62 }
 0x645   : > { %6209 = vmatprep.subr.bf16.mxu1 %v6519_v22  ;;  %vm9227_vm7 = vcmp.gt.s32.totalorder %v4798_v3, 0  ;;  %vm9290_vm9 = vcmp.lt.s32.totalorder %v4798_v3, 7 }
 0x716   : > { %v4567_v2 = vpop.f32.mrb[36].mxu1 }
 0x717   : > { %v4568_v47 = vadd.f32 %v4567_v2, %v4497_v5  ;;  %v6203_v38 = vpop.f32.mrb[37].mxu1 }
 0x718   : > { %v10245_v38 = vld [vmem:[#allocation33_spill] sm:$0xff] }
 0x719   : > { %v4571_v0 = vmax.f32 %v4568_v47, 0.0 }
 0x71b   : > { %6207 = vmatmul.mubr.msk.f32.vlgmr.msra.gmra.mrb[38].mxu1 %vm10232_vm0, %v4571_v0  ;;  %v4805_v0 = vand.u32 7, %v10245_v38 }
 0x71c   : > { %6210 = vmatpush3.bf16.msra.mxu1 %v6519_v22 }
 0x71d   : > { %6211 = vmatprep.subr.bf16.mxu1 %v6520_v50  ;;  %vm9231_vm15 = vcmp.gt.s32.totalorder %v4805_v0, 0  ;;  %vm9294_vm1 = vcmp.lt.s32.totalorder %v4805_v0, 7 }
 0x720   : > { %6212 = vmatpush3.bf16.msra.mxu1 %v6520_v50 }
 0x721   : > { %5372 = vmatprep.subr.bf16.mxu1 %v6667_v42 }
 0x7ee   : > { %v4646_v40 = vpop.f32.mrb[38].mxu1 }
 0x7ef   : > { %v4647_v54 = vadd.f32 %v4646_v40, %v4573_v35  ;;  %v6208_v18 = vpop.f32.mrb[39].mxu1 }
 0x7f1   : > { %v5950_v34 = vmul.f32 -1.442695, %v4647_v54 }
 0x7f3   : > { %6537 = vpow2.f32 %v5950_v34 }
 0x7fd   : > { %v6538_v20 = vpop.eup %6537 }
 0x7fe   : > { %v4653_v16 = vadd.f32 1.0, %v6538_v20 }
 0x800   : > { %6539 = vrcp.f32 %v4653_v16 }
 0x80a   : > { %v6540_v21 = vpop.eup %6539 }
 0x80b   : > { %v4659_v17 = vrot.slane %v6540_v21, %v10085_v45 }
 0x80d   : > { %v4660_v44 = vmul.f32 %v4659_v17, %v8979_v57  ;;  %v4661_v14 = vmul.f32 %v4659_v17, %v9099_v29  ;;  %v4662_v31 = vmul.f32 %v4659_v17, %v9101_v1  ;;  %v4663_v48 = vmul.f32 %v4659_v17, %v9105_v37  ;;  %v6521_v1 = vld [vmem:[%s10233_s16] sm:$0xff]   ;;  %v6522_v37 = vld [vmem:[%s10233_s16 + $0x8] sm:$0xff]  }
 0x80e   : > { %v4664_v51 = vmul.f32 %v4659_v17, %v9113_v33  ;;  %v4665_v53 = vmul.f32 %v4659_v17, %v4466_v63  ;;  %v4666_v45 = vmul.f32 %v4659_v17, %v4468_v30  ;;  %v4667_v57 = vmul.f32 %v4659_v17, %v4470_v12  ;;  %v6524_v63 = vld [vmem:[%s10233_s16 + $0x18] sm:$0xff]  }
 0x80f   : > { %v4668_v10 = vpack.c.bf16 %v4661_v14, %v4660_v44  ;;  %v4669_v60 = vpack.c.bf16 %v4663_v48, %v4662_v31  ;;  %v4791_v30 = vand.u32 7, %v10239_v6  ;;  %v4784_v12 = vand.u32 7, %v10150_v4  ;;  %v6527_v48 = vld [vmem:[%s10233_s16 + $0x30] sm:$0xff]  }
 0x810   : > { %v4670_v56 = vpack.c.bf16 %v4665_v53, %v4664_v51  ;;  %v4671_v29 = vpack.c.bf16 %v4667_v57, %v4666_v45 }
 0x811   : > { %6213 = vmatprep.mubr.msk.bf16.mxu1 %vm10234_vm11, %v4668_v10  ;;  %vm9170_vm10 = vcmp.gt.s32.totalorder %v4791_v30, 0  ;;  %vm9175_vm13 = vcmp.lt.s32.totalorder %v4791_v30, 7  ;;  %vm9199_vm14 = vcmp.lt.s32.totalorder %v4784_v12, 7  ;;  %vm9240_vm4 = vcmp.gt.s32.totalorder %v4784_v12, 0  ;;  %v6528_v30 = vld [vmem:[%s10233_s16 + $0x38] sm:$0xff]  }
 0x812   : > { %6214 = vmatmul.mubr.msk.bf16.vlgmr.msra.gmra.mrb[40].mxu1 %vm10235_vm2, %v4669_v60  ;;  %v10254_v60 = vld [vmem:[#allocation36_spill] sm:$0xff] }
 0x813   : > { %6217 = vmatprep.mubr.msk.bf16.mxu1 %vm10236_vm6, %v4670_v56  ;;  %5373 = vmatpush1.bf16.msra.mxu1 %v6521_v1  ;;  %v4826_v56 = vand.u32 7, %v10254_v60 }
 0x814   : > { %5374 = vmatprep.subr.bf16.mxu1 %v6667_v42 }
 0x815   : > { %vm9264_vm3 = vcmp.lt.s32.totalorder %v4826_v56, 7  ;;  %vm9335_vm6 = vcmp.gt.s32.totalorder %v4826_v56, 0 }
 0x817   : > { %5375 = vmatpush1.bf16.msra.mxu1 %v6522_v37 }
 0x818   : > { %5376 = vmatprep.subr.bf16.mxu1 %v6667_v42 }
 0x81a   : > { %6218 = vmatmul.mubr.msk.bf16.gmra.mrb[44].mxu1 %vm10238_vm8, %v4671_v29 }
 0x81b   : > { %5377 = vmatpush1.bf16.msra.mxu1 %v6523_v43 }
 0x81c   : > { %5378 = vmatprep.subr.bf16.mxu1 %v6667_v42 }
 0x81f   : > { %5379 = vmatpush1.bf16.msra.mxu1 %v6524_v63 }
 0x820   : > { %5380 = vmatprep.subr.bf16.mxu1 %v6667_v42 }
 0x823   : > { %5381 = vmatpush1.bf16.msra.mxu1 %v6525_v46 }
 0x824   : > { %5382 = vmatprep.subr.bf16.mxu1 %v6667_v42 }
 0x827   : > { %5383 = vmatpush1.bf16.msra.mxu1 %v6526_v9 }
 0x828   : > { %5384 = vmatprep.subr.bf16.mxu1 %v6667_v42 }
 0x82b   : > { %5385 = vmatpush1.bf16.msra.mxu1 %v6527_v48 }
 0x82c   : > { %5386 = vmatprep.subr.bf16.mxu1 %v6667_v42 }
 0x82f   : > { %5387 = vmatpush1.bf16.msra.mxu1 %v6528_v30 }
 0x830   : > { %5388 = vmatprep.subr.bf16.mxu1 %v6667_v42 }
 0x8e5   : > { %v6215_v13 = vpop.f32.mrb[40].mxu1 }
 0x8e6   : > { %v4750_v24 = vadd.f32 %v6215_v13, %v5951_v23  ;;  %v4741_v33 = vpop.f32.mrb[41].mxu1  ;;  %v10255_v13 = vld [vmem:[#allocation34_spill] sm:$0xff] }
 0x8e7   : > { %v4742_v15 = vadd.f32 %v5951_v23, %v4741_v33  ;;  %v6216_v32 = vpop.f32.mrb[42].mxu1  ;;  %v10256_v33 = vld [vmem:[#allocation35_spill] sm:$0xff] }
 0x8e8   : > { %4774 = vst.msk [vmem:[#allocation5 + $0x20] sm:$0xff] %vm9800_vm12, %v4750_v24  ;;  %v4753_v8 = vadd.f32 %v6216_v32, %v5951_v23  ;;  %v4744_v61 = vpop.f32.mrb[43].mxu1  ;;  %v4812_v24 = vand.u32 7, %v10255_v13 }
 0x8e9   : > { %4772 = vst.msk [vmem:[#allocation5 + $0x10] sm:$0xff] %vm9800_vm12, %v4742_v15  ;;  %v4745_v55 = vadd.f32 %v5951_v23, %v4744_v61  ;;  %v4819_v15 = vand.u32 7, %v10256_v33 }
 0x8ea   : > { %4775 = vst.msk [vmem:[#allocation5 + $0x28] sm:$0xff] %vm9800_vm12, %v4753_v8  ;;  %vm9314_vm0 = vcmp.gt.s32.totalorder %v4812_v24, 0  ;;  %vm9327_vm2 = vcmp.lt.s32.totalorder %v4812_v24, 7 }
 0x8eb   : > { %4773 = vst.msk [vmem:[#allocation5 + $0x18] sm:$0xff] %vm9800_vm12, %v4745_v55  ;;  %vm9318_vm11 = vcmp.gt.s32.totalorder %v4819_v15, 0 }
 0x8ed   : > { %v6219_v11 = vpop.f32.mrb[44].mxu1 }
 0x8ee   : > { %v4766_v25 = vadd.f32 %v6219_v11, %v5951_v23  ;;  %v4757_v7 = vpop.f32.mrb[45].mxu1  ;;  %v10259_v11 = vld [vmem:[#allocation37_spill] sm:$0xff] }
 0x8ef   : > { %v4758_v36 = vadd.f32 %v5951_v23, %v4757_v7  ;;  %v6220_v28 = vpop.f32.mrb[46].mxu1  ;;  %v9216_v16 = vld [vmem:[#allocation5 + $0x20] sm:$0xff] }
 0x8f0   : > { %4778 = vst.msk [vmem:[#allocation5 + $0x40] sm:$0xff] %vm9800_vm12, %v4766_v25  ;;  %v4769_v39 = vadd.f32 %v6220_v28, %v5951_v23  ;;  %v4760_v59 = vpop.f32.mrb[47].mxu1  ;;  %v9181_v41 = vld [vmem:[#allocation5 + $0x10] sm:$0xff]  ;;  %v4833_v25 = vand.u32 7, %v10259_v11 }
 0x8f1   : > { %v9183_v4 = vld [vmem:[#allocation5 + $0xf] sm:$0xff]  ;;  %4776 = vst.msk [vmem:[#allocation5 + $0x30] sm:$0xff] %vm9800_vm12, %v4758_v36  ;;  %v4761_v62 = vadd.f32 %v5951_v23, %v4760_v59  ;;  %v6361_v5 = vpack.i.bf16 %v9181_v41, %v4916_v58  ;;  %v9188_v2 = vld [vmem:[#allocation5 + $0x21] sm:$0xff] }
 0x8f2   : > { %v4909_v47 = vsel %vm9170_vm10, %v9183_v4, 0.0  ;;  %4779 = vst.msk [vmem:[#allocation5 + $0x48] sm:$0xff] %vm9800_vm12, %v4769_v39  ;;  %v9195_v22 = vld [vmem:[#allocation5 + $0x18] sm:$0xff]  ;;  %v4995_v40 = vsel %vm9175_vm13, %v9188_v2, 0.0  ;;  %v9206_v54 = vld [vmem:[#allocation5 + $0x28] sm:$0xff]  ;;  %v4965_v37 = vsel %vm9240_vm4, %v9183_v4, 0.0 }
 0x8f3   : > { %v9197_v50 = vld [vmem:[#allocation5 + $0x19] sm:$0xff]  ;;  %4777 = vst.msk [vmem:[#allocation5 + $0x38] sm:$0xff] %vm9800_vm12, %v4761_v62  ;;  %6362 = vrot.lane.b32.xlu0 %v6361_v5, %s9785_s22  ;;  %v6371_v18 = vpack.i.bf16 %v9195_v22, %v9181_v41  ;;  %v6366_v21 = vpack.i.bf16 %v9206_v54, %v9216_v16  ;;  %v6381_v51 = vpack.i.bf16 %v9216_v16, %v9195_v22  ;;  %v4925_v10 = vld [vmem:[#allocation5 + $0x11] sm:$0xff]  ;;  %v4924_v1 = vld [vmem:[#allocation5 + $0x9] sm:$0xff]  ;;  %vm9341_vm8 = vcmp.gt.s32.totalorder %v4833_v25, 0 }
 0x8f4   : > { %v4994_v34 = vsel %vm9199_vm14, %v9197_v50, 0.0  ;;  %v9221_v17 = vld [vmem:[#allocation5 + $0x17] sm:$0xff]  ;;  %v9223_v44 = vld [vmem:[#allocation5 + $0x1f] sm:$0xff]  ;;  %v4957_v43 = vsel %vm9175_vm13, %v4925_v10, 0.0  ;;  %v4956_v8 = vsel %vm9199_vm14, %v4924_v1, 0.0  ;;  %v9276_v55 = vld [vmem:[#allocation5 + $0x27] sm:$0xff] }
 0x8f5   : > { %v5274_v20 = vpack.c.bf16 %v4995_v40, %v4994_v34  ;;  %6372 = vrot.lane.b32.xlu1 %v6371_v18, %s9783_s3  ;;  %v4966_v45 = vsel %vm9170_vm10, %v9221_v17, 0.0  ;;  %v4911_v57 = vsel %vm9231_vm15, %v9223_v44, 0.0  ;;  %v4910_v29 = vsel %vm9227_vm7, %v9221_v17, 0.0  ;;  %v6529_v36 = vld [vmem:[%s10233_s16 + $0x40] sm:$0xff]  }
 0x8f6   : > { %v6391_v23 = vpack.i.bf16 %v4966_v45, %v4965_v37  ;;  %v4984_v61 = vsel %vm9240_vm4, %v9221_v17, 0.0  ;;  %v4985_v63 = vsel %vm9170_vm10, %v9223_v44, 0.0  ;;  %v6386_v46 = vpack.i.bf16 %v4957_v43, %v4956_v8  ;;  %5389 = vmatpush1.bf16.msra.mxu1 %v6529_v36 }
 0x8f7   : > { %5968 = vmatprep.mubr.msk.bf16.mxu1 %vm9800_vm12, %v5274_v20  ;;  %6367 = vrot.lane.b32.xlu0 %v6366_v21, %s9783_s3  ;;  %s9787_s3 = smov 112   ;;  %v4975_v7 = vsel %vm9199_vm14, %v4925_v10, 0.0  ;;  %v4976_v58 = vsel %vm9175_vm13, %v9197_v50, 0.0  ;;  %v6401_v28 = vpack.i.bf16 %v4985_v63, %v4984_v61  ;;  %v4967_v49 = vsel %vm9227_vm7, %v9223_v44, 0.0  ;;  %v9413_v12 = vld [vmem:[#allocation5 + $0x40] sm:$0xff] }
 0x8f8   : > { %v4968_v39 = vsel %vm9231_vm15, %v9276_v55, 0.0  ;;  %v9310_v26 = vld [vmem:[#allocation5 + $0x29] sm:$0xff]  ;;  %v6396_v0 = vpack.i.bf16 %v4976_v58, %v4975_v7  ;;  %v4958_v48 = vsel %vm9290_vm9, %v9197_v50, 0.0  ;;  %vm9351_vm13 = vcmp.lt.s32.totalorder %v4819_v15, 7  ;;  %6268 = vmatprep.subr.bf16.mxu1 %v6666_v27 }
 0x8f9   : > { %6382 = vrot.lane.b32.xlu1 %v6381_v51, %s9785_s22  ;;  %v9278_v6 = vld [vmem:[#allocation5 + $0x49] sm:$0xff]  ;;  %s9796_s22 = smov 48   ;;  %v6411_v21 = vpack.i.bf16 %v4968_v39, %v4967_v49  ;;  %v9355_v60 = vld [vmem:[#allocation5 + $0x41] sm:$0xff]  ;;  %v4912_v56 = vsel %vm9314_vm0, %v9276_v55, 0.0  ;;  %v4996_v45 = vsel %vm9290_vm9, %v9310_v26, 0.0  ;;  %v4978_v63 = vsel %vm9294_vm1, %v9310_v26, 0.0 }
 0x8fa   : > { %v5000_v59 = vsel %vm9264_vm3, %v9278_v6, 0.0  ;;  %v9312_v3 = vld [vmem:[#allocation5 + $0x2f] sm:$0xff]  ;;  %v9325_v35 = vld [vmem:[#allocation5 + $0x37] sm:$0xff]  ;;  %v9333_v18 = vld [vmem:[#allocation5 + $0x3f] sm:$0xff]  ;;  %v4999_v15 = vsel %vm9351_vm13, %v9355_v60, 0.0  ;;  %v4977_v30 = vsel %vm9290_vm9, %v9188_v2, 0.0 }
 0x8fb   : > { %6377 = vrot.lane.b32.xlu0 %v6381_v51, %s9787_s3  ;;  %s9789_s3 = smov 32   ;;  %v9322_v38 = vld [vmem:[#allocation5 + $0x31] sm:$0xff]  ;;  %v9331_v40 = vld [vmem:[#allocation5 + $0x39] sm:$0xff]  ;;  %v4959_v51 = vsel %vm9294_vm1, %v9188_v2, 0.0  ;;  %v4913_v50 = vsel %vm9318_vm11, %v9312_v3, 0.0  ;;  %v4915_v13 = vsel %vm9341_vm8, %v9333_v18, 0.0  ;;  %v6426_v7 = vpack.i.bf16 %v4978_v63, %v4977_v30 }
 0x8fc   : > { %v4997_v1 = vsel %vm9294_vm1, %v9322_v38, 0.0  ;;  %v9371_v37 = vld [vmem:[#allocation5 + $0x30] sm:$0xff]  ;;  %v4998_v24 = vsel %vm9327_vm2, %v9331_v40, 0.0  ;;  %v6406_v33 = vpack.i.bf16 %v4959_v51, %v4958_v48  ;;  %v4986_v58 = vsel %vm9227_vm7, %v9276_v55, 0.0  ;;  %v9407_v36 = vld [vmem:[#allocation5 + $0x38] sm:$0xff]  ;;  %v9452_v42 = vld [vmem:[#allocation5 + $0x48] sm:$0xff] }
 0x8fd   : > { %6392 = vrot.lane.b32.xlu1 %v6391_v23, %s9796_s22  ;;  %v9373_v43 = vpack.c.bf16 %v4997_v1, %v4996_v45  ;;  %v4914_v23 = vsel %vm9335_vm6, %v9325_v35, 0.0  ;;  %v9388_v8 = vpack.c.bf16 %v4999_v15, %v4998_v24  ;;  %v6416_v61 = vpack.i.bf16 %v9371_v37, %v9206_v54 }
 0x8fe   : > { %v6436_v2 = vpack.i.bf16 %v9407_v36, %v9371_v37  ;;  %v4970_v49 = vsel %vm9318_vm11, %v9325_v35, 0.0  ;;  %v4969_v39 = vsel %vm9314_vm0, %v9312_v3, 0.0  ;;  %v4960_v48 = vsel %vm9327_vm2, %v9310_v26, 0.0 }
 0x8ff   : > { %6387 = vrot.lane.b32.xlu0 %v6386_v46, %s9789_s3  ;;  %s9791_s3 = smov 96   ;;  %v4987_v46 = vsel %vm9231_vm15, %v9312_v3, 0.0  ;;  %v4979_v51 = vsel %vm9327_vm2, %v9322_v38, 0.0  ;;  %v4980_v45 = vsel %vm9351_vm13, %v9331_v40, 0.0  ;;  %v4988_v24 = vsel %vm9314_vm0, %v9325_v35, 0.0 }
 0x900   : > { %v6431_v9 = vpack.i.bf16 %v4987_v46, %v4986_v58  ;;  %v6461_v26 = vpack.i.bf16 %v4980_v45, %v4979_v51  ;;  %vm9448_vm14 = vcmp.lt.s32.totalorder %v4833_v25, 7  ;;  %v4981_v15 = vsel %vm9264_vm3, %v9355_v60, 0.0  ;;  %v4964_v25 = vld [vmem:[#allocation5 + $0x47] sm:$0xff] }
 0x901   : > { %6402 = vrot.lane.b32.xlu1 %v6401_v28, %s9791_s3  ;;  %s9793_s3 = smov 80   ;;  %v6441_v28 = vpack.i.bf16 %v9413_v12, %v9407_v36  ;;  %v6466_v11 = vpack.i.bf16 %v9452_v42, %v9413_v12  ;;  %v4962_v63 = vsel %vm9264_vm3, %v9331_v40, 0.0  ;;  %v4963_v30 = vsel %vm9448_vm14, %v9355_v60, 0.0 }
 0x902   : > { %v4971_v58 = vsel %vm9335_vm6, %v9333_v18, 0.0  ;;  %v4990_v40 = vsel %vm9335_vm6, %v4964_v25, 0.0  ;;  %vm5228_vm9 = vcmask 392192   ;;  %vm5255_vm2 = vcmask 785408  }
 0x903   : > { %6397 = vrot.lane.b32.xlu0 %v6396_v0, %s9793_s3  ;;  %s10276_s3 = smov 32   ;;  %v4961_v0 = vsel %vm9351_vm13, %v9322_v38, 0.0  ;;  %vm5264_vm1 = vcmask 916480   ;;  %vm10288_vm10 = vcmask 523264   ;;  %vm10297_vm7 = vcmask 523264  }
 0x904   : > { %v6451_v1 = vpack.i.bf16 %v4961_v0, %v4960_v48  ;;  %vm10306_vm0 = vcmask 523264  }
 0x905   : > { %6412 = vrot.lane.b32.xlu1 %v6411_v21, %s9796_s22  ;;  %s10278_s22 = smov 16   ;;  %v6456_v21 = vpack.i.bf16 %v4970_v49, %v4969_v39  ;;  %v4992_v39 = vld [vmem:[#allocation5 + $0x50] sm:$0xff]  ;;  %vm10313_vm6 = vmmov %vm10306_vm0 }
 0x907   : > { %6407 = vrot.lane.b32.xlu0 %v6406_v33, %s10276_s3  ;;  %v4989_v33 = vsel %vm9318_vm11, %v9333_v18, 0.0  ;;  %vm10307_vm11 = vmmov %vm10306_vm0 }
 0x908   : > { %v6471_v10 = vpack.i.bf16 %v4989_v33, %v4988_v24  ;;  %v4876_v24 = vld [vmem:[#allocation5 + $0x7] sm:$0xff] }
 0x909   : > { %6417 = vrot.lane.b32.xlu1 %v6416_v61, %s10277_s2 }
 0x90b   : > { %6422 = vrot.lane.b32.xlu0 %v6416_v61, %s10278_s22  ;;  %v4982_v61 = vsel %vm9448_vm14, %v9278_v6, 0.0 }
 0x90c   : > { %v6476_v46 = vpack.i.bf16 %v4982_v61, %v4981_v15  ;;  %v4908_v61 = vsel %vm9240_vm4, %v4876_v24, 0.0  ;;  %vm10286_vm4 = vcmask 261120  }
 0x90d   : > { %6427 = vrot.lane.b32.xlu1 %v6426_v7, %s10279_s5  ;;  %v4983_v7 = vld [vmem:[#allocation5 + $0x4f] sm:$0xff]  ;;  %vm10287_vm13 = vmmov %vm10286_vm4 }
 0x90e   : > { %v4991_v60 = vsel %vm9341_vm8, %v4983_v7, 0.0 }
 0x90f   : > { %6432 = vrot.lane.b32.xlu0 %v6431_v9, %s10280_s6  ;;  %v4972_v9 = vsel %vm9341_vm8, %v4964_v25, 0.0  ;;  %v6491_v0 = vpack.i.bf16 %v4991_v60, %v4990_v40  ;;  %vm10314_vm8 = vmmov %vm10306_vm0 }
 0x910   : > { %v6486_v49 = vpack.i.bf16 %v4972_v9, %v4971_v58 }
 0x911   : > { %6437 = vrot.lane.b32.xlu1 %v6436_v2, %s10281_s8  ;;  %v6481_v2 = vpack.i.bf16 %v4963_v30, %v4962_v63 }
 0x913   : > { %6442 = vrot.lane.b32.xlu0 %v6441_v28, %s10277_s2 }
 0x915   : > { %6447 = vrot.lane.b32.xlu1 %v6441_v28, %s10278_s22  ;;  %s10285_s22 = sld [smem:[#allocation25_spill]] }
 0x917   : > { %6457 = vrot.lane.b32.xlu0 %v6456_v21, %s10282_s9  ;;  %v6496_v21 = vpack.i.bf16 %v4992_v39, %v9452_v42 }
 0x919   : > { %6452 = vrot.lane.b32.xlu1 %v6451_v1, %s10276_s3 }
 0x91b   : > { %6462 = vrot.lane.b32.xlu0 %v6461_v26, %s10279_s5  ;;  %v6530_v28 = vld [vmem:[%s10285_s22] sm:$0xff]  }
 0x91c   : > { %6221 = vmatprep.subr.bf16.mxu0 %v6530_v28 }
 0x91d   : > { %6472 = vrot.lane.b32.xlu1 %v6471_v10, %s10280_s6  ;;  %6222 = vmatpush3.bf16.msra.mxu0 %v6530_v28 }
 0x91f   : > { %6467 = vrot.lane.b32.xlu0 %v6466_v11, %s10281_s8  ;;  %s10321_s8 = sld [smem:[#allocation26_spill]] }
 0x921   : > { %6477 = vrot.lane.b32.xlu1 %v6476_v46, %s10279_s5  ;;  %s10315_s5 = sld [smem:[#allocation24_spill]] }
 0x923   : > { %6482 = vrot.lane.b32.xlu0 %v6481_v2, %s10276_s3 }
 0x925   : > { %6487 = vrot.lane.b32.xlu1 %v6486_v49, %s10282_s9  ;;  %s10320_s9 = sld [smem:[#allocation27_spill]] }
 0x927   : > { %6492 = vrot.lane.b32.xlu0 %v6491_v0, %s10280_s6  ;;  %s893_s6 = sand.u32 1, %s6625_s10  }
 0x928   : > { %s894_s3 = scalar_lea.vmem [#allocation6], %s893_s6 }
 0x929   : > { %6497 = vrot.lane.b32.xlu1 %v6496_v21, %s10277_s2  ;;  %s5986_s2 = sshll.u32 %s6852_s0, 4  ;;  %s6675_s0 = smov [#allocation6]  }
 0x92a   : > { %s6575_s13 = sshll.u32 %s6675_s0, 4  ;;  %s6576_s13 = int_to_ptr.vmem [resolvable:$false] %s6575_s13 }
 0x92b   : > { %s6577_s14 = scalar_lea.vmem %s6576_s13, 32 }
 0x965   : > { %v6363_v48 = vpop.permute.xlu0 %6362 }
 0x966   : > { %v6365_v26 = vunpack.i.h.bf16 %v6363_v48  ;;  %v6364_v10 = vunpack.i.l.bf16 %v6363_v48 }
 0x967   : > { %v6373_v51 = vpop.permute.xlu1 %6372 }
 0x968   : > { %v5212_v30 = vsel %vm9800_vm12, %v4908_v61, %v6364_v10  ;;  %v5213_v46 = vsel %vm9800_vm12, %v4909_v47, %v6365_v26  ;;  %v6375_v2 = vunpack.i.h.bf16 %v6373_v51  ;;  %v6374_v53 = vunpack.i.l.bf16 %v6373_v51  ;;  %vm10289_vm12 = vmmov %vm10288_vm10 }
 0x969   : > { %v9487_v45 = vpop.permute.xlu0 %6367 }
 0x96a   : > { %v6370_v17 = vunpack.i.h.bf16 %v9487_v45  ;;  %v6369_v14 = vunpack.i.l.bf16 %v9487_v45 }
 0x96b   : > { %v6383_v1 = vpop.permute.xlu1 %6382 }
 0x96c   : > { %v6385_v21 = vunpack.i.h.bf16 %v6383_v1  ;;  %v6384_v48 = vunpack.i.l.bf16 %v6383_v1 }
 0x96d   : > { %v6378_v33 = vpop.permute.xlu0 %6377 }
 0x96e   : > { %v6380_v10 = vunpack.i.h.bf16 %v6378_v33 }
 0x96f   : > { %v6393_v15 = vpop.permute.xlu1 %6392 }
 0x970   : > { %v6395_v7 = vunpack.i.h.bf16 %v6393_v15  ;;  %v6394_v58 = vunpack.i.l.bf16 %v6393_v15  ;;  %v6379_v15 = vunpack.i.l.bf16 %v6378_v33 }
 0x971   : > { %v6388_v11 = vpop.permute.xlu0 %6387 }
 0x972   : > { %v6390_v25 = vunpack.i.h.bf16 %v6388_v11  ;;  %v6389_v63 = vunpack.i.l.bf16 %v6388_v11 }
 0x973   : > { %v6403_v9 = vpop.permute.xlu1 %6402 }
 0x974   : > { %v5220_v28 = vsel %vm10286_vm4, %v5212_v30, %v6389_v63  ;;  %v5221_v40 = vsel %vm10287_vm13, %v5213_v46, %v6390_v25  ;;  %v6405_v51 = vunpack.i.h.bf16 %v6403_v9  ;;  %v6404_v24 = vunpack.i.l.bf16 %v6403_v9 }
 0x975   : > { %v5229_v60 = vsel %vm5228_vm9, %v5220_v28, %v6394_v58  ;;  %v5230_v49 = vsel %vm5228_vm9, %v5221_v40, %v6395_v7  ;;  %v6398_v52 = vpop.permute.xlu0 %6397  ;;  %vm10290_vm4 = vcmask 654336  }
 0x976   : > { %v6400_v39 = vunpack.i.h.bf16 %v6398_v52  ;;  %v6399_v4 = vunpack.i.l.bf16 %v6398_v52  ;;  %v5238_v47 = vsel %vm10288_vm10, %v5229_v60, %v6374_v53  ;;  %v5239_v0 = vsel %vm10289_vm12, %v5230_v49, %v6375_v2  ;;  %vm10291_vm13 = vmmov %vm10290_vm4 }
 0x977   : > { %v6413_v26 = vpop.permute.xlu1 %6412  ;;  %vm10292_vm12 = vcmask 130048  }
 0x978   : > { %v5247_v61 = vsel %vm10290_vm4, %v5238_v47, %v6399_v4  ;;  %v5248_v11 = vsel %vm10291_vm13, %v5239_v0, %v6400_v39  ;;  %v5215_v33 = vsel %vm10292_vm12, %v4911_v57, %v6385_v21  ;;  %vm10293_vm10 = vmmov %vm10292_vm12  ;;  %v6415_v28 = vunpack.i.h.bf16 %v6413_v26 }
 0x979   : > { %v5256_v25 = vsel %vm5255_vm2, %v5247_v61, %v6404_v24  ;;  %v5257_v63 = vsel %vm5255_vm2, %v5248_v11, %v6405_v51  ;;  %v6408_v30 = vpop.permute.xlu0 %6407  ;;  %v5214_v9 = vsel %vm10293_vm10, %v4910_v29, %v6384_v48  ;;  %v6414_v40 = vunpack.i.l.bf16 %v6413_v26  ;;  %vm10296_vm15 = vmmov %vm10293_vm10 }
 0x97a   : > { %v5265_v46 = vsel %vm5264_vm1, %v5256_v25, %v6379_v15  ;;  %v5266_v7 = vsel %vm5264_vm1, %v5257_v63, %v6380_v10  ;;  %v6410_v58 = vunpack.i.h.bf16 %v6408_v30  ;;  %v6409_v1 = vunpack.i.l.bf16 %v6408_v30  ;;  %vm10298_vm12 = vmmov %vm10297_vm7 }
 0x97b   : > { %v5273_v2 = vpack.c.bf16 %v5266_v7, %v5265_v46  ;;  %v6418_v53 = vpop.permute.xlu1 %6417  ;;  %vm10294_vm4 = vcmask 261120   ;;  %vm10299_vm10 = vcmask 654336  }
 0x97c   : > { %v5223_v60 = vsel %vm10294_vm4, %v5215_v33, %v6410_v58  ;;  %vm10295_vm13 = vmmov %vm10294_vm4  ;;  %v6420_v26 = vunpack.i.h.bf16 %v6418_v53 }
 0x97d   : > { %v5222_v49 = vsel %vm10295_vm13, %v5214_v9, %v6409_v1  ;;  %v6423_v52 = vpop.permute.xlu0 %6422  ;;  %5405 = vmatmul.mubr.bf16.vlgmr.msra.gmra.mrb[48].mxu1 %v5273_v2  ;;  %v5232_v31 = vsel %vm5228_vm9, %v5223_v60, %v6415_v28  ;;  %vm10300_vm4 = vmmov %vm10299_vm10 }
 0x97e   : > { %v5231_v44 = vsel %vm5228_vm9, %v5222_v49, %v6414_v40  ;;  %5969 = vmatprep.mubr.msk.bf16.mxu1 %vm10296_vm15, %v9373_v43  ;;  %v5241_v47 = vsel %vm10298_vm12, %v5232_v31, %v6370_v17  ;;  %v6419_v43 = vunpack.i.l.bf16 %v6418_v53  ;;  %v6425_v46 = vunpack.i.h.bf16 %v6423_v52  ;;  %vm10301_vm13 = vmmov %vm10296_vm15  ;;  %v4993_v31 = vld [vmem:[#allocation5 + $0x51] sm:$0xff] }
 0x97f   : > { %v6428_v57 = vpop.permute.xlu1 %6427  ;;  %v5240_v4 = vsel %vm10297_vm7, %v5231_v44, %v6369_v14  ;;  %v6424_v7 = vunpack.i.l.bf16 %v6423_v52  ;;  %vm10302_vm15 = vmmov %vm10301_vm13  ;;  %vm10304_vm12 = vcmask 261120  }
 0x980   : > { %v6430_v29 = vunpack.i.h.bf16 %v6428_v57  ;;  %v6429_v39 = vunpack.i.l.bf16 %v6428_v57  ;;  %v5217_v33 = vsel %vm10302_vm15, %v4913_v50, %v6425_v46  ;;  %vm10303_vm7 = vmmov %vm10301_vm13 }
 0x981   : > { %v6433_v0 = vpop.permute.xlu0 %6432  ;;  %v5216_v9 = vsel %vm10303_vm7, %v4912_v56, %v6424_v7  ;;  %vm10310_vm15 = vmmov %vm10303_vm7 }
 0x982   : > { %v5249_v21 = vsel %vm10299_vm10, %v5240_v4, %v6429_v39  ;;  %v5250_v48 = vsel %vm10300_vm4, %v5241_v47, %v6430_v29  ;;  %v6435_v51 = vunpack.i.h.bf16 %v6433_v0  ;;  %v6434_v24 = vunpack.i.l.bf16 %v6433_v0  ;;  %vm10305_vm10 = vmmov %vm10304_vm12 }
 0x983   : > { %v6438_v10 = vpop.permute.xlu1 %6437  ;;  %vm10311_vm3 = vmmov %vm10305_vm10 }
 0x984   : > { %v5258_v15 = vsel %vm5255_vm2, %v5249_v21, %v6434_v24  ;;  %v5259_v45 = vsel %vm5255_vm2, %v5250_v48, %v6435_v51  ;;  %v6440_v28 = vunpack.i.h.bf16 %v6438_v10  ;;  %v6439_v40 = vunpack.i.l.bf16 %v6438_v10 }
 0x985   : > { %v6443_v61 = vpop.permute.xlu0 %6442  ;;  %v5267_v11 = vsel %vm5264_vm1, %v5258_v15, %v6419_v43  ;;  %v5268_v25 = vsel %vm5264_vm1, %v5259_v45, %v6420_v26  ;;  %v5001_v51 = vsel %vm9448_vm14, %v4993_v31, 0.0  ;;  %vm10309_vm14 = vmmov %vm10303_vm7 }
 0x986   : > { %v5275_v63 = vpack.c.bf16 %v5268_v25, %v5267_v11  ;;  %v6445_v29 = vunpack.i.h.bf16 %v6443_v61  ;;  %v6444_v39 = vunpack.i.l.bf16 %v6443_v61  ;;  %v5280_v11 = vpack.c.bf16 %v5001_v51, %v5000_v59 }
 0x987   : > { %v6448_v30 = vpop.permute.xlu1 %6447 }
 0x988   : > { %5413 = vmatmul.mubr.bf16.gmra.mrb[52].mxu1 %v5275_v63  ;;  %v6450_v24 = vunpack.i.h.bf16 %v6448_v30  ;;  %v6449_v26 = vunpack.i.l.bf16 %v6448_v30 }
 0x989   : > { %v6458_v58 = vpop.permute.xlu0 %6457  ;;  %5970 = vmatprep.mubr.msk.bf16.mxu1 %vm10301_vm13, %v9388_v8  ;;  %vm10308_vm13 = vmmov %vm10300_vm4 }
 0x98a   : > { %v6460_v60 = vunpack.i.h.bf16 %v6458_v58  ;;  %v6459_v49 = vunpack.i.l.bf16 %v6458_v58  ;;  %v5219_v38 = vsel %vm10309_vm14, %v4915_v13, %v6450_v24  ;;  %v5218_v30 = vsel %vm10310_vm15, %v4914_v23, %v6449_v26  ;;  %vm10329_vm15 = vmmov %vm10313_vm6 }
 0x98b   : > { %v6453_v1 = vpop.permute.xlu1 %6452 }
 0x98c   : > { %v6455_v2 = vunpack.i.h.bf16 %v6453_v1  ;;  %v6454_v53 = vunpack.i.l.bf16 %v6453_v1 }
 0x98d   : > { %v6463_v8 = vpop.permute.xlu0 %6462 }
 0x98e   : > { %v5225_v52 = vsel %vm10304_vm12, %v5217_v33, %v6455_v2  ;;  %v5224_v5 = vsel %vm10305_vm10, %v5216_v9, %v6454_v53  ;;  %v6465_v3 = vunpack.i.h.bf16 %v6463_v8  ;;  %v6464_v44 = vunpack.i.l.bf16 %v6463_v8  ;;  %vm10312_vm12 = vmmov %vm10311_vm3 }
 0x98f   : > { %v5234_v50 = vsel %vm5228_vm9, %v5225_v52, %v6460_v60  ;;  %v5233_v62 = vsel %vm5228_vm9, %v5224_v5, %v6459_v49  ;;  %v6473_v55 = vpop.permute.xlu1 %6472  ;;  %vm10316_vm10 = vmmov %vm10300_vm4 }
 0x990   : > { %v5242_v56 = vsel %vm10306_vm0, %v5233_v62, %v6439_v40  ;;  %v5243_v17 = vsel %vm10307_vm11, %v5234_v50, %v6440_v28  ;;  %v6475_v14 = vunpack.i.h.bf16 %v6473_v55  ;;  %v6474_v57 = vunpack.i.l.bf16 %v6473_v55  ;;  %vm10317_vm0 = vmmov %vm10300_vm4  ;;  %v6531_v50 = vld [vmem:[%s10285_s22 + $0x8] sm:$0xff]   ;;  %v5958_v62 = vld [vmem:[%s10315_s5] ss:$0 sm:$0xff]  ;;  %s5780_s5 = sshll.u32 %s894_s3, 4  ;;  %s9637_s5 = int_to_ptr.vmem [resolvable:$true] %s5780_s5 }
 0x991   : > { %v5251_v4 = vsel %vm10300_vm4, %v5242_v56, %v6464_v44  ;;  %v5252_v47 = vsel %vm10308_vm13, %v5243_v17, %v6465_v3  ;;  %v6468_v0 = vpop.permute.xlu0 %6467  ;;  %6223 = vmatprep.subr.bf16.mxu0 %v6531_v50  ;;  %vm10324_vm11 = vmmov %vm10303_vm7  ;;  %p6578_p0 = scmp.lt.s32.totalorder %s9637_s5, %s6576_s13 }
 0x992   : > { %v5260_v21 = vsel %vm5255_vm2, %v5251_v4, %v6474_v57  ;;  %v5261_v48 = vsel %vm5255_vm2, %v5252_v47, %v6475_v14  ;;  %v6470_v20 = vunpack.i.h.bf16 %v6468_v0  ;;  %v6469_v58 = vunpack.i.l.bf16 %v6468_v0  ;;  %6224 = vmatpush3.bf16.msra.mxu0 %v6531_v50  ;;  %vm10325_vm4 = vmmov %vm10303_vm7 }
 0x993   : > { %v6478_v43 = vpop.permute.xlu1 %6477  ;;  %v5269_v10 = vsel %vm5264_vm1, %v5260_v21, %v6444_v39  ;;  %v5270_v15 = vsel %vm5264_vm1, %v5261_v48, %v6445_v29  ;;  %vm10326_vm13 = vmmov %vm10325_vm4 }
 0x994   : > { %v5277_v45 = vpack.c.bf16 %v5270_v15, %v5269_v10  ;;  %v6480_v18 = vunpack.i.h.bf16 %v6478_v43  ;;  %v6479_v1 = vunpack.i.l.bf16 %v6478_v43  ;;  %vm10327_vm14 = vmmov %vm10325_vm4 }
 0x995   : > { %v6483_v61 = vpop.permute.xlu0 %6482 }
 0x996   : > { %v6485_v25 = vunpack.i.h.bf16 %v6483_v61  ;;  %v6484_v63 = vunpack.i.l.bf16 %v6483_v61  ;;  %5421 = vmatmul.mubr.bf16.gmra.mrb[56].mxu1 %v5277_v45 }
 0x997   : > { %v6488_v46 = vpop.permute.xlu1 %6487  ;;  %5971 = vmatprep.mubr.msk.bf16.mxu1 %vm10303_vm7, %v5280_v11  ;;  %vm10330_vm7 = vmmov %vm10313_vm6 }
 0x998   : > { %v5226_v32 = vsel %vm10311_vm3, %v5218_v30, %v6484_v63  ;;  %v5227_v6 = vsel %vm10312_vm12, %v5219_v38, %v6485_v25  ;;  %v6490_v59 = vunpack.i.h.bf16 %v6488_v46  ;;  %v6489_v7 = vunpack.i.l.bf16 %v6488_v46 }
 0x999   : > { %v6493_v13 = vpop.permute.xlu0 %6492 }
 0x99a   : > { %v5235_v34 = vsel %vm5228_vm9, %v5226_v32, %v6489_v7  ;;  %v5236_v35 = vsel %vm5228_vm9, %v5227_v6, %v6490_v59  ;;  %v6495_v33 = vunpack.i.h.bf16 %v6493_v13  ;;  %v6494_v23 = vunpack.i.l.bf16 %v6493_v13  ;;  %vm10318_vm9 = vmmov %vm10311_vm3  ;;  %v6532_v13 = vld [vmem:[%s10320_s9] sm:$0xff]   ;;  %s9635_s9 = scalar_lea.hbm %s6829_s4, %s5986_s2 }
 0x99b   : > { %v5244_v9 = vsel %vm10313_vm6, %v5235_v34, %v6469_v58  ;;  %v5245_v2 = vsel %vm10314_vm8, %v5236_v35, %v6470_v20  ;;  %v6498_v53 = vpop.permute.xlu1 %6497  ;;  %6233 = vmatprep.subr.bf16.mxu0 %v6532_v13  ;;  %v5972_v34 = vld [vmem:[%s10321_s8] ss:$0 sm:$0xff]  ;;  %s5768_s8 = scalar_lea.sflag [#allocation7], %s893_s6 }
 0x99c   : > { %v5253_v28 = vsel %vm10316_vm10, %v5244_v9, %v6479_v1  ;;  %v5254_v40 = vsel %vm10317_vm0, %v5245_v2, %v6480_v18  ;;  %v6500_v60 = vunpack.i.h.bf16 %v6498_v53  ;;  %v6499_v49 = vunpack.i.l.bf16 %v6498_v53 }
 0x99d   : > { %v5262_v8 = vsel %vm5255_vm2, %v5253_v28, %v6494_v23  ;;  %v5263_v52 = vsel %vm5255_vm2, %v5254_v40, %v6495_v33 }
 0x99e   : > { %v5271_v5 = vsel %vm5264_vm1, %v5262_v8, %v6499_v49  ;;  %v5272_v3 = vsel %vm5264_vm1, %v5263_v52, %v6500_v60  ;;  %vm10322_vm1 = vmmov %vm10311_vm3 }
 0x99f   : > { %v5279_v44 = vpack.c.bf16 %v5272_v3, %v5271_v5  ;;  %vm10323_vm2 = vmmov %vm10322_vm1 }
 0x9a1   : > { %5429 = vmatmul.mubr.bf16.gmra.mrb[60].mxu1 %v5279_v44 }
 0x9a2   : > { %6259 = vmatprep.mubr.msk.f32.mxu1 %vm10229_vm5, %v10082_v19  ;;  %vm10319_vm5 = vmmov %vm10311_vm3 }
 0x9a3   : > { %vm10331_vm3 = vmmov %vm10313_vm6 }
 0x9a4   : > { %vm10332_vm12 = vmmov %vm10331_vm3 }
 0x9a5   : > { %vm10333_vm6 = vmmov %vm10331_vm3 }
 0x9a6   : > { %vm10334_vm8 = vmmov %vm10331_vm3 }
 0x9a7   : > { %vm10335_vm10 = vmmov %vm10331_vm3 }
 0x9a8   : > { %vm10336_vm0 = vmmov %vm10331_vm3 }
 0xa50   : > { %v5406_v55 = vpop.f32.mrb[48].mxu1 }
 0xa51   : > { %v5407_v31 = vadd.f32 %v5958_v62, %v5406_v55  ;;  %v5408_v56 = vpop.f32.mrb[49].mxu1 }
 0xa52   : > { %v5409_v17 = vpop.f32.mrb[50].mxu1 }
 0xa53   : > { %v5410_v14 = vadd.f32 %v5958_v62, %v5409_v17  ;;  %v5411_v57 = vpop.f32.mrb[51].mxu1  ;;  %v5437_v29 = vmax.f32 %v5407_v31, 0.0 }
 0xa55   : > { %v5438_v39 = vmax.f32 %v5410_v14, 0.0 }
 0xa57   : > { %v5445_v4 = vpack.c.bf16 %v5438_v39, %v5437_v29  ;;  %v5683_v39 = vld [vmem:[%s6819_s20] sm:$0xff] }
 0xa59   : > { %6225 = vmatprep.mubr.msk.bf16.mxu0 %vm10318_vm9, %v5445_v4  ;;  %v5684_v4 = vld [vmem:[%s6819_s20 + $0x8] sm:$0xff]  ;;  %vm10337_vm9 = vmmov %vm10336_vm0 }
 0xa5b   : > { %v5414_v47 = vpop.f32.mrb[52].mxu1 }
 0xa5c   : > { %v5415_v0 = vadd.f32 %v5958_v62, %v5414_v47  ;;  %v5416_v21 = vpop.f32.mrb[53].mxu1  ;;  %v6269_v47 = vpack.c.bf16 %v5684_v4, %v5683_v39 }
 0xa5d   : > { %v5417_v48 = vpop.f32.mrb[54].mxu1 }
 0xa5e   : > { %v5418_v19 = vadd.f32 %v5958_v62, %v5417_v48  ;;  %v5419_v51 = vpop.f32.mrb[55].mxu1  ;;  %v5439_v24 = vmax.f32 %v5415_v0, 0.0  ;;  %6270 = vmatpush3.bf16.msra.mxu1 %v6269_v47  ;;  %v5689_v48 = vld [vmem:[%s6819_s20 + $0x30] sm:$0xff] }
 0xa5f   : > { %6271 = vmatprep.subr.bf16.mxu1 %v6666_v27 }
 0xa60   : > { %v5440_v26 = vmax.f32 %v5418_v19, 0.0  ;;  %v5690_v19 = vld [vmem:[%s6819_s20 + $0x38] sm:$0xff] }
 0xa61   : > { %v6278_v51 = vpack.c.bf16 %v5690_v19, %v5689_v48 }
 0xa62   : > { %v5446_v43 = vpack.c.bf16 %v5440_v26, %v5439_v24  ;;  %v5979_v24 = vld [vmem:[%s10328_s12] ss:$0 sm:$0xff]  ;;  %s6571_s12 = scalar_lea.vmem %s9637_s5, 16 }
 0xa63   : > { %p6572_p11 = scmp.ne.s32.totalorder %s9637_s5, %s6571_s12  ;;  %p6579_p1 = scmp.lt.s32.totalorder %s6577_s14, %s6571_s12 }
 0xa64   : > { %6226 = vmatmul.mubr.msk.bf16.vlgmr.msra.gmra.mrb[64].mxu0 %vm10319_vm5, %v5446_v43  ;;  %vm5765_vm5 = vcmask 73728  }
 0xa65   : > { %6234 = vmatpush3.bf16.msra.mxu0 %v6532_v13  ;;  %p6573_p12 = pnand %p6572_p11, %p6869_p5  ;;  %p6580_p2 = por %p6579_p1, %p6578_p0 }
 0xa67   : > { %p6574_p13 = pneg %p6573_p12 }
 0xa69   : > { %v5422_v10 = vpop.f32.mrb[56].mxu1  ;;  %p6581_p3 = pnand %p6580_p2, %p6574_p13 }
 0xa6a   : > { %v5423_v15 = vadd.f32 %v5958_v62, %v5422_v10  ;;  %v5424_v45 = vpop.f32.mrb[57].mxu1 }
 0xa6b   : > { %v5425_v61 = vpop.f32.mrb[58].mxu1 }
 0xa6c   : > { %v5426_v11 = vadd.f32 %v5958_v62, %v5425_v61  ;;  %v5427_v25 = vpop.f32.mrb[59].mxu1  ;;  %v5441_v63 = vmax.f32 %v5423_v15, 0.0 }
 0xa6e   : > { %v5442_v38 = vmax.f32 %v5426_v11, 0.0 }
 0xa70   : > { %v5447_v30 = vpack.c.bf16 %v5442_v38, %v5441_v63 }
 0xa72   : > { %6229 = vmatprep.mubr.msk.bf16.mxu0 %vm10322_vm1, %v5447_v30 }
 0xa74   : > { %v5430_v46 = vpop.f32.mrb[60].mxu1 }
 0xa75   : > { %v5431_v32 = vadd.f32 %v5958_v62, %v5430_v46  ;;  %v5432_v6 = vpop.f32.mrb[61].mxu1 }
 0xa76   : > { %v5433_v59 = vpop.f32.mrb[62].mxu1 }
 0xa77   : > { %v5434_v7 = vadd.f32 %v5958_v62, %v5433_v59  ;;  %v5435_v20 = vpop.f32.mrb[63].mxu1  ;;  %v5443_v58 = vmax.f32 %v5431_v32, 0.0 }
 0xa79   : > { %v5444_v18 = vmax.f32 %v5434_v7, 0.0 }
 0xa7b   : > { %v5448_v1 = vpack.c.bf16 %v5444_v18, %v5443_v58 }
 0xa7d   : > { %6230 = vmatmul.mubr.msk.bf16.gmra.mrb[68].mxu0 %vm10323_vm2, %v5448_v1 }
 0xb37   : > { %v6227_v35 = vpop.f32.mrb[64].mxu0 }
 0xb38   : > { %v5527_v33 = vadd.f32 %v6227_v35, %v5972_v34  ;;  %v5518_v23 = vpop.f32.mrb[65].mxu0 }
 0xb39   : > { %v5519_v9 = vadd.f32 %v5972_v34, %v5518_v23  ;;  %v6228_v2 = vpop.f32.mrb[66].mxu0 }
 0xb3a   : > { %v5530_v53 = vadd.f32 %v6228_v2, %v5972_v34  ;;  %v5521_v28 = vpop.f32.mrb[67].mxu0  ;;  %v5551_v60 = vadd.f32 %v5527_v33, %v9216_v16 }
 0xb3b   : > { %v5522_v40 = vadd.f32 %v5972_v34, %v5521_v28  ;;  %v5549_v8 = vadd.f32 %v5519_v9, %v9181_v41 }
 0xb3c   : > { %v5552_v49 = vadd.f32 %v5530_v53, %v9206_v54 }
 0xb3d   : > { %v5550_v52 = vadd.f32 %v5522_v40, %v9195_v22 }
 0xb3e   : > { %v5558_v5 = vpack.c.bf16 %v5552_v49, %v5551_v60 }
 0xb3f   : > { %v5557_v3 = vpack.c.bf16 %v5550_v52, %v5549_v8 }
 0xb41   : > { %6235 = vmatprep.mubr.msk.bf16.mxu0 %vm10324_vm11, %v5557_v3 }
 0xb42   : > { %6236 = vmatmul.mubr.msk.bf16.vlgmr.msra.gmra.mrb[72].mxu0 %vm10325_vm4, %v5558_v5 }
 0xb50   : > { %v6231_v44 = vpop.f32.mrb[68].mxu0 }
 0xb51   : > { %v5543_v50 = vadd.f32 %v6231_v44, %v5972_v34  ;;  %v5534_v62 = vpop.f32.mrb[69].mxu0 }
 0xb52   : > { %v5535_v55 = vadd.f32 %v5972_v34, %v5534_v62  ;;  %v6232_v31 = vpop.f32.mrb[70].mxu0 }
 0xb53   : > { %v5546_v16 = vadd.f32 %v6232_v31, %v5972_v34  ;;  %v5537_v54 = vpop.f32.mrb[71].mxu0  ;;  %v5555_v22 = vadd.f32 %v5543_v50, %v9413_v12  ;;  %v5685_v12 = vld [vmem:[%s6819_s20 + $0x10] sm:$0xff] }
 0xb54   : > { %v5538_v41 = vadd.f32 %v5972_v34, %v5537_v54  ;;  %v5553_v17 = vadd.f32 %v5535_v55, %v9371_v37  ;;  %v5687_v37 = vld [vmem:[%s6819_s20 + $0x20] sm:$0xff] }
 0xb55   : > { %v5556_v56 = vadd.f32 %v5546_v16, %v9452_v42  ;;  %v5686_v42 = vld [vmem:[%s6819_s20 + $0x18] sm:$0xff] }
 0xb56   : > { %v5554_v14 = vadd.f32 %v5538_v41, %v9407_v36  ;;  %v6272_v0 = vpack.c.bf16 %v5686_v42, %v5685_v12  ;;  %v5688_v36 = vld [vmem:[%s6819_s20 + $0x28] sm:$0xff] }
 0xb57   : > { %v5560_v57 = vpack.c.bf16 %v5556_v56, %v5555_v22  ;;  %v6275_v21 = vpack.c.bf16 %v5688_v36, %v5687_v37  ;;  %v5691_v56 = vld [vmem:[%s6824_s27] sm:$0x1] }
 0xb58   : > { %v5559_v29 = vpack.c.bf16 %v5554_v14, %v5553_v17  ;;  %6273 = vmatpush3.bf16.msra.mxu1 %v6272_v0 }
 0xb59   : > { %6274 = vmatprep.subr.bf16.mxu1 %v6666_v27 }
 0xb5a   : > { %6239 = vmatprep.mubr.msk.bf16.mxu0 %vm10326_vm13, %v5559_v29 }
 0xb5b   : > { %6240 = vmatmul.mubr.msk.bf16.gmra.mrb[76].mxu0 %vm10327_vm14, %v5560_v57 }
 0xb5c   : > { %6276 = vmatpush3.bf16.msra.mxu1 %v6275_v21 }
 0xb5d   : > { %6277 = vmatprep.subr.bf16.mxu1 %v6666_v27 }
 0xb60   : > { %6279 = vmatpush3.bf16.msra.mxu1 %v6278_v51 }
 0xc15   : > { %v6237_v26 = vpop.f32.mrb[72].mxu0 }
 0xc16   : > { %v5622_v43 = vpop.f32.mrb[73].mxu0  ;;  %v5631_v10 = vadd.f32 %v6237_v26, %v5979_v24 }
 0xc17   : > { %v5623_v15 = vadd.f32 %v5979_v24, %v5622_v43  ;;  %v6238_v45 = vpop.f32.mrb[74].mxu0 }
 0xc18   : > { %v5625_v61 = vpop.f32.mrb[75].mxu0  ;;  %v5634_v25 = vadd.f32 %v6238_v45, %v5979_v24  ;;  %v5655_v38 = vmax.f32 %v5631_v10, 0.0 }
 0xc19   : > { %v5653_v11 = vmax.f32 %v5623_v15, 0.0  ;;  %v5626_v63 = vadd.f32 %v5979_v24, %v5625_v61 }
 0xc1a   : > { %v5656_v32 = vmax.f32 %v5634_v25, 0.0  ;;  %v5664_v27 = vsel %vm10331_vm3, %v5655_v38, 0.0 }
 0xc1b   : > { %v5654_v30 = vmax.f32 %v5626_v63, 0.0  ;;  %v5661_v46 = vsel %vm10329_vm15, %v5653_v11, 0.0 }
 0xc1c   : > { %v5666_v20 = vsel %vm10332_vm12, %v5656_v32, 0.0 }
 0xc1d   : > { %v5662_v6 = vsel %vm10330_vm7, %v5654_v30, 0.0 }
 0xc1e   : > { %v5663_v59 = vadd.f32 %v5662_v6, %v5661_v46 }
 0xc20   : > { %v5665_v7 = vadd.f32 %v5664_v27, %v5663_v59 }
 0xc22   : > { %v5667_v58 = vadd.f32 %v5666_v20, %v5665_v7 }
 0xc2e   : > { %v6241_v18 = vpop.f32.mrb[76].mxu0 }
 0xc2f   : > { %v5638_v1 = vpop.f32.mrb[77].mxu0  ;;  %v5647_v13 = vadd.f32 %v6241_v18, %v5979_v24 }
 0xc30   : > { %v5639_v34 = vadd.f32 %v5979_v24, %v5638_v1  ;;  %v6242_v35 = vpop.f32.mrb[78].mxu0 }
 0xc31   : > { %v5641_v33 = vpop.f32.mrb[79].mxu0  ;;  %v5650_v9 = vadd.f32 %v6242_v35, %v5979_v24  ;;  %v5659_v53 = vmax.f32 %v5647_v13, 0.0 }
 0xc32   : > { %v5657_v23 = vmax.f32 %v5639_v34, 0.0  ;;  %v5642_v2 = vadd.f32 %v5979_v24, %v5641_v33 }
 0xc33   : > { %v5660_v49 = vmax.f32 %v5650_v9, 0.0  ;;  %v5672_v5 = vsel %vm10335_vm10, %v5659_v53, 0.0 }
 0xc34   : > { %v5668_v28 = vsel %vm10333_vm6, %v5657_v23, 0.0  ;;  %v5658_v40 = vmax.f32 %v5642_v2, 0.0 }
 0xc35   : > { %v5669_v60 = vadd.f32 %v5668_v28, %v5667_v58  ;;  %v5674_v44 = vsel %vm10336_vm0, %v5660_v49, 0.0 }
 0xc36   : > { %v5670_v8 = vsel %vm10334_vm8, %v5658_v40, 0.0 }
 0xc37   : > { %v5671_v52 = vadd.f32 %v5670_v8, %v5669_v60 }
 0xc39   : > { %v5673_v3 = vadd.f32 %v5672_v5, %v5671_v52 }
 0xc3b   : > { %v5675_v50 = vadd.f32 %v5674_v44, %v5673_v3 }
 0xc3d   : > { %v5676_v62 = vrot.slane %v5675_v50, 4 }
 0xc3f   : > { %v5677_v55 = vadd.f32 %v5676_v62, %v5675_v50 }
 0xc41   : > { %v5678_v31 = vrot.slane %v5677_v55, 2 }
 0xc43   : > { %v5679_v16 = vadd.f32 %v5678_v31, %v5677_v55 }
 0xc45   : > { %v5680_v54 = vrot.slane %v5679_v16, 1 }
 0xc47   : > { %v5681_v41 = vadd.f32 %v5680_v54, %v5679_v16 }
 0xc49   : > { %v5682_v22 = vmul.f32 0.015625, %v5681_v41 }
 0xc4b   : > { %6260 = vmatmul.mubr.msk.f32.vlgmr.msra.gmra.mrb[64].mxu1 %vm10337_vm9, %v5682_v22 }
 0xd1e   : > { %v5761_v17 = vpop.f32.mrb[64].mxu1 }
 0xd1f   : > { %v5762_v14 = vadd.f32 %v5761_v17, %v5691_v56  ;;  %v6261_v57 = vpop.f32.mrb[65].mxu1 }
 0xd21   : > { %5766 = vst.msk [vmem:[%s894_s3] sm:$0x1] %vm5765_vm5, %v5762_v14 }
 0xd22   : > { %6584 = shalt.err (!%p6581_p3)
}
 0xd23   : > { %s6585_s6 = scalar_lea.hbm %s9635_s9, 16  ;;  %s6589_s2 = scalar_lea.hbm %s6829_s4, 32 }
 0xd24   : > { %p6586_p4 = scmp.ne.s32.totalorder %s9635_s9, %s6585_s6  ;;  %p6590_p9 = scmp.lt.u32.totalorder %s9635_s9, %s6829_s4 }
 0xd25   : > { %p6591_p10 = scmp.lt.u32.totalorder %s6589_s2, %s6585_s6  ;;  %p6593_p12 = scmp.lt.u32.totalorder %s6585_s6, %s9635_s9 }
 0xd26   : > { %p6587_p7 = pnand %p6586_p4, %p6869_p5 }
 0xd27   : > { %p6592_p11 = por %p6591_p10, %p6590_p9 }
 0xd28   : > { %p6588_p8 = pneg %p6587_p7 }
 0xd29   : > { %p6594_p0 = por %p6593_p12, %p6592_p11 }
 0xd2b   : > { %p6595_p13 = pnand %p6594_p0, %p6588_p8 }
 0xd2d   : > { %6598 = shalt.err (!%p6595_p13)
}
 0xd2e   : > { %6282 = dma.vmem_to_hbm [thread:$0]  (%p6869_p5), %s9637_s5, 16, %s9635_s9, %s5768_s8  }
 0xd2f PF: > { %p6288_p1 = scmp.ge.s32.totalorder %s6633_s15, 2  ;;  %s5792_s13 = sand.u32 1, %s6621_s7  }
 0xd30   : > { %s5793_s14 = scalar_lea.sflag [#allocation7], %s5792_s13 }
 0xd31   : > { %p6285_p2 = pnand %p6288_p1, %p6873_p6 }
 0xd33   : > { %6616 = dma.done.wait (!%p6285_p2), %s5793_s14, 16  }
 0xd34   : > { %6618 = vsyncadd (!%p6285_p2), %s5793_s14, 4294967280  ;;  %p69_p3 = scmp.ge.s32.totalorder %s6856_s18, 4   ;;  %s10338_s7 = smov %s6625_s10 }
 0xd35   : > { %s10339_s10 = smov %s6629_s11  ;;  %s10340_s11 = smov %s6867_s26 }
 0xd36   : > { %s10341_s15 = smov %s6856_s18  ;;  %71 = sbr.rel (!%p69_p3) target bundleno = 61 (0x3d), region = 207 }
 0xd3d   :  { %5797 = vsyncpa [#allocation7], 1 }
 0xd3e   :  { %5799 = vsyncpa [#allocation7 + $0x1], 1 }

</bundles_post_ra>
